<compile_context>
chip_gen: v5e
topology: v5e:2x2
jax: 0.10.0
libtpu: 0.0.40
codegen_flags: <defaults>
</compile_context>

<pallas_src>
import functools

import jax
import jax.numpy as jnp
import numpy as np
from jax.experimental import pallas as pl
from jax.experimental.pallas import tpu as pltpu


# ----------------------------------------------------------------------------
# Pallas kernel: hoisted input projections + fused bidirectional GRU recurrence
# + masked-average pooling, for one batch tile.
# ----------------------------------------------------------------------------
def gru_encoder_kernel(x_ref, m_ref, inv_ref,
                       wi_ref, whf_ref, whb_ref, bgi_ref, bhn_ref,
                       out_ref):
    T, Bt, E = x_ref.shape
    Hd = whf_ref.shape[-1]            # per-direction hidden size

    # ---- Hoisted input projections (one big matmul per gate, done once) ----
    # Gate stacking order in wi/bgi: [f_r, f_z, f_n, b_r, b_z, b_n].
    # bgi already contains bias_ih (+ bias_hh for r/z gates).
    x2d = x_ref[...].reshape(T * Bt, E)                       # bf16
    gi = []
    for g in range(6):
        p = jnp.dot(x2d, wi_ref[g], preferred_element_type=jnp.float32)
        gi.append((p + bgi_ref[g]).reshape(T, Bt, Hd))        # (T, Bt, Hd) f32

    # Recurrent weights / n-gate hidden biases (loads hoisted out of the loop).
    whf = [whf_ref[g] for g in range(3)]                      # (Hd, Hd) bf16
    whb = [whb_ref[g] for g in range(3)]
    bhn_f = bhn_ref[0]                                        # (1, Hd) f32
    bhn_b = bhn_ref[1]

    mask = m_ref[...]                                         # (Bt, T) f32

    def step(h, gi_r, gi_z, gi_n, wh, bhn):
        # PyTorch GRU cell (gate order r, z, n); biases folded as noted above.
        hb16 = h.astype(jnp.bfloat16)
        gh_r = jnp.dot(hb16, wh[0], preferred_element_type=jnp.float32)
        gh_z = jnp.dot(hb16, wh[1], preferred_element_type=jnp.float32)
        gh_n = jnp.dot(hb16, wh[2], preferred_element_type=jnp.float32)
        r = jax.nn.sigmoid(gi_r + gh_r)
        z = jax.nn.sigmoid(gi_z + gh_z)
        n = jnp.tanh(gi_n + r * (gh_n + bhn))
        return (1.0 - z) * n + z * h

    hf = jnp.zeros((Bt, Hd), jnp.float32)
    hb = jnp.zeros((Bt, Hd), jnp.float32)
    accf = jnp.zeros((Bt, Hd), jnp.float32)
    accb = jnp.zeros((Bt, Hd), jnp.float32)

    # Fused fwd/bwd recurrence, fully unrolled (T static & small) so the LLO
    # scheduler can interleave the 6 small matmuls + VPU work across steps.
    # Masked update == pack_padded_sequence semantics (padded steps leave the
    # state untouched and contribute 0 to the pooled sum).
    for i in range(T):
        tf = i
        tb = T - 1 - i
        mf = mask[:, tf:tf + 1]                               # (Bt, 1)
        mb = mask[:, tb:tb + 1]
        hf_new = step(hf, gi[0][tf], gi[1][tf], gi[2][tf], whf, bhn_f)
        hb_new = step(hb, gi[3][tb], gi[4][tb], gi[5][tb], whb, bhn_b)
        hf = mf * hf_new + (1.0 - mf) * hf
        hb = mb * hb_new + (1.0 - mb) * hb
        accf = accf + mf * hf
        accb = accb + mb * hb

    inv = inv_ref[...]                                        # (Bt, 1)
    # Single concatenated store ([forward | backward] pooled hidden).
    out_ref[...] = (jnp.concatenate([accf, accb], axis=1) * inv).astype(out_ref.dtype)


# ----------------------------------------------------------------------------
# Parameter repacking (PyTorch-layout params -> per-gate kernel layout)
# ----------------------------------------------------------------------------
def _pack_params(params):
    Hd = params["whh_f"].shape[1]

    def wsplit(w):                     # (3Hd, X) -> [(X, Hd)] * 3, transposed
        return [w[g * Hd:(g + 1) * Hd, :].T for g in range(3)]

    def bsplit(b):                     # (3Hd,) -> [(Hd,)] * 3
        return [b[g * Hd:(g + 1) * Hd] for g in range(3)]

    wi = jnp.stack(wsplit(params["wih_f"]) + wsplit(params["wih_b"])
                   ).astype(jnp.bfloat16)                      # (6, E, Hd)
    whf = jnp.stack(wsplit(params["whh_f"])).astype(jnp.bfloat16)   # (3, Hd, Hd)
    whb = jnp.stack(wsplit(params["whh_b"])).astype(jnp.bfloat16)

    bif, bhf = bsplit(params["bih_f"]), bsplit(params["bhh_f"])
    bib, bhb = bsplit(params["bih_b"]), bsplit(params["bhh_b"])
    # Combined bias added to the hoisted input projection:
    #   r,z gates: bias_ih + bias_hh ; n gate: bias_ih only (bias_hh_n must sit
    #   inside the r * (.) term).
    bgi = jnp.stack([bif[0] + bhf[0], bif[1] + bhf[1], bif[2],
                     bib[0] + bhb[0], bib[1] + bhb[1], bib[2]]
                    )[:, None, :].astype(jnp.float32)          # (6, 1, Hd)
    bhn = jnp.stack([bhf[2], bhb[2]])[:, None, :].astype(jnp.float32)  # (2, 1, Hd)
    return wi, whf, whb, bgi, bhn


# ----------------------------------------------------------------------------
# Wrapper: embedding lookup + layout glue + pallas_call (batch-parallel grid)
# ----------------------------------------------------------------------------
@functools.partial(jax.jit, static_argnames=("block_b",))
def gru_encoder_forward(tokens, mask, params, block_b=16):
    B, T = tokens.shape
    E = params["embed"].shape[1]
    Hd = params["whh_f"].shape[1]

    wi, whf, whb, bgi, bhn = _pack_params(params)

    # Pad batch to a multiple of the batch tile (padded rows are fully masked).
    Bp = ((B + block_b - 1) // block_b) * block_b
    pad = Bp - B
    tok_p = jnp.pad(tokens, ((0, pad), (0, 0)))
    mask_p = jnp.pad(mask.astype(jnp.float32), ((0, pad), (0, 0)))   # (Bp, T)

    # Embedding gather directly into time-major layout -> no separate
    # (B,T,E)->(T,B,E) transpose pass over the activations.
    # TODO(synk): nn.Dropout is treated as inference-mode identity here.
    x_tbe = params["embed"][tok_p.T].astype(jnp.bfloat16)            # (T, Bp, E)

    inv_len = 1.0 / jnp.maximum(jnp.sum(mask_p, axis=1, keepdims=True), 1.0)  # (Bp, 1)

    grid = (Bp // block_b,)
    out = pl.pallas_call(
        gru_encoder_kernel,
        out_shape=jax.ShapeDtypeStruct((Bp, 2 * Hd), jnp.float32),
        grid=grid,
        in_specs=[
            pl.BlockSpec((T, block_b, E), lambda b: (0, b, 0)),      # x (bf16)
            pl.BlockSpec((block_b, T), lambda b: (b, 0)),            # mask
            pl.BlockSpec((block_b, 1), lambda b: (b, 0)),            # 1/len
            pl.BlockSpec((6, E, Hd), lambda b: (0, 0, 0)),           # wi
            pl.BlockSpec((3, Hd, Hd), lambda b: (0, 0, 0)),          # whh fwd
            pl.BlockSpec((3, Hd, Hd), lambda b: (0, 0, 0)),          # whh bwd
            pl.BlockSpec((6, 1, Hd), lambda b: (0, 0, 0)),           # b_gi
            pl.BlockSpec((2, 1, Hd), lambda b: (0, 0, 0)),           # b_hn
        ],
        out_specs=pl.BlockSpec((block_b, 2 * Hd), lambda b: (b, 0)),
        compiler_params=pltpu.CompilerParams(
            dimension_semantics=("parallel",)),
    )(x_tbe, mask_p, inv_len, wi, whf, whb, bgi, bhn)
    return out[:B]


# ----------------------------------------------------------------------------
# Pure-JAX reference (same math / same bf16 matmul numerics)
# ----------------------------------------------------------------------------
def gru_encoder_reference(tokens, mask, params):
    B, T = tokens.shape
    Hd = params["whh_f"].shape[1]
    x = params["embed"][tokens].astype(jnp.bfloat16)                 # (B, T, E)
    m = mask.astype(jnp.float32)

    def direction(wih, whh, bih, bhh, reverse):
        wi = wih.T.astype(jnp.bfloat16)                              # (E, 3Hd)
        wh = whh.T.astype(jnp.bfloat16)                              # (Hd, 3Hd)
        h = jnp.zeros((B, Hd), jnp.float32)
        acc = jnp.zeros((B, Hd), jnp.float32)
        order = range(T - 1, -1, -1) if reverse else range(T)
        for t in order:
            m_t = m[:, t:t + 1]
            gi = jnp.dot(x[:, t], wi, preferred_element_type=jnp.float32) + bih
            gh = jnp.dot(h.astype(jnp.bfloat16), wh,
                         preferred_element_type=jnp.float32) + bhh
            r = jax.nn.sigmoid(gi[:, :Hd] + gh[:, :Hd])
            z = jax.nn.sigmoid(gi[:, Hd:2 * Hd] + gh[:, Hd:2 * Hd])
            n = jnp.tanh(gi[:, 2 * Hd:] + r * gh[:, 2 * Hd:])
            h_new = (1.0 - z) * n + z * h
            h = m_t * h_new + (1.0 - m_t) * h
            acc = acc + m_t * h
        return acc

    acc_f = direction(params["wih_f"], params["whh_f"],
                      params["bih_f"], params["bhh_f"], False)
    acc_b = direction(params["wih_b"], params["whh_b"],
                      params["bih_b"], params["bhh_b"], True)
    denom = jnp.maximum(jnp.sum(m, axis=1, keepdims=True), 1.0)
    return jnp.concatenate([acc_f, acc_b], axis=1) / denom


# ----------------------------------------------------------------------------
# Deterministic parameter init (PyTorch nn.GRU layout, shapes from GRUEncoder)
# ----------------------------------------------------------------------------
def init_params(key, vocab_size, embed_size, hidden_size):
    hd = hidden_size // 2                   # per direction (bidirectional)
    ks = jax.random.split(key, 9)
    k = 1.0 / np.sqrt(hd)
    u = lambda kk, shape: jax.random.uniform(kk, shape, jnp.float32, -k, k)
    return {
        "embed": jax.random.normal(ks[0], (vocab_size, embed_size), jnp.float32) * 0.1,
        "wih_f": u(ks[1], (3 * hd, embed_size)),
        "whh_f": u(ks[2], (3 * hd, hd)),
        "bih_f": u(ks[3], (3 * hd,)),
        "bhh_f": u(ks[4], (3 * hd,)),
        "wih_b": u(ks[5], (3 * hd, embed_size)),
        "whh_b": u(ks[6], (3 * hd, hd)),
        "bih_b": u(ks[7], (3 * hd,)),
        "bhh_b": u(ks[8], (3 * hd,)),
    }


if __name__ == "__main__":
    VOCAB, EMBED, HIDDEN = 50, 32, 64       # hidden split 32/32 across directions
    B, T = 32, 8

    key = jax.random.PRNGKey(0)
    kp, kt = jax.random.split(key)
    params = init_params(kp, VOCAB, EMBED, HIDDEN)

    tokens = jax.random.randint(kt, (B, T), 0, VOCAB, dtype=jnp.int32)
    lengths = (T - (np.arange(B) % T)).astype(np.int32)   # varied lengths T..1
    mask_np = (np.arange(T)[None, :] < lengths[:, None]).astype(np.float32)
    mask = jnp.asarray(mask_np)

    out = gru_encoder_forward(tokens, mask, params, block_b=16)
    out = jax.block_until_ready(out)

    ref = gru_encoder_reference(tokens, mask, params)
    np.testing.assert_allclose(np.asarray(out), np.asarray(ref),
                               rtol=2e-3, atol=2e-3)

    print("KERNEL_OK")
</pallas_src>

<mosaic_0001>
module attributes {stable_mosaic.version = 11 : i64} {
  func.func @gru_encoder_kernel(%arg0: i32, %arg1: memref<8x16x32xbf16, #tpu.memory_space<vmem>>, %arg2: memref<16x8xf32, #tpu.memory_space<vmem>>, %arg3: memref<16x1xf32, #tpu.memory_space<vmem>>, %arg4: memref<6x32x32xbf16, #tpu.memory_space<vmem>>, %arg5: memref<3x32x32xbf16, #tpu.memory_space<vmem>>, %arg6: memref<3x32x32xbf16, #tpu.memory_space<vmem>>, %arg7: memref<6x1x32xf32, #tpu.memory_space<vmem>>, %arg8: memref<2x1x32xf32, #tpu.memory_space<vmem>>, %arg9: memref<16x64xf32, #tpu.memory_space<vmem>>) attributes {dimension_semantics = [#tpu.dimension_semantics<parallel>], iteration_bounds = array<i64: 2>, scalar_prefetch = 0 : i64, scratch_operands = 0 : i64, tpu.core_type = #tpu.core_type<tc>, window_params = [{transform_indices = @transform_0, window_bounds = array<i64: 8, 16, 32>}, {transform_indices = @transform_1, window_bounds = array<i64: 16, 8>}, {transform_indices = @transform_2, window_bounds = array<i64: 16, 1>}, {pipeline_mode = #tpu.pipeline_mode<synchronous>, transform_indices = @transform_3, window_bounds = array<i64: 6, 32, 32>}, {pipeline_mode = #tpu.pipeline_mode<synchronous>, transform_indices = @transform_4, window_bounds = array<i64: 3, 32, 32>}, {pipeline_mode = #tpu.pipeline_mode<synchronous>, transform_indices = @transform_5, window_bounds = array<i64: 3, 32, 32>}, {pipeline_mode = #tpu.pipeline_mode<synchronous>, transform_indices = @transform_6, window_bounds = array<i64: 6, 1, 32>}, {pipeline_mode = #tpu.pipeline_mode<synchronous>, transform_indices = @transform_7, window_bounds = array<i64: 2, 1, 32>}, {transform_indices = @transform_8, window_bounds = array<i64: 16, 64>}]} {
    %c0 = arith.constant 0 : index
    %c0_0 = arith.constant 0 : index
    %c0_1 = arith.constant 0 : index
    %0 = vector.load %arg1[%c0, %c0_0, %c0_1] : memref<8x16x32xbf16, #tpu.memory_space<vmem>>, vector<8x16x32xbf16>
    %1 = vector.shape_cast %0 : vector<8x16x32xbf16> to vector<128x32xbf16>
    %c0_2 = arith.constant 0 : index
    %c0_3 = arith.constant 0 : index
    %c0_4 = arith.constant 0 : index
    %2 = vector.load %arg4[%c0_2, %c0_3, %c0_4] : memref<6x32x32xbf16, #tpu.memory_space<vmem>>, vector<1x32x32xbf16>
    %3 = vector.shape_cast %2 : vector<1x32x32xbf16> to vector<32x32xbf16>
    %cst = arith.constant dense<0.000000e+00> : vector<128x32xf32>
    %4 = tpu.matmul %1, %3, %cst {dimension_numbers = #tpu.dot_dimension_numbers<[1], [0], [0], [1], [0, 0, 1, 1], [], []>} : vector<128x32xbf16>, vector<32x32xbf16>, vector<128x32xf32> -> vector<128x32xf32>
    %c0_5 = arith.constant 0 : index
    %c0_6 = arith.constant 0 : index
    %c0_7 = arith.constant 0 : index
    %5 = vector.load %arg7[%c0_5, %c0_6, %c0_7] : memref<6x1x32xf32, #tpu.memory_space<vmem>>, vector<1x1x32xf32>
    %6 = vector.shape_cast %5 : vector<1x1x32xf32> to vector<1x32xf32>
    %7 = vector.broadcast %6 : vector<1x32xf32> to vector<128x32xf32>
    %8 = arith.addf %4, %7 : vector<128x32xf32>
    %9 = vector.shape_cast %8 : vector<128x32xf32> to vector<8x16x32xf32>
    %c1 = arith.constant 1 : index
    %c0_8 = arith.constant 0 : index
    %c0_9 = arith.constant 0 : index
    %10 = vector.load %arg4[%c1, %c0_8, %c0_9] : memref<6x32x32xbf16, #tpu.memory_space<vmem>>, vector<1x32x32xbf16>
    %11 = vector.shape_cast %10 : vector<1x32x32xbf16> to vector<32x32xbf16>
    %cst_10 = arith.constant dense<0.000000e+00> : vector<128x32xf32>
    %12 = tpu.matmul %1, %11, %cst_10 {dimension_numbers = #tpu.dot_dimension_numbers<[1], [0], [0], [1], [0, 0, 1, 1], [], []>} : vector<128x32xbf16>, vector<32x32xbf16>, vector<128x32xf32> -> vector<128x32xf32>
    %c1_11 = arith.constant 1 : index
    %c0_12 = arith.constant 0 : index
    %c0_13 = arith.constant 0 : index
    %13 = vector.load %arg7[%c1_11, %c0_12, %c0_13] : memref<6x1x32xf32, #tpu.memory_space<vmem>>, vector<1x1x32xf32>
    %14 = vector.shape_cast %13 : vector<1x1x32xf32> to vector<1x32xf32>
    %15 = vector.broadcast %14 : vector<1x32xf32> to vector<128x32xf32>
    %16 = arith.addf %12, %15 : vector<128x32xf32>
    %17 = vector.shape_cast %16 : vector<128x32xf32> to vector<8x16x32xf32>
    %c2 = arith.constant 2 : index
    %c0_14 = arith.constant 0 : index
    %c0_15 = arith.constant 0 : index
    %18 = vector.load %arg4[%c2, %c0_14, %c0_15] : memref<6x32x32xbf16, #tpu.memory_space<vmem>>, vector<1x32x32xbf16>
    %19 = vector.shape_cast %18 : vector<1x32x32xbf16> to vector<32x32xbf16>
    %cst_16 = arith.constant dense<0.000000e+00> : vector<128x32xf32>
    %20 = tpu.matmul %1, %19, %cst_16 {dimension_numbers = #tpu.dot_dimension_numbers<[1], [0], [0], [1], [0, 0, 1, 1], [], []>} : vector<128x32xbf16>, vector<32x32xbf16>, vector<128x32xf32> -> vector<128x32xf32>
    %c2_17 = arith.constant 2 : index
    %c0_18 = arith.constant 0 : index
    %c0_19 = arith.constant 0 : index
    %21 = vector.load %arg7[%c2_17, %c0_18, %c0_19] : memref<6x1x32xf32, #tpu.memory_space<vmem>>, vector<1x1x32xf32>
    %22 = vector.shape_cast %21 : vector<1x1x32xf32> to vector<1x32xf32>
    %23 = vector.broadcast %22 : vector<1x32xf32> to vector<128x32xf32>
    %24 = arith.addf %20, %23 : vector<128x32xf32>
    %25 = vector.shape_cast %24 : vector<128x32xf32> to vector<8x16x32xf32>
    %c3 = arith.constant 3 : index
    %c0_20 = arith.constant 0 : index
    %c0_21 = arith.constant 0 : index
    %26 = vector.load %arg4[%c3, %c0_20, %c0_21] : memref<6x32x32xbf16, #tpu.memory_space<vmem>>, vector<1x32x32xbf16>
    %27 = vector.shape_cast %26 : vector<1x32x32xbf16> to vector<32x32xbf16>
    %cst_22 = arith.constant dense<0.000000e+00> : vector<128x32xf32>
    %28 = tpu.matmul %1, %27, %cst_22 {dimension_numbers = #tpu.dot_dimension_numbers<[1], [0], [0], [1], [0, 0, 1, 1], [], []>} : vector<128x32xbf16>, vector<32x32xbf16>, vector<128x32xf32> -> vector<128x32xf32>
    %c3_23 = arith.constant 3 : index
    %c0_24 = arith.constant 0 : index
    %c0_25 = arith.constant 0 : index
    %29 = vector.load %arg7[%c3_23, %c0_24, %c0_25] : memref<6x1x32xf32, #tpu.memory_space<vmem>>, vector<1x1x32xf32>
    %30 = vector.shape_cast %29 : vector<1x1x32xf32> to vector<1x32xf32>
    %31 = vector.broadcast %30 : vector<1x32xf32> to vector<128x32xf32>
    %32 = arith.addf %28, %31 : vector<128x32xf32>
    %33 = vector.shape_cast %32 : vector<128x32xf32> to vector<8x16x32xf32>
    %c4 = arith.constant 4 : index
    %c0_26 = arith.constant 0 : index
    %c0_27 = arith.constant 0 : index
    %34 = vector.load %arg4[%c4, %c0_26, %c0_27] : memref<6x32x32xbf16, #tpu.memory_space<vmem>>, vector<1x32x32xbf16>
    %35 = vector.shape_cast %34 : vector<1x32x32xbf16> to vector<32x32xbf16>
    %cst_28 = arith.constant dense<0.000000e+00> : vector<128x32xf32>
    %36 = tpu.matmul %1, %35, %cst_28 {dimension_numbers = #tpu.dot_dimension_numbers<[1], [0], [0], [1], [0, 0, 1, 1], [], []>} : vector<128x32xbf16>, vector<32x32xbf16>, vector<128x32xf32> -> vector<128x32xf32>
    %c4_29 = arith.constant 4 : index
    %c0_30 = arith.constant 0 : index
    %c0_31 = arith.constant 0 : index
    %37 = vector.load %arg7[%c4_29, %c0_30, %c0_31] : memref<6x1x32xf32, #tpu.memory_space<vmem>>, vector<1x1x32xf32>
    %38 = vector.shape_cast %37 : vector<1x1x32xf32> to vector<1x32xf32>
    %39 = vector.broadcast %38 : vector<1x32xf32> to vector<128x32xf32>
    %40 = arith.addf %36, %39 : vector<128x32xf32>
    %41 = vector.shape_cast %40 : vector<128x32xf32> to vector<8x16x32xf32>
    %c5 = arith.constant 5 : index
    %c0_32 = arith.constant 0 : index
    %c0_33 = arith.constant 0 : index
    %42 = vector.load %arg4[%c5, %c0_32, %c0_33] : memref<6x32x32xbf16, #tpu.memory_space<vmem>>, vector<1x32x32xbf16>
    %43 = vector.shape_cast %42 : vector<1x32x32xbf16> to vector<32x32xbf16>
    %cst_34 = arith.constant dense<0.000000e+00> : vector<128x32xf32>
    %44 = tpu.matmul %1, %43, %cst_34 {dimension_numbers = #tpu.dot_dimension_numbers<[1], [0], [0], [1], [0, 0, 1, 1], [], []>} : vector<128x32xbf16>, vector<32x32xbf16>, vector<128x32xf32> -> vector<128x32xf32>
    %c5_35 = arith.constant 5 : index
    %c0_36 = arith.constant 0 : index
    %c0_37 = arith.constant 0 : index
    %45 = vector.load %arg7[%c5_35, %c0_36, %c0_37] : memref<6x1x32xf32, #tpu.memory_space<vmem>>, vector<1x1x32xf32>
    %46 = vector.shape_cast %45 : vector<1x1x32xf32> to vector<1x32xf32>
    %47 = vector.broadcast %46 : vector<1x32xf32> to vector<128x32xf32>
    %48 = arith.addf %44, %47 : vector<128x32xf32>
    %49 = vector.shape_cast %48 : vector<128x32xf32> to vector<8x16x32xf32>
    %c0_38 = arith.constant 0 : index
    %c0_39 = arith.constant 0 : index
    %c0_40 = arith.constant 0 : index
    %50 = vector.load %arg5[%c0_38, %c0_39, %c0_40] : memref<3x32x32xbf16, #tpu.memory_space<vmem>>, vector<1x32x32xbf16>
    %51 = vector.shape_cast %50 : vector<1x32x32xbf16> to vector<32x32xbf16>
    %c1_41 = arith.constant 1 : index
    %c0_42 = arith.constant 0 : index
    %c0_43 = arith.constant 0 : index
    %52 = vector.load %arg5[%c1_41, %c0_42, %c0_43] : memref<3x32x32xbf16, #tpu.memory_space<vmem>>, vector<1x32x32xbf16>
    %53 = vector.shape_cast %52 : vector<1x32x32xbf16> to vector<32x32xbf16>
    %c2_44 = arith.constant 2 : index
    %c0_45 = arith.constant 0 : index
    %c0_46 = arith.constant 0 : index
    %54 = vector.load %arg5[%c2_44, %c0_45, %c0_46] : memref<3x32x32xbf16, #tpu.memory_space<vmem>>, vector<1x32x32xbf16>
    %55 = vector.shape_cast %54 : vector<1x32x32xbf16> to vector<32x32xbf16>
    %c0_47 = arith.constant 0 : index
    %c0_48 = arith.constant 0 : index
    %c0_49 = arith.constant 0 : index
    %56 = vector.load %arg6[%c0_47, %c0_48, %c0_49] : memref<3x32x32xbf16, #tpu.memory_space<vmem>>, vector<1x32x32xbf16>
    %57 = vector.shape_cast %56 : vector<1x32x32xbf16> to vector<32x32xbf16>
    %c1_50 = arith.constant 1 : index
    %c0_51 = arith.constant 0 : index
    %c0_52 = arith.constant 0 : index
    %58 = vector.load %arg6[%c1_50, %c0_51, %c0_52] : memref<3x32x32xbf16, #tpu.memory_space<vmem>>, vector<1x32x32xbf16>
    %59 = vector.shape_cast %58 : vector<1x32x32xbf16> to vector<32x32xbf16>
    %c2_53 = arith.constant 2 : index
    %c0_54 = arith.constant 0 : index
    %c0_55 = arith.constant 0 : index
    %60 = vector.load %arg6[%c2_53, %c0_54, %c0_55] : memref<3x32x32xbf16, #tpu.memory_space<vmem>>, vector<1x32x32xbf16>
    %61 = vector.shape_cast %60 : vector<1x32x32xbf16> to vector<32x32xbf16>
    %c0_56 = arith.constant 0 : index
    %c0_57 = arith.constant 0 : index
    %c0_58 = arith.constant 0 : index
    %62 = vector.load %arg8[%c0_56, %c0_57, %c0_58] : memref<2x1x32xf32, #tpu.memory_space<vmem>>, vector<1x1x32xf32>
    %63 = vector.shape_cast %62 : vector<1x1x32xf32> to vector<1x32xf32>
    %c1_59 = arith.constant 1 : index
    %c0_60 = arith.constant 0 : index
    %c0_61 = arith.constant 0 : index
    %64 = vector.load %arg8[%c1_59, %c0_60, %c0_61] : memref<2x1x32xf32, #tpu.memory_space<vmem>>, vector<1x1x32xf32>
    %65 = vector.shape_cast %64 : vector<1x1x32xf32> to vector<1x32xf32>
    %c0_62 = arith.constant 0 : index
    %c0_63 = arith.constant 0 : index
    %66 = vector.load %arg2[%c0_62, %c0_63] : memref<16x8xf32, #tpu.memory_space<vmem>>, vector<16x8xf32>
    %cst_64 = arith.constant 0.000000e+00 : f32
    %67 = vector.broadcast %cst_64 : f32 to vector<16x32xf32>
    %cst_65 = arith.constant 0.000000e+00 : f32
    %68 = vector.broadcast %cst_65 : f32 to vector<16x32xf32>
    %cst_66 = arith.constant 0.000000e+00 : f32
    %69 = vector.broadcast %cst_66 : f32 to vector<16x32xf32>
    %cst_67 = arith.constant 0.000000e+00 : f32
    %70 = vector.broadcast %cst_67 : f32 to vector<16x32xf32>
    %71 = vector.extract_strided_slice %66 {offsets = [0, 0], sizes = [16, 1], strides = [1, 1]} : vector<16x8xf32> to vector<16x1xf32>
    %72 = vector.extract_strided_slice %66 {offsets = [0, 7], sizes = [16, 1], strides = [1, 1]} : vector<16x8xf32> to vector<16x1xf32>
    %73 = vector.extract_strided_slice %9 {offsets = [0, 0, 0], sizes = [1, 16, 32], strides = [1, 1, 1]} : vector<8x16x32xf32> to vector<1x16x32xf32>
    %74 = vector.shape_cast %73 : vector<1x16x32xf32> to vector<16x32xf32>
    %75 = vector.extract_strided_slice %17 {offsets = [0, 0, 0], sizes = [1, 16, 32], strides = [1, 1, 1]} : vector<8x16x32xf32> to vector<1x16x32xf32>
    %76 = vector.shape_cast %75 : vector<1x16x32xf32> to vector<16x32xf32>
    %77 = vector.extract_strided_slice %25 {offsets = [0, 0, 0], sizes = [1, 16, 32], strides = [1, 1, 1]} : vector<8x16x32xf32> to vector<1x16x32xf32>
    %78 = vector.shape_cast %77 : vector<1x16x32xf32> to vector<16x32xf32>
    %79 = arith.truncf %67 : vector<16x32xf32> to vector<16x32xbf16>
    %cst_68 = arith.constant dense<0.000000e+00> : vector<16x32xf32>
    %80 = tpu.matmul %79, %51, %cst_68 {dimension_numbers = #tpu.dot_dimension_numbers<[1], [0], [0], [1], [0, 0, 1, 1], [], []>} : vector<16x32xbf16>, vector<32x32xbf16>, vector<16x32xf32> -> vector<16x32xf32>
    %cst_69 = arith.constant dense<0.000000e+00> : vector<16x32xf32>
    %81 = tpu.matmul %79, %53, %cst_69 {dimension_numbers = #tpu.dot_dimension_numbers<[1], [0], [0], [1], [0, 0, 1, 1], [], []>} : vector<16x32xbf16>, vector<32x32xbf16>, vector<16x32xf32> -> vector<16x32xf32>
    %cst_70 = arith.constant dense<0.000000e+00> : vector<16x32xf32>
    %82 = tpu.matmul %79, %55, %cst_70 {dimension_numbers = #tpu.dot_dimension_numbers<[1], [0], [0], [1], [0, 0, 1, 1], [], []>} : vector<16x32xbf16>, vector<32x32xbf16>, vector<16x32xf32> -> vector<16x32xf32>
    %83 = arith.addf %74, %80 : vector<16x32xf32>
    %84 = arith.negf %83 : vector<16x32xf32>
    %85 = math.exp %84 : vector<16x32xf32>
    %cst_71 = arith.constant 1.000000e+00 : f32
    %86 = vector.broadcast %cst_71 : f32 to vector<16x32xf32>
    %87 = arith.addf %86, %85 : vector<16x32xf32>
    %88 = arith.divf %86, %87 : vector<16x32xf32>
    %89 = arith.addf %76, %81 : vector<16x32xf32>
    %90 = arith.negf %89 : vector<16x32xf32>
    %91 = math.exp %90 : vector<16x32xf32>
    %cst_72 = arith.constant 1.000000e+00 : f32
    %92 = vector.broadcast %cst_72 : f32 to vector<16x32xf32>
    %93 = arith.addf %92, %91 : vector<16x32xf32>
    %94 = arith.divf %92, %93 : vector<16x32xf32>
    %95 = vector.broadcast %63 : vector<1x32xf32> to vector<16x32xf32>
    %96 = arith.addf %82, %95 : vector<16x32xf32>
    %97 = arith.mulf %88, %96 : vector<16x32xf32>
    %98 = arith.addf %78, %97 : vector<16x32xf32>
    %99 = math.tanh %98 : vector<16x32xf32>
    %cst_73 = arith.constant 1.000000e+00 : f32
    %100 = vector.broadcast %cst_73 : f32 to vector<16x32xf32>
    %101 = arith.subf %100, %94 : vector<16x32xf32>
    %102 = arith.mulf %101, %99 : vector<16x32xf32>
    %103 = arith.mulf %94, %67 : vector<16x32xf32>
    %104 = arith.addf %102, %103 : vector<16x32xf32>
    %105 = vector.extract_strided_slice %33 {offsets = [7, 0, 0], sizes = [1, 16, 32], strides = [1, 1, 1]} : vector<8x16x32xf32> to vector<1x16x32xf32>
    %106 = vector.shape_cast %105 : vector<1x16x32xf32> to vector<16x32xf32>
    %107 = vector.extract_strided_slice %41 {offsets = [7, 0, 0], sizes = [1, 16, 32], strides = [1, 1, 1]} : vector<8x16x32xf32> to vector<1x16x32xf32>
    %108 = vector.shape_cast %107 : vector<1x16x32xf32> to vector<16x32xf32>
    %109 = vector.extract_strided_slice %49 {offsets = [7, 0, 0], sizes = [1, 16, 32], strides = [1, 1, 1]} : vector<8x16x32xf32> to vector<1x16x32xf32>
    %110 = vector.shape_cast %109 : vector<1x16x32xf32> to vector<16x32xf32>
    %111 = arith.truncf %68 : vector<16x32xf32> to vector<16x32xbf16>
    %cst_74 = arith.constant dense<0.000000e+00> : vector<16x32xf32>
    %112 = tpu.matmul %111, %57, %cst_74 {dimension_numbers = #tpu.dot_dimension_numbers<[1], [0], [0], [1], [0, 0, 1, 1], [], []>} : vector<16x32xbf16>, vector<32x32xbf16>, vector<16x32xf32> -> vector<16x32xf32>
    %cst_75 = arith.constant dense<0.000000e+00> : vector<16x32xf32>
    %113 = tpu.matmul %111, %59, %cst_75 {dimension_numbers = #tpu.dot_dimension_numbers<[1], [0], [0], [1], [0, 0, 1, 1], [], []>} : vector<16x32xbf16>, vector<32x32xbf16>, vector<16x32xf32> -> vector<16x32xf32>
    %cst_76 = arith.constant dense<0.000000e+00> : vector<16x32xf32>
    %114 = tpu.matmul %111, %61, %cst_76 {dimension_numbers = #tpu.dot_dimension_numbers<[1], [0], [0], [1], [0, 0, 1, 1], [], []>} : vector<16x32xbf16>, vector<32x32xbf16>, vector<16x32xf32> -> vector<16x32xf32>
    %115 = arith.addf %106, %112 : vector<16x32xf32>
    %116 = arith.negf %115 : vector<16x32xf32>
    %117 = math.exp %116 : vector<16x32xf32>
    %cst_77 = arith.constant 1.000000e+00 : f32
    %118 = vector.broadcast %cst_77 : f32 to vector<16x32xf32>
    %119 = arith.addf %118, %117 : vector<16x32xf32>
    %120 = arith.divf %118, %119 : vector<16x32xf32>
    %121 = arith.addf %108, %113 : vector<16x32xf32>
    %122 = arith.negf %121 : vector<16x32xf32>
    %123 = math.exp %122 : vector<16x32xf32>
    %cst_78 = arith.constant 1.000000e+00 : f32
    %124 = vector.broadcast %cst_78 : f32 to vector<16x32xf32>
    %125 = arith.addf %124, %123 : vector<16x32xf32>
    %126 = arith.divf %124, %125 : vector<16x32xf32>
    %127 = vector.broadcast %65 : vector<1x32xf32> to vector<16x32xf32>
    %128 = arith.addf %114, %127 : vector<16x32xf32>
    %129 = arith.mulf %120, %128 : vector<16x32xf32>
    %130 = arith.addf %110, %129 : vector<16x32xf32>
    %131 = math.tanh %130 : vector<16x32xf32>
    %cst_79 = arith.constant 1.000000e+00 : f32
    %132 = vector.broadcast %cst_79 : f32 to vector<16x32xf32>
    %133 = arith.subf %132, %126 : vector<16x32xf32>
    %134 = arith.mulf %133, %131 : vector<16x32xf32>
    %135 = arith.mulf %126, %68 : vector<16x32xf32>
    %136 = arith.addf %134, %135 : vector<16x32xf32>
    %137 = vector.broadcast %71 : vector<16x1xf32> to vector<16x32xf32>
    %138 = arith.mulf %137, %104 : vector<16x32xf32>
    %cst_80 = arith.constant 1.000000e+00 : f32
    %139 = vector.broadcast %cst_80 : f32 to vector<16x1xf32>
    %140 = arith.subf %139, %71 : vector<16x1xf32>
    %141 = vector.broadcast %140 : vector<16x1xf32> to vector<16x32xf32>
    %142 = arith.mulf %141, %67 : vector<16x32xf32>
    %143 = arith.addf %138, %142 : vector<16x32xf32>
    %144 = vector.broadcast %72 : vector<16x1xf32> to vector<16x32xf32>
    %145 = arith.mulf %144, %136 : vector<16x32xf32>
    %cst_81 = arith.constant 1.000000e+00 : f32
    %146 = vector.broadcast %cst_81 : f32 to vector<16x1xf32>
    %147 = arith.subf %146, %72 : vector<16x1xf32>
    %148 = vector.broadcast %147 : vector<16x1xf32> to vector<16x32xf32>
    %149 = arith.mulf %148, %68 : vector<16x32xf32>
    %150 = arith.addf %145, %149 : vector<16x32xf32>
    %151 = vector.broadcast %71 : vector<16x1xf32> to vector<16x32xf32>
    %152 = arith.mulf %151, %143 : vector<16x32xf32>
    %153 = arith.addf %69, %152 : vector<16x32xf32>
    %154 = vector.broadcast %72 : vector<16x1xf32> to vector<16x32xf32>
    %155 = arith.mulf %154, %150 : vector<16x32xf32>
    %156 = arith.addf %70, %155 : vector<16x32xf32>
    %157 = vector.extract_strided_slice %66 {offsets = [0, 1], sizes = [16, 1], strides = [1, 1]} : vector<16x8xf32> to vector<16x1xf32>
    %158 = vector.extract_strided_slice %66 {offsets = [0, 6], sizes = [16, 1], strides = [1, 1]} : vector<16x8xf32> to vector<16x1xf32>
    %159 = vector.extract_strided_slice %9 {offsets = [1, 0, 0], sizes = [1, 16, 32], strides = [1, 1, 1]} : vector<8x16x32xf32> to vector<1x16x32xf32>
    %160 = vector.shape_cast %159 : vector<1x16x32xf32> to vector<16x32xf32>
    %161 = vector.extract_strided_slice %17 {offsets = [1, 0, 0], sizes = [1, 16, 32], strides = [1, 1, 1]} : vector<8x16x32xf32> to vector<1x16x32xf32>
    %162 = vector.shape_cast %161 : vector<1x16x32xf32> to vector<16x32xf32>
    %163 = vector.extract_strided_slice %25 {offsets = [1, 0, 0], sizes = [1, 16, 32], strides = [1, 1, 1]} : vector<8x16x32xf32> to vector<1x16x32xf32>
    %164 = vector.shape_cast %163 : vector<1x16x32xf32> to vector<16x32xf32>
    %165 = arith.truncf %143 : vector<16x32xf32> to vector<16x32xbf16>
    %cst_82 = arith.constant dense<0.000000e+00> : vector<16x32xf32>
    %166 = tpu.matmul %165, %51, %cst_82 {dimension_numbers = #tpu.dot_dimension_numbers<[1], [0], [0], [1], [0, 0, 1, 1], [], []>} : vector<16x32xbf16>, vector<32x32xbf16>, vector<16x32xf32> -> vector<16x32xf32>
    %cst_83 = arith.constant dense<0.000000e+00> : vector<16x32xf32>
    %167 = tpu.matmul %165, %53, %cst_83 {dimension_numbers = #tpu.dot_dimension_numbers<[1], [0], [0], [1], [0, 0, 1, 1], [], []>} : vector<16x32xbf16>, vector<32x32xbf16>, vector<16x32xf32> -> vector<16x32xf32>
    %cst_84 = arith.constant dense<0.000000e+00> : vector<16x32xf32>
    %168 = tpu.matmul %165, %55, %cst_84 {dimension_numbers = #tpu.dot_dimension_numbers<[1], [0], [0], [1], [0, 0, 1, 1], [], []>} : vector<16x32xbf16>, vector<32x32xbf16>, vector<16x32xf32> -> vector<16x32xf32>
    %169 = arith.addf %160, %166 : vector<16x32xf32>
    %170 = arith.negf %169 : vector<16x32xf32>
    %171 = math.exp %170 : vector<16x32xf32>
    %cst_85 = arith.constant 1.000000e+00 : f32
    %172 = vector.broadcast %cst_85 : f32 to vector<16x32xf32>
    %173 = arith.addf %172, %171 : vector<16x32xf32>
    %174 = arith.divf %172, %173 : vector<16x32xf32>
    %175 = arith.addf %162, %167 : vector<16x32xf32>
    %176 = arith.negf %175 : vector<16x32xf32>
    %177 = math.exp %176 : vector<16x32xf32>
    %cst_86 = arith.constant 1.000000e+00 : f32
    %178 = vector.broadcast %cst_86 : f32 to vector<16x32xf32>
    %179 = arith.addf %178, %177 : vector<16x32xf32>
    %180 = arith.divf %178, %179 : vector<16x32xf32>
    %181 = vector.broadcast %63 : vector<1x32xf32> to vector<16x32xf32>
    %182 = arith.addf %168, %181 : vector<16x32xf32>
    %183 = arith.mulf %174, %182 : vector<16x32xf32>
    %184 = arith.addf %164, %183 : vector<16x32xf32>
    %185 = math.tanh %184 : vector<16x32xf32>
    %cst_87 = arith.constant 1.000000e+00 : f32
    %186 = vector.broadcast %cst_87 : f32 to vector<16x32xf32>
    %187 = arith.subf %186, %180 : vector<16x32xf32>
    %188 = arith.mulf %187, %185 : vector<16x32xf32>
    %189 = arith.mulf %180, %143 : vector<16x32xf32>
    %190 = arith.addf %188, %189 : vector<16x32xf32>
    %191 = vector.extract_strided_slice %33 {offsets = [6, 0, 0], sizes = [1, 16, 32], strides = [1, 1, 1]} : vector<8x16x32xf32> to vector<1x16x32xf32>
    %192 = vector.shape_cast %191 : vector<1x16x32xf32> to vector<16x32xf32>
    %193 = vector.extract_strided_slice %41 {offsets = [6, 0, 0], sizes = [1, 16, 32], strides = [1, 1, 1]} : vector<8x16x32xf32> to vector<1x16x32xf32>
    %194 = vector.shape_cast %193 : vector<1x16x32xf32> to vector<16x32xf32>
    %195 = vector.extract_strided_slice %49 {offsets = [6, 0, 0], sizes = [1, 16, 32], strides = [1, 1, 1]} : vector<8x16x32xf32> to vector<1x16x32xf32>
    %196 = vector.shape_cast %195 : vector<1x16x32xf32> to vector<16x32xf32>
    %197 = arith.truncf %150 : vector<16x32xf32> to vector<16x32xbf16>
    %cst_88 = arith.constant dense<0.000000e+00> : vector<16x32xf32>
    %198 = tpu.matmul %197, %57, %cst_88 {dimension_numbers = #tpu.dot_dimension_numbers<[1], [0], [0], [1], [0, 0, 1, 1], [], []>} : vector<16x32xbf16>, vector<32x32xbf16>, vector<16x32xf32> -> vector<16x32xf32>
    %cst_89 = arith.constant dense<0.000000e+00> : vector<16x32xf32>
    %199 = tpu.matmul %197, %59, %cst_89 {dimension_numbers = #tpu.dot_dimension_numbers<[1], [0], [0], [1], [0, 0, 1, 1], [], []>} : vector<16x32xbf16>, vector<32x32xbf16>, vector<16x32xf32> -> vector<16x32xf32>
    %cst_90 = arith.constant dense<0.000000e+00> : vector<16x32xf32>
    %200 = tpu.matmul %197, %61, %cst_90 {dimension_numbers = #tpu.dot_dimension_numbers<[1], [0], [0], [1], [0, 0, 1, 1], [], []>} : vector<16x32xbf16>, vector<32x32xbf16>, vector<16x32xf32> -> vector<16x32xf32>
    %201 = arith.addf %192, %198 : vector<16x32xf32>
    %202 = arith.negf %201 : vector<16x32xf32>
    %203 = math.exp %202 : vector<16x32xf32>
    %cst_91 = arith.constant 1.000000e+00 : f32
    %204 = vector.broadcast %cst_91 : f32 to vector<16x32xf32>
    %205 = arith.addf %204, %203 : vector<16x32xf32>
    %206 = arith.divf %204, %205 : vector<16x32xf32>
    %207 = arith.addf %194, %199 : vector<16x32xf32>
    %208 = arith.negf %207 : vector<16x32xf32>
    %209 = math.exp %208 : vector<16x32xf32>
    %cst_92 = arith.constant 1.000000e+00 : f32
    %210 = vector.broadcast %cst_92 : f32 to vector<16x32xf32>
    %211 = arith.addf %210, %209 : vector<16x32xf32>
    %212 = arith.divf %210, %211 : vector<16x32xf32>
    %213 = vector.broadcast %65 : vector<1x32xf32> to vector<16x32xf32>
    %214 = arith.addf %200, %213 : vector<16x32xf32>
    %215 = arith.mulf %206, %214 : vector<16x32xf32>
    %216 = arith.addf %196, %215 : vector<16x32xf32>
    %217 = math.tanh %216 : vector<16x32xf32>
    %cst_93 = arith.constant 1.000000e+00 : f32
    %218 = vector.broadcast %cst_93 : f32 to vector<16x32xf32>
    %219 = arith.subf %218, %212 : vector<16x32xf32>
    %220 = arith.mulf %219, %217 : vector<16x32xf32>
    %221 = arith.mulf %212, %150 : vector<16x32xf32>
    %222 = arith.addf %220, %221 : vector<16x32xf32>
    %223 = vector.broadcast %157 : vector<16x1xf32> to vector<16x32xf32>
    %224 = arith.mulf %223, %190 : vector<16x32xf32>
    %cst_94 = arith.constant 1.000000e+00 : f32
    %225 = vector.broadcast %cst_94 : f32 to vector<16x1xf32>
    %226 = arith.subf %225, %157 : vector<16x1xf32>
    %227 = vector.broadcast %226 : vector<16x1xf32> to vector<16x32xf32>
    %228 = arith.mulf %227, %143 : vector<16x32xf32>
    %229 = arith.addf %224, %228 : vector<16x32xf32>
    %230 = vector.broadcast %158 : vector<16x1xf32> to vector<16x32xf32>
    %231 = arith.mulf %230, %222 : vector<16x32xf32>
    %cst_95 = arith.constant 1.000000e+00 : f32
    %232 = vector.broadcast %cst_95 : f32 to vector<16x1xf32>
    %233 = arith.subf %232, %158 : vector<16x1xf32>
    %234 = vector.broadcast %233 : vector<16x1xf32> to vector<16x32xf32>
    %235 = arith.mulf %234, %150 : vector<16x32xf32>
    %236 = arith.addf %231, %235 : vector<16x32xf32>
    %237 = vector.broadcast %157 : vector<16x1xf32> to vector<16x32xf32>
    %238 = arith.mulf %237, %229 : vector<16x32xf32>
    %239 = arith.addf %153, %238 : vector<16x32xf32>
    %240 = vector.broadcast %158 : vector<16x1xf32> to vector<16x32xf32>
    %241 = arith.mulf %240, %236 : vector<16x32xf32>
    %242 = arith.addf %156, %241 : vector<16x32xf32>
    %243 = vector.extract_strided_slice %66 {offsets = [0, 2], sizes = [16, 1], strides = [1, 1]} : vector<16x8xf32> to vector<16x1xf32>
    %244 = vector.extract_strided_slice %66 {offsets = [0, 5], sizes = [16, 1], strides = [1, 1]} : vector<16x8xf32> to vector<16x1xf32>
    %245 = vector.extract_strided_slice %9 {offsets = [2, 0, 0], sizes = [1, 16, 32], strides = [1, 1, 1]} : vector<8x16x32xf32> to vector<1x16x32xf32>
    %246 = vector.shape_cast %245 : vector<1x16x32xf32> to vector<16x32xf32>
    %247 = vector.extract_strided_slice %17 {offsets = [2, 0, 0], sizes = [1, 16, 32], strides = [1, 1, 1]} : vector<8x16x32xf32> to vector<1x16x32xf32>
    %248 = vector.shape_cast %247 : vector<1x16x32xf32> to vector<16x32xf32>
    %249 = vector.extract_strided_slice %25 {offsets = [2, 0, 0], sizes = [1, 16, 32], strides = [1, 1, 1]} : vector<8x16x32xf32> to vector<1x16x32xf32>
    %250 = vector.shape_cast %249 : vector<1x16x32xf32> to vector<16x32xf32>
    %251 = arith.truncf %229 : vector<16x32xf32> to vector<16x32xbf16>
    %cst_96 = arith.constant dense<0.000000e+00> : vector<16x32xf32>
    %252 = tpu.matmul %251, %51, %cst_96 {dimension_numbers = #tpu.dot_dimension_numbers<[1], [0], [0], [1], [0, 0, 1, 1], [], []>} : vector<16x32xbf16>, vector<32x32xbf16>, vector<16x32xf32> -> vector<16x32xf32>
    %cst_97 = arith.constant dense<0.000000e+00> : vector<16x32xf32>
    %253 = tpu.matmul %251, %53, %cst_97 {dimension_numbers = #tpu.dot_dimension_numbers<[1], [0], [0], [1], [0, 0, 1, 1], [], []>} : vector<16x32xbf16>, vector<32x32xbf16>, vector<16x32xf32> -> vector<16x32xf32>
    %cst_98 = arith.constant dense<0.000000e+00> : vector<16x32xf32>
    %254 = tpu.matmul %251, %55, %cst_98 {dimension_numbers = #tpu.dot_dimension_numbers<[1], [0], [0], [1], [0, 0, 1, 1], [], []>} : vector<16x32xbf16>, vector<32x32xbf16>, vector<16x32xf32> -> vector<16x32xf32>
    %255 = arith.addf %246, %252 : vector<16x32xf32>
    %256 = arith.negf %255 : vector<16x32xf32>
    %257 = math.exp %256 : vector<16x32xf32>
    %cst_99 = arith.constant 1.000000e+00 : f32
    %258 = vector.broadcast %cst_99 : f32 to vector<16x32xf32>
    %259 = arith.addf %258, %257 : vector<16x32xf32>
    %260 = arith.divf %258, %259 : vector<16x32xf32>
    %261 = arith.addf %248, %253 : vector<16x32xf32>
    %262 = arith.negf %261 : vector<16x32xf32>
    %263 = math.exp %262 : vector<16x32xf32>
    %cst_100 = arith.constant 1.000000e+00 : f32
    %264 = vector.broadcast %cst_100 : f32 to vector<16x32xf32>
    %265 = arith.addf %264, %263 : vector<16x32xf32>
    %266 = arith.divf %264, %265 : vector<16x32xf32>
    %267 = vector.broadcast %63 : vector<1x32xf32> to vector<16x32xf32>
    %268 = arith.addf %254, %267 : vector<16x32xf32>
    %269 = arith.mulf %260, %268 : vector<16x32xf32>
    %270 = arith.addf %250, %269 : vector<16x32xf32>
    %271 = math.tanh %270 : vector<16x32xf32>
    %cst_101 = arith.constant 1.000000e+00 : f32
    %272 = vector.broadcast %cst_101 : f32 to vector<16x32xf32>
    %273 = arith.subf %272, %266 : vector<16x32xf32>
    %274 = arith.mulf %273, %271 : vector<16x32xf32>
    %275 = arith.mulf %266, %229 : vector<16x32xf32>
    %276 = arith.addf %274, %275 : vector<16x32xf32>
    %277 = vector.extract_strided_slice %33 {offsets = [5, 0, 0], sizes = [1, 16, 32], strides = [1, 1, 1]} : vector<8x16x32xf32> to vector<1x16x32xf32>
    %278 = vector.shape_cast %277 : vector<1x16x32xf32> to vector<16x32xf32>
    %279 = vector.extract_strided_slice %41 {offsets = [5, 0, 0], sizes = [1, 16, 32], strides = [1, 1, 1]} : vector<8x16x32xf32> to vector<1x16x32xf32>
    %280 = vector.shape_cast %279 : vector<1x16x32xf32> to vector<16x32xf32>
    %281 = vector.extract_strided_slice %49 {offsets = [5, 0, 0], sizes = [1, 16, 32], strides = [1, 1, 1]} : vector<8x16x32xf32> to vector<1x16x32xf32>
    %282 = vector.shape_cast %281 : vector<1x16x32xf32> to vector<16x32xf32>
    %283 = arith.truncf %236 : vector<16x32xf32> to vector<16x32xbf16>
    %cst_102 = arith.constant dense<0.000000e+00> : vector<16x32xf32>
    %284 = tpu.matmul %283, %57, %cst_102 {dimension_numbers = #tpu.dot_dimension_numbers<[1], [0], [0], [1], [0, 0, 1, 1], [], []>} : vector<16x32xbf16>, vector<32x32xbf16>, vector<16x32xf32> -> vector<16x32xf32>
    %cst_103 = arith.constant dense<0.000000e+00> : vector<16x32xf32>
    %285 = tpu.matmul %283, %59, %cst_103 {dimension_numbers = #tpu.dot_dimension_numbers<[1], [0], [0], [1], [0, 0, 1, 1], [], []>} : vector<16x32xbf16>, vector<32x32xbf16>, vector<16x32xf32> -> vector<16x32xf32>
    %cst_104 = arith.constant dense<0.000000e+00> : vector<16x32xf32>
    %286 = tpu.matmul %283, %61, %cst_104 {dimension_numbers = #tpu.dot_dimension_numbers<[1], [0], [0], [1], [0, 0, 1, 1], [], []>} : vector<16x32xbf16>, vector<32x32xbf16>, vector<16x32xf32> -> vector<16x32xf32>
    %287 = arith.addf %278, %284 : vector<16x32xf32>
    %288 = arith.negf %287 : vector<16x32xf32>
    %289 = math.exp %288 : vector<16x32xf32>
    %cst_105 = arith.constant 1.000000e+00 : f32
    %290 = vector.broadcast %cst_105 : f32 to vector<16x32xf32>
    %291 = arith.addf %290, %289 : vector<16x32xf32>
    %292 = arith.divf %290, %291 : vector<16x32xf32>
    %293 = arith.addf %280, %285 : vector<16x32xf32>
    %294 = arith.negf %293 : vector<16x32xf32>
    %295 = math.exp %294 : vector<16x32xf32>
    %cst_106 = arith.constant 1.000000e+00 : f32
    %296 = vector.broadcast %cst_106 : f32 to vector<16x32xf32>
    %297 = arith.addf %296, %295 : vector<16x32xf32>
    %298 = arith.divf %296, %297 : vector<16x32xf32>
    %299 = vector.broadcast %65 : vector<1x32xf32> to vector<16x32xf32>
    %300 = arith.addf %286, %299 : vector<16x32xf32>
    %301 = arith.mulf %292, %300 : vector<16x32xf32>
    %302 = arith.addf %282, %301 : vector<16x32xf32>
    %303 = math.tanh %302 : vector<16x32xf32>
    %cst_107 = arith.constant 1.000000e+00 : f32
    %304 = vector.broadcast %cst_107 : f32 to vector<16x32xf32>
    %305 = arith.subf %304, %298 : vector<16x32xf32>
    %306 = arith.mulf %305, %303 : vector<16x32xf32>
    %307 = arith.mulf %298, %236 : vector<16x32xf32>
    %308 = arith.addf %306, %307 : vector<16x32xf32>
    %309 = vector.broadcast %243 : vector<16x1xf32> to vector<16x32xf32>
    %310 = arith.mulf %309, %276 : vector<16x32xf32>
    %cst_108 = arith.constant 1.000000e+00 : f32
    %311 = vector.broadcast %cst_108 : f32 to vector<16x1xf32>
    %312 = arith.subf %311, %243 : vector<16x1xf32>
    %313 = vector.broadcast %312 : vector<16x1xf32> to vector<16x32xf32>
    %314 = arith.mulf %313, %229 : vector<16x32xf32>
    %315 = arith.addf %310, %314 : vector<16x32xf32>
    %316 = vector.broadcast %244 : vector<16x1xf32> to vector<16x32xf32>
    %317 = arith.mulf %316, %308 : vector<16x32xf32>
    %cst_109 = arith.constant 1.000000e+00 : f32
    %318 = vector.broadcast %cst_109 : f32 to vector<16x1xf32>
    %319 = arith.subf %318, %244 : vector<16x1xf32>
    %320 = vector.broadcast %319 : vector<16x1xf32> to vector<16x32xf32>
    %321 = arith.mulf %320, %236 : vector<16x32xf32>
    %322 = arith.addf %317, %321 : vector<16x32xf32>
    %323 = vector.broadcast %243 : vector<16x1xf32> to vector<16x32xf32>
    %324 = arith.mulf %323, %315 : vector<16x32xf32>
    %325 = arith.addf %239, %324 : vector<16x32xf32>
    %326 = vector.broadcast %244 : vector<16x1xf32> to vector<16x32xf32>
    %327 = arith.mulf %326, %322 : vector<16x32xf32>
    %328 = arith.addf %242, %327 : vector<16x32xf32>
    %329 = vector.extract_strided_slice %66 {offsets = [0, 3], sizes = [16, 1], strides = [1, 1]} : vector<16x8xf32> to vector<16x1xf32>
    %330 = vector.extract_strided_slice %66 {offsets = [0, 4], sizes = [16, 1], strides = [1, 1]} : vector<16x8xf32> to vector<16x1xf32>
    %331 = vector.extract_strided_slice %9 {offsets = [3, 0, 0], sizes = [1, 16, 32], strides = [1, 1, 1]} : vector<8x16x32xf32> to vector<1x16x32xf32>
    %332 = vector.shape_cast %331 : vector<1x16x32xf32> to vector<16x32xf32>
    %333 = vector.extract_strided_slice %17 {offsets = [3, 0, 0], sizes = [1, 16, 32], strides = [1, 1, 1]} : vector<8x16x32xf32> to vector<1x16x32xf32>
    %334 = vector.shape_cast %333 : vector<1x16x32xf32> to vector<16x32xf32>
    %335 = vector.extract_strided_slice %25 {offsets = [3, 0, 0], sizes = [1, 16, 32], strides = [1, 1, 1]} : vector<8x16x32xf32> to vector<1x16x32xf32>
    %336 = vector.shape_cast %335 : vector<1x16x32xf32> to vector<16x32xf32>
    %337 = arith.truncf %315 : vector<16x32xf32> to vector<16x32xbf16>
    %cst_110 = arith.constant dense<0.000000e+00> : vector<16x32xf32>
    %338 = tpu.matmul %337, %51, %cst_110 {dimension_numbers = #tpu.dot_dimension_numbers<[1], [0], [0], [1], [0, 0, 1, 1], [], []>} : vector<16x32xbf16>, vector<32x32xbf16>, vector<16x32xf32> -> vector<16x32xf32>
    %cst_111 = arith.constant dense<0.000000e+00> : vector<16x32xf32>
    %339 = tpu.matmul %337, %53, %cst_111 {dimension_numbers = #tpu.dot_dimension_numbers<[1], [0], [0], [1], [0, 0, 1, 1], [], []>} : vector<16x32xbf16>, vector<32x32xbf16>, vector<16x32xf32> -> vector<16x32xf32>
    %cst_112 = arith.constant dense<0.000000e+00> : vector<16x32xf32>
    %340 = tpu.matmul %337, %55, %cst_112 {dimension_numbers = #tpu.dot_dimension_numbers<[1], [0], [0], [1], [0, 0, 1, 1], [], []>} : vector<16x32xbf16>, vector<32x32xbf16>, vector<16x32xf32> -> vector<16x32xf32>
    %341 = arith.addf %332, %338 : vector<16x32xf32>
    %342 = arith.negf %341 : vector<16x32xf32>
    %343 = math.exp %342 : vector<16x32xf32>
    %cst_113 = arith.constant 1.000000e+00 : f32
    %344 = vector.broadcast %cst_113 : f32 to vector<16x32xf32>
    %345 = arith.addf %344, %343 : vector<16x32xf32>
    %346 = arith.divf %344, %345 : vector<16x32xf32>
    %347 = arith.addf %334, %339 : vector<16x32xf32>
    %348 = arith.negf %347 : vector<16x32xf32>
    %349 = math.exp %348 : vector<16x32xf32>
    %cst_114 = arith.constant 1.000000e+00 : f32
    %350 = vector.broadcast %cst_114 : f32 to vector<16x32xf32>
    %351 = arith.addf %350, %349 : vector<16x32xf32>
    %352 = arith.divf %350, %351 : vector<16x32xf32>
    %353 = vector.broadcast %63 : vector<1x32xf32> to vector<16x32xf32>
    %354 = arith.addf %340, %353 : vector<16x32xf32>
    %355 = arith.mulf %346, %354 : vector<16x32xf32>
    %356 = arith.addf %336, %355 : vector<16x32xf32>
    %357 = math.tanh %356 : vector<16x32xf32>
    %cst_115 = arith.constant 1.000000e+00 : f32
    %358 = vector.broadcast %cst_115 : f32 to vector<16x32xf32>
    %359 = arith.subf %358, %352 : vector<16x32xf32>
    %360 = arith.mulf %359, %357 : vector<16x32xf32>
    %361 = arith.mulf %352, %315 : vector<16x32xf32>
    %362 = arith.addf %360, %361 : vector<16x32xf32>
    %363 = vector.extract_strided_slice %33 {offsets = [4, 0, 0], sizes = [1, 16, 32], strides = [1, 1, 1]} : vector<8x16x32xf32> to vector<1x16x32xf32>
    %364 = vector.shape_cast %363 : vector<1x16x32xf32> to vector<16x32xf32>
    %365 = vector.extract_strided_slice %41 {offsets = [4, 0, 0], sizes = [1, 16, 32], strides = [1, 1, 1]} : vector<8x16x32xf32> to vector<1x16x32xf32>
    %366 = vector.shape_cast %365 : vector<1x16x32xf32> to vector<16x32xf32>
    %367 = vector.extract_strided_slice %49 {offsets = [4, 0, 0], sizes = [1, 16, 32], strides = [1, 1, 1]} : vector<8x16x32xf32> to vector<1x16x32xf32>
    %368 = vector.shape_cast %367 : vector<1x16x32xf32> to vector<16x32xf32>
    %369 = arith.truncf %322 : vector<16x32xf32> to vector<16x32xbf16>
    %cst_116 = arith.constant dense<0.000000e+00> : vector<16x32xf32>
    %370 = tpu.matmul %369, %57, %cst_116 {dimension_numbers = #tpu.dot_dimension_numbers<[1], [0], [0], [1], [0, 0, 1, 1], [], []>} : vector<16x32xbf16>, vector<32x32xbf16>, vector<16x32xf32> -> vector<16x32xf32>
    %cst_117 = arith.constant dense<0.000000e+00> : vector<16x32xf32>
    %371 = tpu.matmul %369, %59, %cst_117 {dimension_numbers = #tpu.dot_dimension_numbers<[1], [0], [0], [1], [0, 0, 1, 1], [], []>} : vector<16x32xbf16>, vector<32x32xbf16>, vector<16x32xf32> -> vector<16x32xf32>
    %cst_118 = arith.constant dense<0.000000e+00> : vector<16x32xf32>
    %372 = tpu.matmul %369, %61, %cst_118 {dimension_numbers = #tpu.dot_dimension_numbers<[1], [0], [0], [1], [0, 0, 1, 1], [], []>} : vector<16x32xbf16>, vector<32x32xbf16>, vector<16x32xf32> -> vector<16x32xf32>
    %373 = arith.addf %364, %370 : vector<16x32xf32>
    %374 = arith.negf %373 : vector<16x32xf32>
    %375 = math.exp %374 : vector<16x32xf32>
    %cst_119 = arith.constant 1.000000e+00 : f32
    %376 = vector.broadcast %cst_119 : f32 to vector<16x32xf32>
    %377 = arith.addf %376, %375 : vector<16x32xf32>
    %378 = arith.divf %376, %377 : vector<16x32xf32>
    %379 = arith.addf %366, %371 : vector<16x32xf32>
    %380 = arith.negf %379 : vector<16x32xf32>
    %381 = math.exp %380 : vector<16x32xf32>
    %cst_120 = arith.constant 1.000000e+00 : f32
    %382 = vector.broadcast %cst_120 : f32 to vector<16x32xf32>
    %383 = arith.addf %382, %381 : vector<16x32xf32>
    %384 = arith.divf %382, %383 : vector<16x32xf32>
    %385 = vector.broadcast %65 : vector<1x32xf32> to vector<16x32xf32>
    %386 = arith.addf %372, %385 : vector<16x32xf32>
    %387 = arith.mulf %378, %386 : vector<16x32xf32>
    %388 = arith.addf %368, %387 : vector<16x32xf32>
    %389 = math.tanh %388 : vector<16x32xf32>
    %cst_121 = arith.constant 1.000000e+00 : f32
    %390 = vector.broadcast %cst_121 : f32 to vector<16x32xf32>
    %391 = arith.subf %390, %384 : vector<16x32xf32>
    %392 = arith.mulf %391, %389 : vector<16x32xf32>
    %393 = arith.mulf %384, %322 : vector<16x32xf32>
    %394 = arith.addf %392, %393 : vector<16x32xf32>
    %395 = vector.broadcast %329 : vector<16x1xf32> to vector<16x32xf32>
    %396 = arith.mulf %395, %362 : vector<16x32xf32>
    %cst_122 = arith.constant 1.000000e+00 : f32
    %397 = vector.broadcast %cst_122 : f32 to vector<16x1xf32>
    %398 = arith.subf %397, %329 : vector<16x1xf32>
    %399 = vector.broadcast %398 : vector<16x1xf32> to vector<16x32xf32>
    %400 = arith.mulf %399, %315 : vector<16x32xf32>
    %401 = arith.addf %396, %400 : vector<16x32xf32>
    %402 = vector.broadcast %330 : vector<16x1xf32> to vector<16x32xf32>
    %403 = arith.mulf %402, %394 : vector<16x32xf32>
    %cst_123 = arith.constant 1.000000e+00 : f32
    %404 = vector.broadcast %cst_123 : f32 to vector<16x1xf32>
    %405 = arith.subf %404, %330 : vector<16x1xf32>
    %406 = vector.broadcast %405 : vector<16x1xf32> to vector<16x32xf32>
    %407 = arith.mulf %406, %322 : vector<16x32xf32>
    %408 = arith.addf %403, %407 : vector<16x32xf32>
    %409 = vector.broadcast %329 : vector<16x1xf32> to vector<16x32xf32>
    %410 = arith.mulf %409, %401 : vector<16x32xf32>
    %411 = arith.addf %325, %410 : vector<16x32xf32>
    %412 = vector.broadcast %330 : vector<16x1xf32> to vector<16x32xf32>
    %413 = arith.mulf %412, %408 : vector<16x32xf32>
    %414 = arith.addf %328, %413 : vector<16x32xf32>
    %415 = vector.extract_strided_slice %66 {offsets = [0, 4], sizes = [16, 1], strides = [1, 1]} : vector<16x8xf32> to vector<16x1xf32>
    %416 = vector.extract_strided_slice %66 {offsets = [0, 3], sizes = [16, 1], strides = [1, 1]} : vector<16x8xf32> to vector<16x1xf32>
    %417 = vector.extract_strided_slice %9 {offsets = [4, 0, 0], sizes = [1, 16, 32], strides = [1, 1, 1]} : vector<8x16x32xf32> to vector<1x16x32xf32>
    %418 = vector.shape_cast %417 : vector<1x16x32xf32> to vector<16x32xf32>
    %419 = vector.extract_strided_slice %17 {offsets = [4, 0, 0], sizes = [1, 16, 32], strides = [1, 1, 1]} : vector<8x16x32xf32> to vector<1x16x32xf32>
    %420 = vector.shape_cast %419 : vector<1x16x32xf32> to vector<16x32xf32>
    %421 = vector.extract_strided_slice %25 {offsets = [4, 0, 0], sizes = [1, 16, 32], strides = [1, 1, 1]} : vector<8x16x32xf32> to vector<1x16x32xf32>
    %422 = vector.shape_cast %421 : vector<1x16x32xf32> to vector<16x32xf32>
    %423 = arith.truncf %401 : vector<16x32xf32> to vector<16x32xbf16>
    %cst_124 = arith.constant dense<0.000000e+00> : vector<16x32xf32>
    %424 = tpu.matmul %423, %51, %cst_124 {dimension_numbers = #tpu.dot_dimension_numbers<[1], [0], [0], [1], [0, 0, 1, 1], [], []>} : vector<16x32xbf16>, vector<32x32xbf16>, vector<16x32xf32> -> vector<16x32xf32>
    %cst_125 = arith.constant dense<0.000000e+00> : vector<16x32xf32>
    %425 = tpu.matmul %423, %53, %cst_125 {dimension_numbers = #tpu.dot_dimension_numbers<[1], [0], [0], [1], [0, 0, 1, 1], [], []>} : vector<16x32xbf16>, vector<32x32xbf16>, vector<16x32xf32> -> vector<16x32xf32>
    %cst_126 = arith.constant dense<0.000000e+00> : vector<16x32xf32>
    %426 = tpu.matmul %423, %55, %cst_126 {dimension_numbers = #tpu.dot_dimension_numbers<[1], [0], [0], [1], [0, 0, 1, 1], [], []>} : vector<16x32xbf16>, vector<32x32xbf16>, vector<16x32xf32> -> vector<16x32xf32>
    %427 = arith.addf %418, %424 : vector<16x32xf32>
    %428 = arith.negf %427 : vector<16x32xf32>
    %429 = math.exp %428 : vector<16x32xf32>
    %cst_127 = arith.constant 1.000000e+00 : f32
    %430 = vector.broadcast %cst_127 : f32 to vector<16x32xf32>
    %431 = arith.addf %430, %429 : vector<16x32xf32>
    %432 = arith.divf %430, %431 : vector<16x32xf32>
    %433 = arith.addf %420, %425 : vector<16x32xf32>
    %434 = arith.negf %433 : vector<16x32xf32>
    %435 = math.exp %434 : vector<16x32xf32>
    %cst_128 = arith.constant 1.000000e+00 : f32
    %436 = vector.broadcast %cst_128 : f32 to vector<16x32xf32>
    %437 = arith.addf %436, %435 : vector<16x32xf32>
    %438 = arith.divf %436, %437 : vector<16x32xf32>
    %439 = vector.broadcast %63 : vector<1x32xf32> to vector<16x32xf32>
    %440 = arith.addf %426, %439 : vector<16x32xf32>
    %441 = arith.mulf %432, %440 : vector<16x32xf32>
    %442 = arith.addf %422, %441 : vector<16x32xf32>
    %443 = math.tanh %442 : vector<16x32xf32>
    %cst_129 = arith.constant 1.000000e+00 : f32
    %444 = vector.broadcast %cst_129 : f32 to vector<16x32xf32>
    %445 = arith.subf %444, %438 : vector<16x32xf32>
    %446 = arith.mulf %445, %443 : vector<16x32xf32>
    %447 = arith.mulf %438, %401 : vector<16x32xf32>
    %448 = arith.addf %446, %447 : vector<16x32xf32>
    %449 = vector.extract_strided_slice %33 {offsets = [3, 0, 0], sizes = [1, 16, 32], strides = [1, 1, 1]} : vector<8x16x32xf32> to vector<1x16x32xf32>
    %450 = vector.shape_cast %449 : vector<1x16x32xf32> to vector<16x32xf32>
    %451 = vector.extract_strided_slice %41 {offsets = [3, 0, 0], sizes = [1, 16, 32], strides = [1, 1, 1]} : vector<8x16x32xf32> to vector<1x16x32xf32>
    %452 = vector.shape_cast %451 : vector<1x16x32xf32> to vector<16x32xf32>
    %453 = vector.extract_strided_slice %49 {offsets = [3, 0, 0], sizes = [1, 16, 32], strides = [1, 1, 1]} : vector<8x16x32xf32> to vector<1x16x32xf32>
    %454 = vector.shape_cast %453 : vector<1x16x32xf32> to vector<16x32xf32>
    %455 = arith.truncf %408 : vector<16x32xf32> to vector<16x32xbf16>
    %cst_130 = arith.constant dense<0.000000e+00> : vector<16x32xf32>
    %456 = tpu.matmul %455, %57, %cst_130 {dimension_numbers = #tpu.dot_dimension_numbers<[1], [0], [0], [1], [0, 0, 1, 1], [], []>} : vector<16x32xbf16>, vector<32x32xbf16>, vector<16x32xf32> -> vector<16x32xf32>
    %cst_131 = arith.constant dense<0.000000e+00> : vector<16x32xf32>
    %457 = tpu.matmul %455, %59, %cst_131 {dimension_numbers = #tpu.dot_dimension_numbers<[1], [0], [0], [1], [0, 0, 1, 1], [], []>} : vector<16x32xbf16>, vector<32x32xbf16>, vector<16x32xf32> -> vector<16x32xf32>
    %cst_132 = arith.constant dense<0.000000e+00> : vector<16x32xf32>
    %458 = tpu.matmul %455, %61, %cst_132 {dimension_numbers = #tpu.dot_dimension_numbers<[1], [0], [0], [1], [0, 0, 1, 1], [], []>} : vector<16x32xbf16>, vector<32x32xbf16>, vector<16x32xf32> -> vector<16x32xf32>
    %459 = arith.addf %450, %456 : vector<16x32xf32>
    %460 = arith.negf %459 : vector<16x32xf32>
    %461 = math.exp %460 : vector<16x32xf32>
    %cst_133 = arith.constant 1.000000e+00 : f32
    %462 = vector.broadcast %cst_133 : f32 to vector<16x32xf32>
    %463 = arith.addf %462, %461 : vector<16x32xf32>
    %464 = arith.divf %462, %463 : vector<16x32xf32>
    %465 = arith.addf %452, %457 : vector<16x32xf32>
    %466 = arith.negf %465 : vector<16x32xf32>
    %467 = math.exp %466 : vector<16x32xf32>
    %cst_134 = arith.constant 1.000000e+00 : f32
    %468 = vector.broadcast %cst_134 : f32 to vector<16x32xf32>
    %469 = arith.addf %468, %467 : vector<16x32xf32>
    %470 = arith.divf %468, %469 : vector<16x32xf32>
    %471 = vector.broadcast %65 : vector<1x32xf32> to vector<16x32xf32>
    %472 = arith.addf %458, %471 : vector<16x32xf32>
    %473 = arith.mulf %464, %472 : vector<16x32xf32>
    %474 = arith.addf %454, %473 : vector<16x32xf32>
    %475 = math.tanh %474 : vector<16x32xf32>
    %cst_135 = arith.constant 1.000000e+00 : f32
    %476 = vector.broadcast %cst_135 : f32 to vector<16x32xf32>
    %477 = arith.subf %476, %470 : vector<16x32xf32>
    %478 = arith.mulf %477, %475 : vector<16x32xf32>
    %479 = arith.mulf %470, %408 : vector<16x32xf32>
    %480 = arith.addf %478, %479 : vector<16x32xf32>
    %481 = vector.broadcast %415 : vector<16x1xf32> to vector<16x32xf32>
    %482 = arith.mulf %481, %448 : vector<16x32xf32>
    %cst_136 = arith.constant 1.000000e+00 : f32
    %483 = vector.broadcast %cst_136 : f32 to vector<16x1xf32>
    %484 = arith.subf %483, %415 : vector<16x1xf32>
    %485 = vector.broadcast %484 : vector<16x1xf32> to vector<16x32xf32>
    %486 = arith.mulf %485, %401 : vector<16x32xf32>
    %487 = arith.addf %482, %486 : vector<16x32xf32>
    %488 = vector.broadcast %416 : vector<16x1xf32> to vector<16x32xf32>
    %489 = arith.mulf %488, %480 : vector<16x32xf32>
    %cst_137 = arith.constant 1.000000e+00 : f32
    %490 = vector.broadcast %cst_137 : f32 to vector<16x1xf32>
    %491 = arith.subf %490, %416 : vector<16x1xf32>
    %492 = vector.broadcast %491 : vector<16x1xf32> to vector<16x32xf32>
    %493 = arith.mulf %492, %408 : vector<16x32xf32>
    %494 = arith.addf %489, %493 : vector<16x32xf32>
    %495 = vector.broadcast %415 : vector<16x1xf32> to vector<16x32xf32>
    %496 = arith.mulf %495, %487 : vector<16x32xf32>
    %497 = arith.addf %411, %496 : vector<16x32xf32>
    %498 = vector.broadcast %416 : vector<16x1xf32> to vector<16x32xf32>
    %499 = arith.mulf %498, %494 : vector<16x32xf32>
    %500 = arith.addf %414, %499 : vector<16x32xf32>
    %501 = vector.extract_strided_slice %66 {offsets = [0, 5], sizes = [16, 1], strides = [1, 1]} : vector<16x8xf32> to vector<16x1xf32>
    %502 = vector.extract_strided_slice %66 {offsets = [0, 2], sizes = [16, 1], strides = [1, 1]} : vector<16x8xf32> to vector<16x1xf32>
    %503 = vector.extract_strided_slice %9 {offsets = [5, 0, 0], sizes = [1, 16, 32], strides = [1, 1, 1]} : vector<8x16x32xf32> to vector<1x16x32xf32>
    %504 = vector.shape_cast %503 : vector<1x16x32xf32> to vector<16x32xf32>
    %505 = vector.extract_strided_slice %17 {offsets = [5, 0, 0], sizes = [1, 16, 32], strides = [1, 1, 1]} : vector<8x16x32xf32> to vector<1x16x32xf32>
    %506 = vector.shape_cast %505 : vector<1x16x32xf32> to vector<16x32xf32>
    %507 = vector.extract_strided_slice %25 {offsets = [5, 0, 0], sizes = [1, 16, 32], strides = [1, 1, 1]} : vector<8x16x32xf32> to vector<1x16x32xf32>
    %508 = vector.shape_cast %507 : vector<1x16x32xf32> to vector<16x32xf32>
    %509 = arith.truncf %487 : vector<16x32xf32> to vector<16x32xbf16>
    %cst_138 = arith.constant dense<0.000000e+00> : vector<16x32xf32>
    %510 = tpu.matmul %509, %51, %cst_138 {dimension_numbers = #tpu.dot_dimension_numbers<[1], [0], [0], [1], [0, 0, 1, 1], [], []>} : vector<16x32xbf16>, vector<32x32xbf16>, vector<16x32xf32> -> vector<16x32xf32>
    %cst_139 = arith.constant dense<0.000000e+00> : vector<16x32xf32>
    %511 = tpu.matmul %509, %53, %cst_139 {dimension_numbers = #tpu.dot_dimension_numbers<[1], [0], [0], [1], [0, 0, 1, 1], [], []>} : vector<16x32xbf16>, vector<32x32xbf16>, vector<16x32xf32> -> vector<16x32xf32>
    %cst_140 = arith.constant dense<0.000000e+00> : vector<16x32xf32>
    %512 = tpu.matmul %509, %55, %cst_140 {dimension_numbers = #tpu.dot_dimension_numbers<[1], [0], [0], [1], [0, 0, 1, 1], [], []>} : vector<16x32xbf16>, vector<32x32xbf16>, vector<16x32xf32> -> vector<16x32xf32>
    %513 = arith.addf %504, %510 : vector<16x32xf32>
    %514 = arith.negf %513 : vector<16x32xf32>
    %515 = math.exp %514 : vector<16x32xf32>
    %cst_141 = arith.constant 1.000000e+00 : f32
    %516 = vector.broadcast %cst_141 : f32 to vector<16x32xf32>
    %517 = arith.addf %516, %515 : vector<16x32xf32>
    %518 = arith.divf %516, %517 : vector<16x32xf32>
    %519 = arith.addf %506, %511 : vector<16x32xf32>
    %520 = arith.negf %519 : vector<16x32xf32>
    %521 = math.exp %520 : vector<16x32xf32>
    %cst_142 = arith.constant 1.000000e+00 : f32
    %522 = vector.broadcast %cst_142 : f32 to vector<16x32xf32>
    %523 = arith.addf %522, %521 : vector<16x32xf32>
    %524 = arith.divf %522, %523 : vector<16x32xf32>
    %525 = vector.broadcast %63 : vector<1x32xf32> to vector<16x32xf32>
    %526 = arith.addf %512, %525 : vector<16x32xf32>
    %527 = arith.mulf %518, %526 : vector<16x32xf32>
    %528 = arith.addf %508, %527 : vector<16x32xf32>
    %529 = math.tanh %528 : vector<16x32xf32>
    %cst_143 = arith.constant 1.000000e+00 : f32
    %530 = vector.broadcast %cst_143 : f32 to vector<16x32xf32>
    %531 = arith.subf %530, %524 : vector<16x32xf32>
    %532 = arith.mulf %531, %529 : vector<16x32xf32>
    %533 = arith.mulf %524, %487 : vector<16x32xf32>
    %534 = arith.addf %532, %533 : vector<16x32xf32>
    %535 = vector.extract_strided_slice %33 {offsets = [2, 0, 0], sizes = [1, 16, 32], strides = [1, 1, 1]} : vector<8x16x32xf32> to vector<1x16x32xf32>
    %536 = vector.shape_cast %535 : vector<1x16x32xf32> to vector<16x32xf32>
    %537 = vector.extract_strided_slice %41 {offsets = [2, 0, 0], sizes = [1, 16, 32], strides = [1, 1, 1]} : vector<8x16x32xf32> to vector<1x16x32xf32>
    %538 = vector.shape_cast %537 : vector<1x16x32xf32> to vector<16x32xf32>
    %539 = vector.extract_strided_slice %49 {offsets = [2, 0, 0], sizes = [1, 16, 32], strides = [1, 1, 1]} : vector<8x16x32xf32> to vector<1x16x32xf32>
    %540 = vector.shape_cast %539 : vector<1x16x32xf32> to vector<16x32xf32>
    %541 = arith.truncf %494 : vector<16x32xf32> to vector<16x32xbf16>
    %cst_144 = arith.constant dense<0.000000e+00> : vector<16x32xf32>
    %542 = tpu.matmul %541, %57, %cst_144 {dimension_numbers = #tpu.dot_dimension_numbers<[1], [0], [0], [1], [0, 0, 1, 1], [], []>} : vector<16x32xbf16>, vector<32x32xbf16>, vector<16x32xf32> -> vector<16x32xf32>
    %cst_145 = arith.constant dense<0.000000e+00> : vector<16x32xf32>
    %543 = tpu.matmul %541, %59, %cst_145 {dimension_numbers = #tpu.dot_dimension_numbers<[1], [0], [0], [1], [0, 0, 1, 1], [], []>} : vector<16x32xbf16>, vector<32x32xbf16>, vector<16x32xf32> -> vector<16x32xf32>
    %cst_146 = arith.constant dense<0.000000e+00> : vector<16x32xf32>
    %544 = tpu.matmul %541, %61, %cst_146 {dimension_numbers = #tpu.dot_dimension_numbers<[1], [0], [0], [1], [0, 0, 1, 1], [], []>} : vector<16x32xbf16>, vector<32x32xbf16>, vector<16x32xf32> -> vector<16x32xf32>
    %545 = arith.addf %536, %542 : vector<16x32xf32>
    %546 = arith.negf %545 : vector<16x32xf32>
    %547 = math.exp %546 : vector<16x32xf32>
    %cst_147 = arith.constant 1.000000e+00 : f32
    %548 = vector.broadcast %cst_147 : f32 to vector<16x32xf32>
    %549 = arith.addf %548, %547 : vector<16x32xf32>
    %550 = arith.divf %548, %549 : vector<16x32xf32>
    %551 = arith.addf %538, %543 : vector<16x32xf32>
    %552 = arith.negf %551 : vector<16x32xf32>
    %553 = math.exp %552 : vector<16x32xf32>
    %cst_148 = arith.constant 1.000000e+00 : f32
    %554 = vector.broadcast %cst_148 : f32 to vector<16x32xf32>
    %555 = arith.addf %554, %553 : vector<16x32xf32>
    %556 = arith.divf %554, %555 : vector<16x32xf32>
    %557 = vector.broadcast %65 : vector<1x32xf32> to vector<16x32xf32>
    %558 = arith.addf %544, %557 : vector<16x32xf32>
    %559 = arith.mulf %550, %558 : vector<16x32xf32>
    %560 = arith.addf %540, %559 : vector<16x32xf32>
    %561 = math.tanh %560 : vector<16x32xf32>
    %cst_149 = arith.constant 1.000000e+00 : f32
    %562 = vector.broadcast %cst_149 : f32 to vector<16x32xf32>
    %563 = arith.subf %562, %556 : vector<16x32xf32>
    %564 = arith.mulf %563, %561 : vector<16x32xf32>
    %565 = arith.mulf %556, %494 : vector<16x32xf32>
    %566 = arith.addf %564, %565 : vector<16x32xf32>
    %567 = vector.broadcast %501 : vector<16x1xf32> to vector<16x32xf32>
    %568 = arith.mulf %567, %534 : vector<16x32xf32>
    %cst_150 = arith.constant 1.000000e+00 : f32
    %569 = vector.broadcast %cst_150 : f32 to vector<16x1xf32>
    %570 = arith.subf %569, %501 : vector<16x1xf32>
    %571 = vector.broadcast %570 : vector<16x1xf32> to vector<16x32xf32>
    %572 = arith.mulf %571, %487 : vector<16x32xf32>
    %573 = arith.addf %568, %572 : vector<16x32xf32>
    %574 = vector.broadcast %502 : vector<16x1xf32> to vector<16x32xf32>
    %575 = arith.mulf %574, %566 : vector<16x32xf32>
    %cst_151 = arith.constant 1.000000e+00 : f32
    %576 = vector.broadcast %cst_151 : f32 to vector<16x1xf32>
    %577 = arith.subf %576, %502 : vector<16x1xf32>
    %578 = vector.broadcast %577 : vector<16x1xf32> to vector<16x32xf32>
    %579 = arith.mulf %578, %494 : vector<16x32xf32>
    %580 = arith.addf %575, %579 : vector<16x32xf32>
    %581 = vector.broadcast %501 : vector<16x1xf32> to vector<16x32xf32>
    %582 = arith.mulf %581, %573 : vector<16x32xf32>
    %583 = arith.addf %497, %582 : vector<16x32xf32>
    %584 = vector.broadcast %502 : vector<16x1xf32> to vector<16x32xf32>
    %585 = arith.mulf %584, %580 : vector<16x32xf32>
    %586 = arith.addf %500, %585 : vector<16x32xf32>
    %587 = vector.extract_strided_slice %66 {offsets = [0, 6], sizes = [16, 1], strides = [1, 1]} : vector<16x8xf32> to vector<16x1xf32>
    %588 = vector.extract_strided_slice %66 {offsets = [0, 1], sizes = [16, 1], strides = [1, 1]} : vector<16x8xf32> to vector<16x1xf32>
    %589 = vector.extract_strided_slice %9 {offsets = [6, 0, 0], sizes = [1, 16, 32], strides = [1, 1, 1]} : vector<8x16x32xf32> to vector<1x16x32xf32>
    %590 = vector.shape_cast %589 : vector<1x16x32xf32> to vector<16x32xf32>
    %591 = vector.extract_strided_slice %17 {offsets = [6, 0, 0], sizes = [1, 16, 32], strides = [1, 1, 1]} : vector<8x16x32xf32> to vector<1x16x32xf32>
    %592 = vector.shape_cast %591 : vector<1x16x32xf32> to vector<16x32xf32>
    %593 = vector.extract_strided_slice %25 {offsets = [6, 0, 0], sizes = [1, 16, 32], strides = [1, 1, 1]} : vector<8x16x32xf32> to vector<1x16x32xf32>
    %594 = vector.shape_cast %593 : vector<1x16x32xf32> to vector<16x32xf32>
    %595 = arith.truncf %573 : vector<16x32xf32> to vector<16x32xbf16>
    %cst_152 = arith.constant dense<0.000000e+00> : vector<16x32xf32>
    %596 = tpu.matmul %595, %51, %cst_152 {dimension_numbers = #tpu.dot_dimension_numbers<[1], [0], [0], [1], [0, 0, 1, 1], [], []>} : vector<16x32xbf16>, vector<32x32xbf16>, vector<16x32xf32> -> vector<16x32xf32>
    %cst_153 = arith.constant dense<0.000000e+00> : vector<16x32xf32>
    %597 = tpu.matmul %595, %53, %cst_153 {dimension_numbers = #tpu.dot_dimension_numbers<[1], [0], [0], [1], [0, 0, 1, 1], [], []>} : vector<16x32xbf16>, vector<32x32xbf16>, vector<16x32xf32> -> vector<16x32xf32>
    %cst_154 = arith.constant dense<0.000000e+00> : vector<16x32xf32>
    %598 = tpu.matmul %595, %55, %cst_154 {dimension_numbers = #tpu.dot_dimension_numbers<[1], [0], [0], [1], [0, 0, 1, 1], [], []>} : vector<16x32xbf16>, vector<32x32xbf16>, vector<16x32xf32> -> vector<16x32xf32>
    %599 = arith.addf %590, %596 : vector<16x32xf32>
    %600 = arith.negf %599 : vector<16x32xf32>
    %601 = math.exp %600 : vector<16x32xf32>
    %cst_155 = arith.constant 1.000000e+00 : f32
    %602 = vector.broadcast %cst_155 : f32 to vector<16x32xf32>
    %603 = arith.addf %602, %601 : vector<16x32xf32>
    %604 = arith.divf %602, %603 : vector<16x32xf32>
    %605 = arith.addf %592, %597 : vector<16x32xf32>
    %606 = arith.negf %605 : vector<16x32xf32>
    %607 = math.exp %606 : vector<16x32xf32>
    %cst_156 = arith.constant 1.000000e+00 : f32
    %608 = vector.broadcast %cst_156 : f32 to vector<16x32xf32>
    %609 = arith.addf %608, %607 : vector<16x32xf32>
    %610 = arith.divf %608, %609 : vector<16x32xf32>
    %611 = vector.broadcast %63 : vector<1x32xf32> to vector<16x32xf32>
    %612 = arith.addf %598, %611 : vector<16x32xf32>
    %613 = arith.mulf %604, %612 : vector<16x32xf32>
    %614 = arith.addf %594, %613 : vector<16x32xf32>
    %615 = math.tanh %614 : vector<16x32xf32>
    %cst_157 = arith.constant 1.000000e+00 : f32
    %616 = vector.broadcast %cst_157 : f32 to vector<16x32xf32>
    %617 = arith.subf %616, %610 : vector<16x32xf32>
    %618 = arith.mulf %617, %615 : vector<16x32xf32>
    %619 = arith.mulf %610, %573 : vector<16x32xf32>
    %620 = arith.addf %618, %619 : vector<16x32xf32>
    %621 = vector.extract_strided_slice %33 {offsets = [1, 0, 0], sizes = [1, 16, 32], strides = [1, 1, 1]} : vector<8x16x32xf32> to vector<1x16x32xf32>
    %622 = vector.shape_cast %621 : vector<1x16x32xf32> to vector<16x32xf32>
    %623 = vector.extract_strided_slice %41 {offsets = [1, 0, 0], sizes = [1, 16, 32], strides = [1, 1, 1]} : vector<8x16x32xf32> to vector<1x16x32xf32>
    %624 = vector.shape_cast %623 : vector<1x16x32xf32> to vector<16x32xf32>
    %625 = vector.extract_strided_slice %49 {offsets = [1, 0, 0], sizes = [1, 16, 32], strides = [1, 1, 1]} : vector<8x16x32xf32> to vector<1x16x32xf32>
    %626 = vector.shape_cast %625 : vector<1x16x32xf32> to vector<16x32xf32>
    %627 = arith.truncf %580 : vector<16x32xf32> to vector<16x32xbf16>
    %cst_158 = arith.constant dense<0.000000e+00> : vector<16x32xf32>
    %628 = tpu.matmul %627, %57, %cst_158 {dimension_numbers = #tpu.dot_dimension_numbers<[1], [0], [0], [1], [0, 0, 1, 1], [], []>} : vector<16x32xbf16>, vector<32x32xbf16>, vector<16x32xf32> -> vector<16x32xf32>
    %cst_159 = arith.constant dense<0.000000e+00> : vector<16x32xf32>
    %629 = tpu.matmul %627, %59, %cst_159 {dimension_numbers = #tpu.dot_dimension_numbers<[1], [0], [0], [1], [0, 0, 1, 1], [], []>} : vector<16x32xbf16>, vector<32x32xbf16>, vector<16x32xf32> -> vector<16x32xf32>
    %cst_160 = arith.constant dense<0.000000e+00> : vector<16x32xf32>
    %630 = tpu.matmul %627, %61, %cst_160 {dimension_numbers = #tpu.dot_dimension_numbers<[1], [0], [0], [1], [0, 0, 1, 1], [], []>} : vector<16x32xbf16>, vector<32x32xbf16>, vector<16x32xf32> -> vector<16x32xf32>
    %631 = arith.addf %622, %628 : vector<16x32xf32>
    %632 = arith.negf %631 : vector<16x32xf32>
    %633 = math.exp %632 : vector<16x32xf32>
    %cst_161 = arith.constant 1.000000e+00 : f32
    %634 = vector.broadcast %cst_161 : f32 to vector<16x32xf32>
    %635 = arith.addf %634, %633 : vector<16x32xf32>
    %636 = arith.divf %634, %635 : vector<16x32xf32>
    %637 = arith.addf %624, %629 : vector<16x32xf32>
    %638 = arith.negf %637 : vector<16x32xf32>
    %639 = math.exp %638 : vector<16x32xf32>
    %cst_162 = arith.constant 1.000000e+00 : f32
    %640 = vector.broadcast %cst_162 : f32 to vector<16x32xf32>
    %641 = arith.addf %640, %639 : vector<16x32xf32>
    %642 = arith.divf %640, %641 : vector<16x32xf32>
    %643 = vector.broadcast %65 : vector<1x32xf32> to vector<16x32xf32>
    %644 = arith.addf %630, %643 : vector<16x32xf32>
    %645 = arith.mulf %636, %644 : vector<16x32xf32>
    %646 = arith.addf %626, %645 : vector<16x32xf32>
    %647 = math.tanh %646 : vector<16x32xf32>
    %cst_163 = arith.constant 1.000000e+00 : f32
    %648 = vector.broadcast %cst_163 : f32 to vector<16x32xf32>
    %649 = arith.subf %648, %642 : vector<16x32xf32>
    %650 = arith.mulf %649, %647 : vector<16x32xf32>
    %651 = arith.mulf %642, %580 : vector<16x32xf32>
    %652 = arith.addf %650, %651 : vector<16x32xf32>
    %653 = vector.broadcast %587 : vector<16x1xf32> to vector<16x32xf32>
    %654 = arith.mulf %653, %620 : vector<16x32xf32>
    %cst_164 = arith.constant 1.000000e+00 : f32
    %655 = vector.broadcast %cst_164 : f32 to vector<16x1xf32>
    %656 = arith.subf %655, %587 : vector<16x1xf32>
    %657 = vector.broadcast %656 : vector<16x1xf32> to vector<16x32xf32>
    %658 = arith.mulf %657, %573 : vector<16x32xf32>
    %659 = arith.addf %654, %658 : vector<16x32xf32>
    %660 = vector.broadcast %588 : vector<16x1xf32> to vector<16x32xf32>
    %661 = arith.mulf %660, %652 : vector<16x32xf32>
    %cst_165 = arith.constant 1.000000e+00 : f32
    %662 = vector.broadcast %cst_165 : f32 to vector<16x1xf32>
    %663 = arith.subf %662, %588 : vector<16x1xf32>
    %664 = vector.broadcast %663 : vector<16x1xf32> to vector<16x32xf32>
    %665 = arith.mulf %664, %580 : vector<16x32xf32>
    %666 = arith.addf %661, %665 : vector<16x32xf32>
    %667 = vector.broadcast %587 : vector<16x1xf32> to vector<16x32xf32>
    %668 = arith.mulf %667, %659 : vector<16x32xf32>
    %669 = arith.addf %583, %668 : vector<16x32xf32>
    %670 = vector.broadcast %588 : vector<16x1xf32> to vector<16x32xf32>
    %671 = arith.mulf %670, %666 : vector<16x32xf32>
    %672 = arith.addf %586, %671 : vector<16x32xf32>
    %673 = vector.extract_strided_slice %66 {offsets = [0, 7], sizes = [16, 1], strides = [1, 1]} : vector<16x8xf32> to vector<16x1xf32>
    %674 = vector.extract_strided_slice %66 {offsets = [0, 0], sizes = [16, 1], strides = [1, 1]} : vector<16x8xf32> to vector<16x1xf32>
    %675 = vector.extract_strided_slice %9 {offsets = [7, 0, 0], sizes = [1, 16, 32], strides = [1, 1, 1]} : vector<8x16x32xf32> to vector<1x16x32xf32>
    %676 = vector.shape_cast %675 : vector<1x16x32xf32> to vector<16x32xf32>
    %677 = vector.extract_strided_slice %17 {offsets = [7, 0, 0], sizes = [1, 16, 32], strides = [1, 1, 1]} : vector<8x16x32xf32> to vector<1x16x32xf32>
    %678 = vector.shape_cast %677 : vector<1x16x32xf32> to vector<16x32xf32>
    %679 = vector.extract_strided_slice %25 {offsets = [7, 0, 0], sizes = [1, 16, 32], strides = [1, 1, 1]} : vector<8x16x32xf32> to vector<1x16x32xf32>
    %680 = vector.shape_cast %679 : vector<1x16x32xf32> to vector<16x32xf32>
    %681 = arith.truncf %659 : vector<16x32xf32> to vector<16x32xbf16>
    %cst_166 = arith.constant dense<0.000000e+00> : vector<16x32xf32>
    %682 = tpu.matmul %681, %51, %cst_166 {dimension_numbers = #tpu.dot_dimension_numbers<[1], [0], [0], [1], [0, 0, 1, 1], [], []>} : vector<16x32xbf16>, vector<32x32xbf16>, vector<16x32xf32> -> vector<16x32xf32>
    %cst_167 = arith.constant dense<0.000000e+00> : vector<16x32xf32>
    %683 = tpu.matmul %681, %53, %cst_167 {dimension_numbers = #tpu.dot_dimension_numbers<[1], [0], [0], [1], [0, 0, 1, 1], [], []>} : vector<16x32xbf16>, vector<32x32xbf16>, vector<16x32xf32> -> vector<16x32xf32>
    %cst_168 = arith.constant dense<0.000000e+00> : vector<16x32xf32>
    %684 = tpu.matmul %681, %55, %cst_168 {dimension_numbers = #tpu.dot_dimension_numbers<[1], [0], [0], [1], [0, 0, 1, 1], [], []>} : vector<16x32xbf16>, vector<32x32xbf16>, vector<16x32xf32> -> vector<16x32xf32>
    %685 = arith.addf %676, %682 : vector<16x32xf32>
    %686 = arith.negf %685 : vector<16x32xf32>
    %687 = math.exp %686 : vector<16x32xf32>
    %cst_169 = arith.constant 1.000000e+00 : f32
    %688 = vector.broadcast %cst_169 : f32 to vector<16x32xf32>
    %689 = arith.addf %688, %687 : vector<16x32xf32>
    %690 = arith.divf %688, %689 : vector<16x32xf32>
    %691 = arith.addf %678, %683 : vector<16x32xf32>
    %692 = arith.negf %691 : vector<16x32xf32>
    %693 = math.exp %692 : vector<16x32xf32>
    %cst_170 = arith.constant 1.000000e+00 : f32
    %694 = vector.broadcast %cst_170 : f32 to vector<16x32xf32>
    %695 = arith.addf %694, %693 : vector<16x32xf32>
    %696 = arith.divf %694, %695 : vector<16x32xf32>
    %697 = vector.broadcast %63 : vector<1x32xf32> to vector<16x32xf32>
    %698 = arith.addf %684, %697 : vector<16x32xf32>
    %699 = arith.mulf %690, %698 : vector<16x32xf32>
    %700 = arith.addf %680, %699 : vector<16x32xf32>
    %701 = math.tanh %700 : vector<16x32xf32>
    %cst_171 = arith.constant 1.000000e+00 : f32
    %702 = vector.broadcast %cst_171 : f32 to vector<16x32xf32>
    %703 = arith.subf %702, %696 : vector<16x32xf32>
    %704 = arith.mulf %703, %701 : vector<16x32xf32>
    %705 = arith.mulf %696, %659 : vector<16x32xf32>
    %706 = arith.addf %704, %705 : vector<16x32xf32>
    %707 = vector.extract_strided_slice %33 {offsets = [0, 0, 0], sizes = [1, 16, 32], strides = [1, 1, 1]} : vector<8x16x32xf32> to vector<1x16x32xf32>
    %708 = vector.shape_cast %707 : vector<1x16x32xf32> to vector<16x32xf32>
    %709 = vector.extract_strided_slice %41 {offsets = [0, 0, 0], sizes = [1, 16, 32], strides = [1, 1, 1]} : vector<8x16x32xf32> to vector<1x16x32xf32>
    %710 = vector.shape_cast %709 : vector<1x16x32xf32> to vector<16x32xf32>
    %711 = vector.extract_strided_slice %49 {offsets = [0, 0, 0], sizes = [1, 16, 32], strides = [1, 1, 1]} : vector<8x16x32xf32> to vector<1x16x32xf32>
    %712 = vector.shape_cast %711 : vector<1x16x32xf32> to vector<16x32xf32>
    %713 = arith.truncf %666 : vector<16x32xf32> to vector<16x32xbf16>
    %cst_172 = arith.constant dense<0.000000e+00> : vector<16x32xf32>
    %714 = tpu.matmul %713, %57, %cst_172 {dimension_numbers = #tpu.dot_dimension_numbers<[1], [0], [0], [1], [0, 0, 1, 1], [], []>} : vector<16x32xbf16>, vector<32x32xbf16>, vector<16x32xf32> -> vector<16x32xf32>
    %cst_173 = arith.constant dense<0.000000e+00> : vector<16x32xf32>
    %715 = tpu.matmul %713, %59, %cst_173 {dimension_numbers = #tpu.dot_dimension_numbers<[1], [0], [0], [1], [0, 0, 1, 1], [], []>} : vector<16x32xbf16>, vector<32x32xbf16>, vector<16x32xf32> -> vector<16x32xf32>
    %cst_174 = arith.constant dense<0.000000e+00> : vector<16x32xf32>
    %716 = tpu.matmul %713, %61, %cst_174 {dimension_numbers = #tpu.dot_dimension_numbers<[1], [0], [0], [1], [0, 0, 1, 1], [], []>} : vector<16x32xbf16>, vector<32x32xbf16>, vector<16x32xf32> -> vector<16x32xf32>
    %717 = arith.addf %708, %714 : vector<16x32xf32>
    %718 = arith.negf %717 : vector<16x32xf32>
    %719 = math.exp %718 : vector<16x32xf32>
    %cst_175 = arith.constant 1.000000e+00 : f32
    %720 = vector.broadcast %cst_175 : f32 to vector<16x32xf32>
    %721 = arith.addf %720, %719 : vector<16x32xf32>
    %722 = arith.divf %720, %721 : vector<16x32xf32>
    %723 = arith.addf %710, %715 : vector<16x32xf32>
    %724 = arith.negf %723 : vector<16x32xf32>
    %725 = math.exp %724 : vector<16x32xf32>
    %cst_176 = arith.constant 1.000000e+00 : f32
    %726 = vector.broadcast %cst_176 : f32 to vector<16x32xf32>
    %727 = arith.addf %726, %725 : vector<16x32xf32>
    %728 = arith.divf %726, %727 : vector<16x32xf32>
    %729 = vector.broadcast %65 : vector<1x32xf32> to vector<16x32xf32>
    %730 = arith.addf %716, %729 : vector<16x32xf32>
    %731 = arith.mulf %722, %730 : vector<16x32xf32>
    %732 = arith.addf %712, %731 : vector<16x32xf32>
    %733 = math.tanh %732 : vector<16x32xf32>
    %cst_177 = arith.constant 1.000000e+00 : f32
    %734 = vector.broadcast %cst_177 : f32 to vector<16x32xf32>
    %735 = arith.subf %734, %728 : vector<16x32xf32>
    %736 = arith.mulf %735, %733 : vector<16x32xf32>
    %737 = arith.mulf %728, %666 : vector<16x32xf32>
    %738 = arith.addf %736, %737 : vector<16x32xf32>
    %739 = vector.broadcast %673 : vector<16x1xf32> to vector<16x32xf32>
    %740 = arith.mulf %739, %706 : vector<16x32xf32>
    %cst_178 = arith.constant 1.000000e+00 : f32
    %741 = vector.broadcast %cst_178 : f32 to vector<16x1xf32>
    %742 = arith.subf %741, %673 : vector<16x1xf32>
    %743 = vector.broadcast %742 : vector<16x1xf32> to vector<16x32xf32>
    %744 = arith.mulf %743, %659 : vector<16x32xf32>
    %745 = arith.addf %740, %744 : vector<16x32xf32>
    %746 = vector.broadcast %674 : vector<16x1xf32> to vector<16x32xf32>
    %747 = arith.mulf %746, %738 : vector<16x32xf32>
    %cst_179 = arith.constant 1.000000e+00 : f32
    %748 = vector.broadcast %cst_179 : f32 to vector<16x1xf32>
    %749 = arith.subf %748, %674 : vector<16x1xf32>
    %750 = vector.broadcast %749 : vector<16x1xf32> to vector<16x32xf32>
    %751 = arith.mulf %750, %666 : vector<16x32xf32>
    %752 = arith.addf %747, %751 : vector<16x32xf32>
    %753 = vector.broadcast %673 : vector<16x1xf32> to vector<16x32xf32>
    %754 = arith.mulf %753, %745 : vector<16x32xf32>
    %755 = arith.addf %669, %754 : vector<16x32xf32>
    %756 = vector.broadcast %674 : vector<16x1xf32> to vector<16x32xf32>
    %757 = arith.mulf %756, %752 : vector<16x32xf32>
    %758 = arith.addf %672, %757 : vector<16x32xf32>
    %c0_180 = arith.constant 0 : index
    %c0_181 = arith.constant 0 : index
    %759 = vector.load %arg3[%c0_180, %c0_181] : memref<16x1xf32, #tpu.memory_space<vmem>>, vector<16x1xf32>
    %760 = tpu.concatenate %755, %758 in 1 : vector<16x32xf32>, vector<16x32xf32> -> vector<16x64xf32>
    %761 = vector.broadcast %759 : vector<16x1xf32> to vector<16x64xf32>
    %762 = arith.mulf %760, %761 : vector<16x64xf32>
    %c0_182 = arith.constant 0 : index
    %c0_183 = arith.constant 0 : index
    %763 = vector.load %arg9[%c0_182, %c0_183] : memref<16x64xf32, #tpu.memory_space<vmem>>, vector<16x64xf32>
    tpu.vector_store %arg9[%c0_182, %c0_183], %762 {strides = array<i32>} : memref<16x64xf32, #tpu.memory_space<vmem>>, vector<16x64xf32>,
    return
  }
  func.func @transform_0(%arg0: i32) -> (i32, i32, i32) {
    %c0_i32 = arith.constant 0 : i32
    %c0_i32_0 = arith.constant 0 : i32
    %c0_i32_1 = arith.constant 0 : i32
    return %c0_i32, %arg0, %c0_i32_0 : i32, i32, i32
  }
  func.func @transform_1(%arg0: i32) -> (i32, i32) {
    %c0_i32 = arith.constant 0 : i32
    %c0_i32_0 = arith.constant 0 : i32
    return %arg0, %c0_i32 : i32, i32
  }
  func.func @transform_2(%arg0: i32) -> (i32, i32) {
    %c0_i32 = arith.constant 0 : i32
    %c0_i32_0 = arith.constant 0 : i32
    return %arg0, %c0_i32 : i32, i32
  }
  func.func @transform_3(%arg0: i32) -> (i32, i32, i32) {
    %c0_i32 = arith.constant 0 : i32
    %c0_i32_0 = arith.constant 0 : i32
    %c0_i32_1 = arith.constant 0 : i32
    %c0_i32_2 = arith.constant 0 : i32
    return %c0_i32, %c0_i32_0, %c0_i32_1 : i32, i32, i32
  }
  func.func @transform_4(%arg0: i32) -> (i32, i32, i32) {
    %c0_i32 = arith.constant 0 : i32
    %c0_i32_0 = arith.constant 0 : i32
    %c0_i32_1 = arith.constant 0 : i32
    %c0_i32_2 = arith.constant 0 : i32
    return %c0_i32, %c0_i32_0, %c0_i32_1 : i32, i32, i32
  }
  func.func @transform_5(%arg0: i32) -> (i32, i32, i32) {
    %c0_i32 = arith.constant 0 : i32
    %c0_i32_0 = arith.constant 0 : i32
    %c0_i32_1 = arith.constant 0 : i32
    %c0_i32_2 = arith.constant 0 : i32
    return %c0_i32, %c0_i32_0, %c0_i32_1 : i32, i32, i32
  }
  func.func @transform_6(%arg0: i32) -> (i32, i32, i32) {
    %c0_i32 = arith.constant 0 : i32
    %c0_i32_0 = arith.constant 0 : i32
    %c0_i32_1 = arith.constant 0 : i32
    %c0_i32_2 = arith.constant 0 : i32
    return %c0_i32, %c0_i32_0, %c0_i32_1 : i32, i32, i32
  }
  func.func @transform_7(%arg0: i32) -> (i32, i32, i32) {
    %c0_i32 = arith.constant 0 : i32
    %c0_i32_0 = arith.constant 0 : i32
    %c0_i32_1 = arith.constant 0 : i32
    %c0_i32_2 = arith.constant 0 : i32
    return %c0_i32, %c0_i32_0, %c0_i32_1 : i32, i32, i32
  }
  func.func @transform_8(%arg0: i32) -> (i32, i32) {
    %c0_i32 = arith.constant 0 : i32
    %c0_i32_0 = arith.constant 0 : i32
    return %arg0, %c0_i32 : i32, i32
  }
}

</mosaic_0001>

<bundles_post_ra>
// kernel: gru_encoder_forward.1
= control target key start
LH: loop header
LB: loop body
LE: loop exit
PB: predicated region body
PF: predicated region fallthrough
CT: control target
= control target key end

     0   :  { %13 = vsyncpa [#allocation4], 0  ;;  %s6482_s0 = inlined_call_operand.vmem [shape: bf16[8,32,32], index: 0, kind: input, shape index: {}]   ;;  %s6483_s1 = inlined_call_operand.vmem [shape: f32[32,8], index: 1, kind: input, shape index: {}]   ;;  %s6484_s2 = inlined_call_operand.vmem [shape: f32[32,1], index: 2, kind: input, shape index: {}]   ;;  %s6485_s3 = inlined_call_operand.vmem [shape: bf16[6,32,32], index: 3, kind: input, shape index: {}]   ;;  %s6486_s4 = inlined_call_operand.vmem [shape: bf16[3,32,32], index: 4, kind: input, shape index: {}]   ;;  %s6487_s5 = inlined_call_operand.vmem [shape: bf16[3,32,32], index: 5, kind: input, shape index: {}]   ;;  %s6488_s6 = inlined_call_operand.vmem [shape: f32[6,1,32], index: 6, kind: input, shape index: {}]   ;;  %s6489_s7 = inlined_call_operand.vmem [shape: f32[2,1,32], index: 7, kind: input, shape index: {}]   ;;  %s6490_s8 = inlined_call_operand.hbm [shape: f32[32,64], index: 8, kind: output, shape index: {}]  }
   0x1   :  { %15 = vsyncpa [#allocation4 + $0x1], 0  ;;  %s4684_s27 = smov 0   ;;  %s4686_s28 = smov 0  }
   0x2   :  { %s4688_s29 = smov 0   ;;  %s4690_s30 = smov 0  }
   0x3 LB: > { %s4705_s9 = sadd.s32 4294967295, %s4626_s30   ;;  %s3735_s10 = sadd.s32 4294967294, %s4626_s30   ;;  %s4626_s30 = sphi %s4690_s30, %s6752_s30   ;;  %s4622_s29 = sphi %s4688_s29, %s6751_s29   ;;  %s4618_s28 = sphi %s4686_s28, %s6750_s28   ;;  %s4614_s27 = sphi %s4684_s27, %s6749_s27  }
   0x4   : > { %s4709_s11 = sadd.s32 1, %s4626_s30   ;;  %s28_s12 = sadd.s32 1, %s4622_s29 }
   0x5   : > { %s25_s13 = ssub.s32 %s4626_s30, %s4709_s11  ;;  %p35_p0 = scmp.ne.s32.totalorder %s4622_s29, %s4618_s28 }
   0x6   : > { %p26_p1 = scmp.eq.s32.totalorder %s25_s13, 0  ;;  %p36_p2 = scmp.eq.s32.totalorder %s4626_s30, 0 }
   0x7   : > { %p222_p3 = scmp.eq.s32.totalorder %s4705_s9, 1  ;;  %p227_p4 = scmp.ne.s32.totalorder %s4618_s28, %s4614_s27 }
   0x8   : > { %s4721_s14 = scalar_select %p26_p1, %s4622_s29, %s28_s12  }
   0x9   : > { %p37_p5 = por %p36_p2, %p35_p0  ;;  %p4723_p6 = por %p222_p3, %p35_p0 }
   0xa   : > { %p228_p7 = scmp.eq.s32.totalorder %s3735_s10, 1  ;;  %p3737_p9 = scmp.ge.s32.totalorder %s4626_s30, 2 }
   0xc   : > { %p4727_p8 = por %p228_p7, %p227_p4  ;;  %259 = sbr.rel (%p3737_p9) target bundleno = 29 (0x1d), region = 36 }
  0x11   : > { %262 = sbr.rel (!%p37_p5) target bundleno = 29 (0x1d), region = 40  ;;  %s264_s17 = sand.u32 (%p37_p5), 1, %s4622_s29  }
  0x12   : > { %s4077_s18 = sshll.u32 (%p37_p5), %s4626_s30, 3  ;;  %s3738_s19 = sshll.u32 (%p37_p5), %s264_s17, 6 }
  0x13   : > { %s269_s22 = scalar_lea.vmem (%p37_p5), %s6482_s0, %s4077_s18  ;;  %s266_s23 = scalar_lea.vmem (%p37_p5), [#allocation2], %s3738_s19 }
  0x14   : > { %v286_v0 = vld [vmem:[%s269_s22] sm:$0xff] (%p37_p5)   ;;  %v290_v1 = vld [vmem:[%s269_s22 + $0x10] sm:$0xff] (%p37_p5)  }
  0x15   : > { %v294_v2 = vld [vmem:[%s269_s22 + $0x20] sm:$0xff] (%p37_p5)   ;;  %287 = vst [vmem:[%s266_s23] sm:$0xff] (%p37_p5), %v286_v0   ;;  %v298_v3 = vld [vmem:[%s269_s22 + $0x30] sm:$0xff] (%p37_p5)  }
  0x16   : > { %291 = vst [vmem:[%s266_s23 + $0x8] sm:$0xff] %v290_v1   ;;  %v302_v4 = vld [vmem:[%s269_s22 + $0x40] sm:$0xff]   ;;  %v306_v5 = vld [vmem:[%s269_s22 + $0x50] sm:$0xff]  }
  0x17   : > { %295 = vst [vmem:[%s266_s23 + $0x10] sm:$0xff] %v294_v2   ;;  %v310_v6 = vld [vmem:[%s269_s22 + $0x60] sm:$0xff]   ;;  %v314_v7 = vld [vmem:[%s269_s22 + $0x70] sm:$0xff]  }
  0x18   : > { %299 = vst [vmem:[%s266_s23 + $0x18] sm:$0xff] %v298_v3  }
  0x19   : > { %303 = vst [vmem:[%s266_s23 + $0x20] sm:$0xff] %v302_v4  }
  0x1a   : > { %307 = vst [vmem:[%s266_s23 + $0x28] sm:$0xff] %v306_v5  }
  0x1b   : > { %311 = vst [vmem:[%s266_s23 + $0x30] sm:$0xff] %v310_v6  }
  0x1c   : > { %315 = vst [vmem:[%s266_s23 + $0x38] sm:$0xff] %v314_v7  }
  0x1d PF: > { %p3741_p10 = scmp.ge.s32.totalorder %s4626_s30, 1  ;;  %p390_p11 = scmp.lt.s32.totalorder %s4626_s30, 3 }
  0x1f   : > { %p391_p12 = pnand %p3741_p10, %p390_p11 }
  0x21   : > { %394 = sbr.rel (%p391_p12) target bundleno = 1907 (0x773), region = 89 }
  0x26   : > { %v4087_v8 = vld [vmem:[%s6485_s3 + $0x8] sm:$0xff]  ;;  %v4089_v9 = vld [vmem:[%s6485_s3 + $0x18] sm:$0xff]  ;;  %s4751_s17 = sand.u32 1, %s4618_s28   ;;  %v4086_v12 = vld [vmem:[%s6485_s3] sm:$0xff]  ;;  %vm531_vm0 = vcmask 261120   ;;  %v6491_v31 = vmov 0  }
  0x27   : > { %v4091_v10 = vld [vmem:[%s6485_s3 + $0x28] sm:$0xff]  ;;  %v4093_v11 = vld [vmem:[%s6485_s3 + $0x38] sm:$0xff]  ;;  %s3742_s20 = sshll.u32 %s4751_s17, 6  ;;  %562 = vmatpush.bf16.msra.mxu0 %v4087_v8  ;;  %633 = vmatpush.bf16.msra.mxu1 %v4089_v9  ;;  %v4088_v13 = vld [vmem:[%s6485_s3 + $0x10] sm:$0xff]  ;;  %s3744_s26 = sshll.u32 %s4705_s9, 1  ;;  %v4629_v58 = vmov 7  }
  0x28   : > { %v4090_v14 = vld [vmem:[%s6485_s3 + $0x20] sm:$0xff]  ;;  %704 = vmatpush.bf16.msra.mxu2 %v4091_v10  ;;  %775 = vmatpush.bf16.msra.mxu3 %v4093_v11  ;;  %v4092_v15 = vld [vmem:[%s6485_s3 + $0x30] sm:$0xff]  ;;  %s4769_s13 = scalar_lea.vmem [#allocation2], %s3742_s20  ;;  %v4095_v17 = vld [vmem:[%s6485_s3 + $0x48] sm:$0xff]  ;;  %p442_p13 = scmp.lt.s32.totalorder %s3744_s26, 3  ;;  %v4630_v2 = vmov 1  }
  0x29   : > { %v4772_v16 = vld [vmem:[%s4769_s13] sm:$0xff]  ;;  %v4097_v18 = vld [vmem:[%s6485_s3 + $0x58] sm:$0xff]  ;;  %v4789_v19 = vld [vmem:[%s4769_s13 + $0x8] sm:$0xff]  ;;  %4161 = vset.pattern.permute.xlu0 %v6491_v31  ;;  %4162 = vset.pattern.permute.xlu1 %v6491_v31  ;;  %s4636_s10 = smov 32   ;;  %s4110_s21 = sshll.u32 %s4705_s9, 4 }
  0x2a   : > { %v4800_v20 = vld [vmem:[%s4769_s13 + $0x10] sm:$0xff]  ;;  %v4094_v21 = vld [vmem:[%s6485_s3 + $0x40] sm:$0xff]  ;;  %v4816_v22 = vld [vmem:[%s6486_s4 + $0x8] sm:$0xff]  ;;  %s6754_s26 = smov (!%p442_p13, %s3744_s26), 3  ;;  %4163 = vset.pattern.permute.xlu2 %v4629_v58  ;;  %s3639_s24 = scalar_lea.hbm %s6490_s8, %s4110_s21 }
  0x2b   : > { %563 = vmatpush.bf16.msra.mxu0 %v4086_v12  ;;  %634 = vmatpush.bf16.msra.mxu1 %v4088_v13  ;;  %v4820_v23 = vld [vmem:[%s4769_s13 + $0x18] sm:$0xff]  ;;  %v4096_v25 = vld [vmem:[%s6485_s3 + $0x50] sm:$0xff]  ;;  %v4840_v26 = vld [vmem:[%s4769_s13 + $0x20] sm:$0xff]  ;;  %s3745_s18 = sshll.u32 %s6754_s26, 3  ;;  %s3743_s26 = sshll.u32 %s4751_s17, 4 }
  0x2c   : > { %705 = vmatpush.bf16.msra.mxu2 %v4090_v14  ;;  %776 = vmatpush.bf16.msra.mxu3 %v4092_v15  ;;  %v4833_v24 = vld [vmem:[%s6486_s4 + $0x18] sm:$0xff]  ;;  %v4851_v27 = vld [vmem:[%s4769_s13 + $0x28] sm:$0xff]  ;;  %v4862_v28 = vld [vmem:[%s4769_s13 + $0x30] sm:$0xff]  ;;  %s4942_s22 = scalar_lea.vmem %s6483_s1, %s3745_s18  ;;  %s451_s19 = scalar_lea.vmem %s6484_s2, %s3745_s18 }
  0x2d   : > { %v4867_v29 = vld [vmem:[%s6486_s4] sm:$0xff]  ;;  %v4872_v30 = vld [vmem:[%s6486_s4 + $0x10] sm:$0xff]  ;;  %v4887_v32 = vld [vmem:[%s4769_s13 + $0x38] sm:$0xff]  ;;  %s439_s18 = scalar_lea.vmem [#allocation3], %s3743_s26  ;;  %s3642_s25 = sshll.u32 %s3639_s24, 4  ;;  %s3643_s25 = int_to_ptr.hbm [resolvable:$true] %s3642_s25 }
  0x2e   : > { %3788 = vmatmul.msk.bf16.vlgmr.msra.gmra.mxu0 %vm531_vm0, %v4772_v16  ;;  %3809 = vmatmul.msk.bf16.vlgmr.msra.gmra.mxu1 %vm531_vm0, %v4772_v16  ;;  %v4900_v33 = vld [vmem:[%s6486_s4 + $0x28] sm:$0xff]  ;;  %v4906_v34 = vld [vmem:[%s6486_s4 + $0x20] sm:$0xff]  ;;  %v5064_v13 = vld [vmem:[%s6487_s5 + $0x18] sm:$0xff]  ;;  %s3640_s13 = sshll.u32 %s439_s18, 4  ;;  %s3628_s9 = scalar_lea.sflag [#allocation4], %s4751_s17  ;;  %s3641_s13 = int_to_ptr.vmem [resolvable:$true] %s3640_s13 }
  0x2f   : > { %846 = vmatpush.bf16.msrb.mxu0 %v4095_v17  ;;  %917 = vmatpush.bf16.msrb.mxu1 %v4097_v18  ;;  %v4933_v41 = vld [vmem:[%s6487_s5 + $0x8] sm:$0xff]  ;;  %v4951_v44 = vld [vmem:[%s6487_s5] sm:$0xff]  ;;  %s4584_s26 = scalar_lea.hbm %s6490_s8, 32 }
  0x30   : > { %3830 = vmatmul.msk.bf16.vlgmr.msra.gmra.mxu2 %vm531_vm0, %v4772_v16  ;;  %3851 = vmatmul.msk.bf16.vlgmr.msra.gmra.mxu3 %vm531_vm0, %v4772_v16  ;;  %v4959_v47 = vld [vmem:[%s4942_s22] sm:$0xff]  ;;  %v4977_v52 = vld [vmem:[%s4942_s22 + $0x8] sm:$0xff] }
  0x31   : > { %1014 = vmatpush.bf16.msrb.mxu2 %v4816_v22  ;;  %1040 = vmatpush.bf16.msrb.mxu3 %v4833_v24  ;;  %v4989_v57 = vsub.f32 1.0, %v4959_v47  ;;  %v5005_v61 = vld [vmem:[%s6487_s5 + $0x28] sm:$0xff]  ;;  %v5012_v0 = vsub.f32 1.0, %v4977_v52  ;;  %v5018_v1 = vld [vmem:[%s6487_s5 + $0x20] sm:$0xff] }
  0x32   : > { %1348 = vperm.xlu0 %4161, %v4959_v47   ;;  %1375 = vperm.xlu2 %4163, %v4959_v47  }
  0x33   : > { %847 = vmatpush.bf16.msrb.mxu0 %v4094_v21  ;;  %918 = vmatpush.bf16.msrb.mxu1 %v4096_v25 }
  0x34   : > { %1362 = vperm.xlu1 %4162, %v4989_v57  }
  0x35   : > { %1015 = vmatpush.bf16.msrb.mxu2 %v4867_v29  ;;  %1041 = vmatpush.bf16.msrb.mxu3 %v4872_v30 }
  0x37   : > { %1994 = vmatpush.bf16.msra.mxu1 %v5005_v61  ;;  %1900 = vmatpush.bf16.msra.mxu0 %v5064_v13 }
  0x39   : > { %1149 = vmatpush.bf16.msra.mxu2 %v4900_v33  ;;  %1189 = vmatpush.bf16.msra.mxu3 %v4933_v41 }
  0x3a   : > { %1353 = vperm.xlu0 %4161, %v4977_v52   ;;  %1379 = vperm.xlu2 %4163, %v4977_v52  }
  0x3b   : > { %1995 = vmatpush.bf16.msra.mxu1 %v5018_v1 }
  0x3c   : > { %1367 = vperm.xlu1 %4162, %v5012_v0  }
  0x3d   : > { %1150 = vmatpush.bf16.msra.mxu2 %v4906_v34  ;;  %1190 = vmatpush.bf16.msra.mxu3 %v4951_v44 }
  0x3e   : > { %3789 = vmatmul.msk.bf16.gmra.mxu0 %vm531_vm0, %v4789_v19  ;;  %3810 = vmatmul.msk.bf16.gmra.mxu1 %vm531_vm0, %v4789_v19 }
  0x40   : > { %3831 = vmatmul.msk.bf16.gmra.mxu2 %vm531_vm0, %v4789_v19  ;;  %3852 = vmatmul.msk.bf16.gmra.mxu3 %vm531_vm0, %v4789_v19 }
  0x42   : > { %4164 = vset.pattern.permute.xlu0 %v4629_v58  ;;  %4166 = vset.pattern.permute.xlu2 %v4630_v2 }
  0x43   : > { %1385 = vperm.xlu0 %4164, %v4989_v57   ;;  %1685 = vperm.xlu2 %4166, %v4959_v47  }
  0x44   : > { %4165 = vset.pattern.permute.xlu1 %v4629_v58 }
  0x45   : > { %1389 = vperm.xlu1 %4165, %v5012_v0  }
  0x4b   : > { %4168 = vset.pattern.permute.xlu0 %v4630_v2  ;;  %1695 = vperm.xlu2 %4166, %v4989_v57  }
  0x4c   : > { %1699 = vperm.xlu0 %4168, %v5012_v0  }
  0x4d   : > { %4167 = vset.pattern.permute.xlu1 %v4630_v2 }
  0x4e   : > { %3790 = vmatmul.msk.bf16.gmra.mxu0 %vm531_vm0, %v4800_v20  ;;  %3811 = vmatmul.msk.bf16.gmra.mxu1 %vm531_vm0, %v4800_v20 }
  0x4f   : > { %1689 = vperm.xlu1 %4167, %v4977_v52  }
  0x50   : > { %3832 = vmatmul.msk.bf16.gmra.mxu2 %vm531_vm0, %v4800_v20  ;;  %3853 = vmatmul.msk.bf16.gmra.mxu3 %vm531_vm0, %v4800_v20 }
  0x5e   : > { %3791 = vmatmul.msk.bf16.gmra.mxu0 %vm531_vm0, %v4820_v23  ;;  %3812 = vmatmul.msk.bf16.gmra.mxu1 %vm531_vm0, %v4820_v23 }
  0x60   : > { %3833 = vmatmul.msk.bf16.gmra.mxu2 %vm531_vm0, %v4820_v23  ;;  %3854 = vmatmul.msk.bf16.gmra.mxu3 %vm531_vm0, %v4820_v23 }
  0x6e   : > { %3792 = vmatmul.msk.bf16.gmra.mxu0 %vm531_vm0, %v4840_v26  ;;  %3813 = vmatmul.msk.bf16.gmra.mxu1 %vm531_vm0, %v4840_v26 }
  0x70   : > { %3834 = vmatmul.msk.bf16.gmra.mxu2 %vm531_vm0, %v4840_v26  ;;  %3855 = vmatmul.msk.bf16.gmra.mxu3 %vm531_vm0, %v4840_v26 }
  0x7e   : > { %3793 = vmatmul.msk.bf16.gmra.mxu0 %vm531_vm0, %v4851_v27  ;;  %3814 = vmatmul.msk.bf16.gmra.mxu1 %vm531_vm0, %v4851_v27 }
  0x80   : > { %3835 = vmatmul.msk.bf16.gmra.mxu2 %vm531_vm0, %v4851_v27  ;;  %3856 = vmatmul.msk.bf16.gmra.mxu3 %vm531_vm0, %v4851_v27 }
  0x8e   : > { %3794 = vmatmul.msk.bf16.gmra.mxu0 %vm531_vm0, %v4862_v28  ;;  %3815 = vmatmul.msk.bf16.gmra.mxu1 %vm531_vm0, %v4862_v28 }
  0x90   : > { %3836 = vmatmul.msk.bf16.gmra.mxu2 %vm531_vm0, %v4862_v28  ;;  %3857 = vmatmul.msk.bf16.gmra.mxu3 %vm531_vm0, %v4862_v28 }
  0x9e   : > { %3795 = vmatmul.msk.bf16.gmra.mxu0 %vm531_vm0, %v4887_v32  ;;  %3816 = vmatmul.msk.bf16.gmra.mxu1 %vm531_vm0, %v4887_v32 }
  0xa0   : > { %3837 = vmatmul.msk.bf16.gmra.mxu2 %vm531_vm0, %v4887_v32  ;;  %3858 = vmatmul.msk.bf16.gmra.mxu3 %vm531_vm0, %v4887_v32 }
  0xab   : > { %v4909_v35 = vpop.f32.mrf.mxu0  ;;  %v4911_v36 = vpop.f32.mrf.mxu1 }
  0xae   : > { %3872 = vmatmul.msk.bf16.vlgmr.msrb.gmra.mxu0 %vm531_vm0, %v4772_v16  ;;  %3893 = vmatmul.msk.bf16.vlgmr.msrb.gmra.mxu1 %vm531_vm0, %v4772_v16  ;;  %v5079_v16 = vld [vmem:[%s6487_s5 + $0x10] sm:$0xff] }
  0xaf   : > { %2218 = vmatpush.bf16.msrb.mxu1 %v4933_v41  ;;  %1901 = vmatpush.bf16.msra.mxu0 %v5079_v16 }
  0xb0   : > { %1016 = vmatmul.bf16.vlgmr.msrb.gmra.mxu2 %v6491_v31  ;;  %1042 = vmatmul.bf16.vlgmr.msrb.gmra.mxu3 %v6491_v31 }
  0xb1   : > { %1324 = vmatpush.bf16.msrb.mxu3 %v5005_v61  ;;  %1215 = vmatpush.bf16.msrb.mxu2 %v5064_v13 }
  0xb3   : > { %v4920_v37 = vpop.f32.mrf.mxu2  ;;  %v4922_v38 = vpop.f32.mrf.mxu3  ;;  %2219 = vmatpush.bf16.msrb.mxu1 %v4951_v44  ;;  %2186 = vmatpush.bf16.msrb.mxu0 %v4900_v33 }
  0xb4   : > { %6532 = vst [vmem:[#allocation6_spill] sm:$0xff] %v4922_v38  ;;  %v4926_v39 = vpop.f32.mrf.mxu0  ;;  %v4928_v40 = vpop.f32.mrf.mxu1 }
  0xb5   : > { %1325 = vmatpush.bf16.msrb.mxu3 %v5018_v1  ;;  %1216 = vmatpush.bf16.msrb.mxu2 %v5079_v16 }
  0xb7   : > { %2187 = vmatpush.bf16.msrb.mxu0 %v4906_v34 }
  0xbb   : > { %v4944_v42 = vpop.f32.mrf.mxu2  ;;  %v4946_v43 = vpop.f32.mrf.mxu3 }
  0xbc   : > { %6533 = vst [vmem:[#allocation7_spill] sm:$0xff] %v4946_v43  ;;  %v4953_v45 = vpop.f32.mrf.mxu0  ;;  %v4955_v46 = vpop.f32.mrf.mxu1 }
  0xbe   : > { %3873 = vmatmul.msk.bf16.gmra.mxu0 %vm531_vm0, %v4789_v19  ;;  %3894 = vmatmul.msk.bf16.gmra.mxu1 %vm531_vm0, %v4789_v19 }
  0xc0   : > { %1151 = vmatmul.bf16.vlgmr.msra.gmra.mxu2 %v6491_v31  ;;  %1191 = vmatmul.bf16.vlgmr.msra.gmra.mxu3 %v6491_v31 }
  0xc1   : > { %1428 = vmatpush.bf16.msra.mxu3 %v4833_v24  ;;  %1414 = vmatpush.bf16.msra.mxu2 %v4816_v22 }
  0xc3   : > { %v4968_v48 = vpop.f32.mrf.mxu2  ;;  %v4970_v49 = vpop.f32.mrf.mxu3 }
  0xc4   : > { %6534 = vst [vmem:[#allocation8_spill] sm:$0xff] %v4970_v49  ;;  %v4972_v50 = vpop.f32.mrf.mxu0  ;;  %v4974_v51 = vpop.f32.mrf.mxu1 }
  0xc5   : > { %1429 = vmatpush.bf16.msra.mxu3 %v4872_v30  ;;  %1415 = vmatpush.bf16.msra.mxu2 %v4867_v29 }
  0xcb   : > { %v4980_v53 = vpop.f32.mrf.mxu2  ;;  %v4982_v54 = vpop.f32.mrf.mxu3 }
  0xcc   : > { %6535 = vst [vmem:[#allocation9_spill] sm:$0xff] %v4982_v54  ;;  %v4984_v55 = vpop.f32.mrf.mxu0  ;;  %v4986_v56 = vpop.f32.mrf.mxu1 }
  0xce   : > { %3874 = vmatmul.msk.bf16.gmra.mxu0 %vm531_vm0, %v4800_v20  ;;  %3895 = vmatmul.msk.bf16.gmra.mxu1 %vm531_vm0, %v4800_v20 }
  0xd0   : > { %1326 = vmatmul.bf16.vlgmr.msrb.gmra.mxu3 %v6491_v31  ;;  %1217 = vmatmul.bf16.vlgmr.msrb.gmra.mxu2 %v6491_v31 }
  0xd1   : > { %1554 = vmatpush.bf16.msrb.mxu3 %v4933_v41  ;;  %1522 = vmatpush.bf16.msrb.mxu2 %v4900_v33 }
  0xd3   : > { %v4998_v59 = vpop.f32.mrf.mxu2  ;;  %v5000_v60 = vpop.f32.mrf.mxu3 }
  0xd4   : > { %6536 = vst [vmem:[#allocation10_spill] sm:$0xff] %v5000_v60  ;;  %v5007_v62 = vpop.f32.mrf.mxu0  ;;  %v5009_v63 = vpop.f32.mrf.mxu1 }
  0xd5   : > { %1555 = vmatpush.bf16.msrb.mxu3 %v4951_v44  ;;  %1523 = vmatpush.bf16.msrb.mxu2 %v4906_v34 }
  0xdb   : > { %v5026_v3 = vpop.f32.mrf.mxu2  ;;  %v5028_v4 = vpop.f32.mrf.mxu3 }
  0xdc   : > { %6537 = vst [vmem:[#allocation11_spill] sm:$0xff] %v5026_v3  ;;  %v5031_v5 = vpop.f32.mrf.mxu0  ;;  %v5033_v6 = vpop.f32.mrf.mxu1 }
  0xdd   : > { %6538 = vst [vmem:[#allocation12_spill] sm:$0xff] %v5028_v4 }
  0xde   : > { %6539 = vst [vmem:[#allocation13_spill] sm:$0xff] %v5031_v5  ;;  %3875 = vmatmul.msk.bf16.gmra.mxu0 %vm531_vm0, %v4820_v23  ;;  %3896 = vmatmul.msk.bf16.gmra.mxu1 %vm531_vm0, %v4820_v23 }
  0xdf   : > { %6540 = vst [vmem:[#allocation14_spill] sm:$0xff] %v5033_v6 }
  0xe3   : > { %v5046_v7 = vpop.f32.mrf.mxu2  ;;  %v5048_v8 = vpop.f32.mrf.mxu3 }
  0xe4   : > { %6541 = vst [vmem:[#allocation15_spill] sm:$0xff] %v5046_v7  ;;  %v5050_v9 = vpop.f32.mrf.mxu0  ;;  %v5052_v10 = vpop.f32.mrf.mxu1 }
  0xe5   : > { %6542 = vst [vmem:[#allocation16_spill] sm:$0xff] %v5048_v8 }
  0xe6   : > { %6543 = vst [vmem:[#allocation17_spill] sm:$0xff] %v5050_v9 }
  0xe7   : > { %6544 = vst [vmem:[#allocation18_spill] sm:$0xff] %v5052_v10 }
  0xeb   : > { %v5057_v11 = vpop.f32.mrf.mxu2  ;;  %v5059_v12 = vpop.f32.mrf.mxu3 }
  0xec   : > { %6545 = vst [vmem:[#allocation19_spill] sm:$0xff] %v5057_v11  ;;  %v5066_v14 = vpop.f32.mrf.mxu0  ;;  %v5068_v15 = vpop.f32.mrf.mxu1 }
  0xed   : > { %6546 = vst [vmem:[#allocation20_spill] sm:$0xff] %v5059_v12 }
  0xee   : > { %6547 = vst [vmem:[#allocation21_spill] sm:$0xff] %v5066_v14  ;;  %3876 = vmatmul.msk.bf16.gmra.mxu0 %vm531_vm0, %v4840_v26  ;;  %3897 = vmatmul.msk.bf16.gmra.mxu1 %vm531_vm0, %v4840_v26 }
  0xef   : > { %6548 = vst [vmem:[#allocation22_spill] sm:$0xff] %v5068_v15 }
  0xf3   : > { %v5085_v17 = vpop.f32.mrf.mxu2  ;;  %v5087_v18 = vpop.f32.mrf.mxu3 }
  0xf4   : > { %6549 = vst [vmem:[#allocation23_spill] sm:$0xff] %v5085_v17  ;;  %v5089_v19 = vpop.f32.mrf.mxu0  ;;  %v5091_v20 = vpop.f32.mrf.mxu1 }
  0xf5   : > { %6550 = vst [vmem:[#allocation24_spill] sm:$0xff] %v5087_v18 }
  0xf6   : > { %6551 = vst [vmem:[#allocation25_spill] sm:$0xff] %v5089_v19 }
  0xf7   : > { %6552 = vst [vmem:[#allocation26_spill] sm:$0xff] %v5091_v20 }
  0xfb   : > { %v5097_v21 = vpop.f32.mrf.mxu2  ;;  %v5099_v23 = vpop.f32.mrf.mxu3 }
  0xfc   : > { %6553 = vst [vmem:[#allocation27_spill] sm:$0xff] %v5097_v21  ;;  %v5102_v25 = vpop.f32.mrf.mxu0  ;;  %v5104_v26 = vpop.f32.mrf.mxu1 }
  0xfd   : > { %6554 = vst [vmem:[#allocation28_spill] sm:$0xff] %v5099_v23 }
  0xfe   : > { %6555 = vst [vmem:[#allocation29_spill] sm:$0xff] %v5102_v25  ;;  %3877 = vmatmul.msk.bf16.gmra.mxu0 %vm531_vm0, %v4851_v27  ;;  %3898 = vmatmul.msk.bf16.gmra.mxu1 %vm531_vm0, %v4851_v27 }
  0xff   : > { %6556 = vst [vmem:[#allocation30_spill] sm:$0xff] %v5104_v26 }
 0x103   : > { %v5110_v58 = vpop.f32.mrf.mxu2  ;;  %v5112_v2 = vpop.f32.mrf.mxu3 }
 0x104   : > { %6557 = vst [vmem:[#allocation31_spill] sm:$0xff] %v5110_v58  ;;  %v5114_v31 = vpop.f32.mrf.mxu0  ;;  %v5116_v43 = vpop.f32.mrf.mxu1 }
 0x105   : > { %6558 = vst [vmem:[#allocation32_spill] sm:$0xff] %v5112_v2 }
 0x106   : > { %6559 = vst [vmem:[#allocation33_spill] sm:$0xff] %v5114_v31 }
 0x107   : > { %6560 = vst [vmem:[#allocation34_spill] sm:$0xff] %v5116_v43 }
 0x10b   : > { %v5118_v38 = vpop.f32.mrf.mxu2  ;;  %v5120_v54 = vpop.f32.mrf.mxu3 }
 0x10c   : > { %6561 = vst [vmem:[#allocation35_spill] sm:$0xff] %v5118_v38  ;;  %v5122_v49 = vpop.f32.mrf.mxu0  ;;  %v5124_v4 = vpop.f32.mrf.mxu1 }
 0x10d   : > { %6562 = vst [vmem:[#allocation36_spill] sm:$0xff] %v5120_v54 }
 0x10e   : > { %6563 = vst [vmem:[#allocation37_spill] sm:$0xff] %v5122_v49  ;;  %3878 = vmatmul.msk.bf16.gmra.mxu0 %vm531_vm0, %v4862_v28  ;;  %3899 = vmatmul.msk.bf16.gmra.mxu1 %vm531_vm0, %v4862_v28 }
 0x10f   : > { %6564 = vst [vmem:[#allocation38_spill] sm:$0xff] %v5124_v4 }
 0x113   : > { %v5130_v27 = vpop.f32.mrf.mxu2  ;;  %v5132_v60 = vpop.f32.mrf.mxu3 }
 0x114   : > { %6565 = vst [vmem:[#allocation39_spill] sm:$0xff] %v5130_v27  ;;  %v5134_v58 = vpop.f32.mrf.mxu0  ;;  %v5136_v43 = vpop.f32.mrf.mxu1 }
 0x115   : > { %6566 = vst [vmem:[#allocation40_spill] sm:$0xff] %v5134_v58 }
 0x116   : > { %6567 = vst [vmem:[#allocation41_spill] sm:$0xff] %v5136_v43 }
 0x11b   : > { %v5138_v38 = vpop.f32.mrf.mxu2  ;;  %v5140_v31 = vpop.f32.mrf.mxu3 }
 0x11c   : > { %6568 = vst [vmem:[#allocation42_spill] sm:$0xff] %v5138_v38  ;;  %v5142_v49 = vpop.f32.mrf.mxu0  ;;  %v5144_v4 = vpop.f32.mrf.mxu1 }
 0x11d   : > { %6569 = vst [vmem:[#allocation43_spill] sm:$0xff] %v5142_v49 }
 0x11e   : > { %6570 = vst [vmem:[#allocation44_spill] sm:$0xff] %v5144_v4  ;;  %3879 = vmatmul.msk.bf16.gmra.mxu0 %vm531_vm0, %v4887_v32  ;;  %3900 = vmatmul.msk.bf16.gmra.mxu1 %vm531_vm0, %v4887_v32  ;;  %v5169_v32 = vld [vmem:[%s6488_s6] ss:$0 sm:$0xff] }
 0x123   : > { %v5150_v28 = vpop.f32.mrf.mxu2  ;;  %v5152_v27 = vpop.f32.mrf.mxu3 }
 0x124   : > { %6571 = vst [vmem:[#allocation45_spill] sm:$0xff] %v5150_v28  ;;  %v5154_v58 = vpop.f32.mrf.mxu0  ;;  %v5156_v43 = vpop.f32.mrf.mxu1  ;;  %v5174_v28 = vld [vmem:[%s6488_s6 + $0x1] ss:$0 sm:$0xff] }
 0x125   : > { %6572 = vst [vmem:[#allocation46_spill] sm:$0xff] %v5154_v58  ;;  %v4631_v58 = vmov 6  }
 0x126   : > { %6573 = vst [vmem:[#allocation47_spill] sm:$0xff] %v5156_v43  ;;  %4169 = vset.pattern.permute.xlu1 %v4631_v58  ;;  %4170 = vset.pattern.permute.xlu2 %v4631_v58  ;;  %v637_v43 = vadd.f32 %v5174_v28, %v4911_v36  ;;  %v639_v36 = vadd.f32 %v5174_v28, %v4928_v40 }
 0x127   : > { %1707 = vperm.xlu1 %4169, %v4959_v47   ;;  %1711 = vperm.xlu2 %4170, %v4977_v52  }
 0x12b   : > { %v5158_v38 = vpop.f32.mrf.mxu2  ;;  %v5160_v26 = vpop.f32.mrf.mxu3 }
 0x12c   : > { %6574 = vst [vmem:[#allocation48_spill] sm:$0xff] %v5158_v38  ;;  %v5162_v49 = vpop.f32.mrf.mxu0  ;;  %v5164_v4 = vpop.f32.mrf.mxu1  ;;  %v566_v38 = vadd.f32 %v5169_v32, %v4909_v35  ;;  %v568_v35 = vadd.f32 %v5169_v32, %v4926_v39 }
 0x12d   : > { %6575 = vst [vmem:[#allocation49_spill] sm:$0xff] %v5162_v49 }
 0x12e   : > { %6576 = vst [vmem:[#allocation50_spill] sm:$0xff] %v5164_v4 }
 0x12f   : > { %1717 = vperm.xlu1 %4169, %v4989_v57   ;;  %1721 = vperm.xlu2 %4170, %v5012_v0  }
 0x133   : > { %v1017_v4 = vpop.f32.mrf.mxu2  ;;  %v1043_v49 = vpop.f32.mrf.mxu3 }
 0x134   : > { %v1048_v25 = vadd.f32 %v1017_v4, %v566_v38  ;;  %v1088_v12 = vadd.f32 %v1043_v49, %v637_v43  ;;  %v5182_v8 = vpop.f32.mrf.mxu0  ;;  %v5184_v21 = vpop.f32.mrf.mxu1 }
 0x135   : > { %6577 = vst [vmem:[#allocation51_spill] sm:$0xff] %v5182_v8 }
 0x136   : > { %6578 = vst [vmem:[#allocation52_spill] sm:$0xff] %v5184_v21  ;;  %v3934_v17 = vmul.f32 -1.442695, %v1048_v25  ;;  %v3936_v58 = vmul.f32 -1.442695, %v1088_v12 }
 0x138   : > { %4194 = vpow2.f32 %v3934_v17 }
 0x139   : > { %4196 = vpow2.f32 %v3936_v58 }
 0x13b   : > { %v1019_v38 = vpop.f32.mrf.mxu2  ;;  %v1045_v43 = vpop.f32.mrf.mxu3 }
 0x13c   : > { %v1049_v49 = vadd.f32 %v1019_v38, %v568_v35  ;;  %v1089_v4 = vadd.f32 %v1045_v43, %v639_v36  ;;  %v5192_v8 = vpop.f32.mrf.mxu0  ;;  %v5194_v25 = vpop.f32.mrf.mxu1 }
 0x13d   : > { %6579 = vst [vmem:[#allocation53_spill] sm:$0xff] %v5192_v8 }
 0x13e   : > { %6580 = vst [vmem:[#allocation54_spill] sm:$0xff] %v5194_v25  ;;  %v4195_v12 = vpop.eup %4194  ;;  %v3935_v17 = vmul.f32 -1.442695, %v1049_v49  ;;  %v3937_v19 = vmul.f32 -1.442695, %v1089_v4 }
 0x13f   : > { %v4197_v21 = vpop.eup %4196  ;;  %v1056_v20 = vadd.f32 1.0, %v4195_v12 }
 0x140   : > { %v5196_v58 = vadd.f32 1.0, %v4197_v21  ;;  %4198 = vpow2.f32 %v3935_v17 }
 0x141   : > { %4200 = vrcp.f32 %v1056_v20  ;;  %v1067_v14 = vand.u32 2147483647, %v1056_v20  ;;  %vm1063_vm2 = vweird.f32 %v1056_v20 }
 0x142   : > { %4202 = vrcp.f32 %v5196_v58  ;;  %vm1103_vm6 = vweird.f32 %v5196_v58 }
 0x143   : > { %4204 = vpow2.f32 %v3937_v19  ;;  %v1152_v4 = vpop.f32.mrf.mxu2  ;;  %v5212_v19 = vld [vmem:[%s6489_s7] ss:$0 sm:$0xff]  ;;  %vm1068_vm4 = vcmp.eq.f32.partialorder %v1067_v14, 8.507059e+37 }
 0x144   : > { %v5199_v39 = vpop.f32.mrf.mxu0  ;;  %v5201_v40 = vpop.f32.mrf.mxu1 }
 0x145   : > { %6581 = vst [vmem:[#allocation55_spill] sm:$0xff] %v5199_v39  ;;  %v1069_v39 = vand.u32 2147483648, %v1056_v20 }
 0x146   : > { %6582 = vst [vmem:[#allocation56_spill] sm:$0xff] %v5201_v40  ;;  %v4199_v35 = vpop.eup %4198 }
 0x147   : > { %v4201_v36 = vpop.eup %4200  ;;  %v1057_v38 = vadd.f32 1.0, %v4199_v35  ;;  %v1070_v11 = vor.u32 1.1754944e-38, %v1069_v39 }
 0x148   : > { %v5203_v43 = vpop.eup %4202  ;;  %v1059_v49 = vmul.f32 %v4201_v36, %v1056_v20  ;;  %vm1064_vm1 = vweird.f32 %v4201_v36 }
 0x149   : > { %v4205_v25 = vpop.eup %4204  ;;  %v1099_v21 = vmul.f32 %v5203_v43, %v5196_v58  ;;  %4206 = vrcp.f32 %v1057_v38  ;;  %vm1065_vm3 = vmor %vm1063_vm2, %vm1064_vm1  ;;  %vm1104_vm5 = vweird.f32 %v5203_v43  ;;  %v1082_v6 = vand.u32 2147483647, %v1057_v38 }
 0x14a   : > { %v5207_v12 = vadd.f32 1.0, %v4205_v25  ;;  %v1060_v17 = vsub.f32 1.0, %v1059_v49  ;;  %v5223_v49 = vld [vmem:[%s6488_s6 + $0x2] ss:$0 sm:$0xff]  ;;  %vm1105_vm8 = vmor %vm1103_vm6, %vm1104_vm5  ;;  %vm1078_vm9 = vweird.f32 %v1057_v38 }
 0x14b   : > { %v1100_v40 = vsub.f32 1.0, %v1099_v21  ;;  %v1153_v21 = vadd.f32 %v5212_v19, %v1152_v4  ;;  %v1154_v14 = vpop.f32.mrf.mxu2  ;;  %vm1083_vm12 = vcmp.eq.f32.partialorder %v1082_v6, 8.507059e+37 }
 0x14c   : > { %4208 = vrcp.f32 %v5207_v12  ;;  %v5215_v35 = vpop.f32.mrf.mxu0  ;;  %v5217_v8 = vpop.f32.mrf.mxu1  ;;  %v1061_v15 = vmul.f32 %v4201_v36, %v1060_v17  ;;  %vm1118_vm14 = vweird.f32 %v5207_v12 }
 0x14d   : > { %6583 = vst [vmem:[#allocation57_spill] sm:$0xff] %v5215_v35  ;;  %v1101_v25 = vmul.f32 %v5203_v43, %v1100_v40  ;;  %v1109_v40 = vand.u32 2147483648, %v5196_v58 }
 0x14e   : > { %6584 = vst [vmem:[#allocation58_spill] sm:$0xff] %v5217_v8  ;;  %v1062_v23 = vadd.f32 %v4201_v36, %v1061_v15  ;;  %v708_v15 = vadd.f32 %v5223_v49, %v4920_v37 }
 0x14f   : > { %v4207_v18 = vpop.eup %4206  ;;  %v1102_v7 = vadd.f32 %v5203_v43, %v1101_v25 }
 0x150   : > { %v1066_v35 = vsel %vm1065_vm3, %v4201_v36, %v1062_v23  ;;  %v1074_v8 = vmul.f32 %v4207_v18, %v1057_v38  ;;  %v1084_v23 = vand.u32 2147483648, %v1057_v38  ;;  %vm1079_vm7 = vweird.f32 %v4207_v18 }
 0x151   : > { %v1071_v17 = vsel %vm1068_vm4, %v1070_v11, %v1066_v35  ;;  %v1107_v11 = vand.u32 2147483647, %v5196_v58  ;;  %v1155_v58 = vadd.f32 %v5212_v19, %v1154_v14  ;;  %vm1080_vm10 = vmor %vm1078_vm9, %vm1079_vm7  ;;  %v1124_v38 = vand.u32 2147483648, %v5207_v12 }
 0x152   : > { %v4209_v10 = vpop.eup %4208  ;;  %v1157_v20 = vmul.f32 %v1153_v21, %v1071_v17  ;;  %v1075_v9 = vsub.f32 1.0, %v1074_v8  ;;  %v1106_v8 = vsel %vm1105_vm8, %v5203_v43, %v1102_v7  ;;  %v1110_v21 = vor.u32 1.1754944e-38, %v1109_v40  ;;  %v5244_v43 = vpop.permute.xlu1 %1362 }
 0x153   : > { %v1114_v39 = vmul.f32 %v4209_v10, %v5207_v12  ;;  %vm1108_vm11 = vcmp.eq.f32.partialorder %v1107_v11, 8.507059e+37  ;;  %vm1119_vm13 = vweird.f32 %v4209_v10  ;;  %6587 = vst [vmem:[#allocation61_spill] sm:$0xff] %v5244_v43 }
 0x154   : > { %v1159_v36 = vadd.f32 %v1157_v20, %v708_v15  ;;  %v5234_v4 = vpop.f32.mrf.mxu0  ;;  %v5236_v35 = vpop.f32.mrf.mxu1  ;;  %v1076_v25 = vmul.f32 %v4207_v18, %v1075_v9  ;;  %v1085_v15 = vor.u32 1.1754944e-38, %v1084_v23  ;;  %v1111_v9 = vsel %vm1108_vm11, %v1110_v21, %v1106_v8  ;;  %vm1120_vm15 = vmor %vm1118_vm14, %vm1119_vm13 }
 0x155   : > { %6585 = vst [vmem:[#allocation59_spill] sm:$0xff] %v5234_v4  ;;  %v1115_v37 = vsub.f32 1.0, %v1114_v39  ;;  %v710_v39 = vadd.f32 %v5223_v49, %v4944_v42  ;;  %v1163_v40 = vsub.f32 1.0, %v1111_v9  ;;  %v1122_v23 = vand.u32 2147483647, %v5207_v12 }
 0x156   : > { %6586 = vst [vmem:[#allocation60_spill] sm:$0xff] %v5236_v35  ;;  %4210 = vtanh.f32 %v1159_v36  ;;  %v1077_v17 = vadd.f32 %v4207_v18, %v1076_v25  ;;  %v1125_v25 = vor.u32 1.1754944e-38, %v1124_v38 }
 0x157   : > { %v1116_v20 = vmul.f32 %v4209_v10, %v1115_v37  ;;  %vm1123_vm1 = vcmp.eq.f32.partialorder %v1122_v23, 8.507059e+37 }
 0x158   : > { %v1081_v35 = vsel %vm1080_vm10, %v4207_v18, %v1077_v17 }
 0x159   : > { %v1086_v4 = vsel %vm1083_vm12, %v1085_v15, %v1081_v35  ;;  %v1117_v5 = vadd.f32 %v4209_v10, %v1116_v20  ;;  %v1167_v35 = vmul.f32 0.0, %v1111_v9 }
 0x15a   : > { %v1158_v7 = vmul.f32 %v1155_v58, %v1086_v4  ;;  %v5253_v4 = vpop.permute.xlu0 %1348  ;;  %v5257_v58 = vpop.permute.xlu1 %1367 }
 0x15b   : > { %v1121_v42 = vsel %vm1120_vm15, %v4209_v10, %v1117_v5  ;;  %6590 = vst [vmem:[#allocation64_spill] sm:$0xff] %v5253_v4  ;;  %v1370_v5 = vmul.f32 0.0, %v5244_v43 }
 0x15c   : > { %v4211_v14 = vpop.eup %4210  ;;  %v1160_v18 = vadd.f32 %v1158_v7, %v710_v39  ;;  %v5249_v6 = vpop.f32.mrf.mxu0  ;;  %v1126_v8 = vsel %vm1123_vm1, %v1125_v25, %v1121_v42  ;;  %6592 = vst [vmem:[#allocation66_spill] sm:$0xff] %v5257_v58  ;;  %v1371_v7 = vmul.f32 0.0, %v5257_v58 }
 0x15d   : > { %6588 = vst [vmem:[#allocation62_spill] sm:$0xff] %v5249_v6  ;;  %v5251_v11 = vpop.f32.mrf.mxu1  ;;  %v1165_v36 = vmul.f32 %v4211_v14, %v1163_v40  ;;  %v1164_v21 = vsub.f32 1.0, %v1126_v8  ;;  %v1168_v39 = vmul.f32 0.0, %v1126_v8  ;;  %v1192_v25 = vpop.f32.mrf.mxu3  ;;  %v5290_v8 = vld [vmem:[%s6488_s6 + $0x3] ss:$0 sm:$0xff] }
 0x15e   : > { %6589 = vst [vmem:[#allocation63_spill] sm:$0xff] %v5251_v11  ;;  %4212 = vtanh.f32 %v1160_v18 }
 0x15f   : > { %v1169_v37 = vadd.f32 %v1167_v35, %v1165_v36 }
 0x161   : > { %v1356_v9 = vmul.f32 %v5253_v4, %v1169_v37 }
 0x162   : > { %v5264_v38 = vpop.permute.xlu0 %1353 }
 0x163   : > { %6594 = vst [vmem:[#allocation68_spill] sm:$0xff] %v5264_v38  ;;  %v5267_v23 = vadd.f32 %v1370_v5, %v1356_v9 }
 0x164   : > { %v4213_v17 = vpop.eup %4212  ;;  %v5255_v12 = vpop.f32.mrf.mxu0 }
 0x165   : > { %6591 = vst [vmem:[#allocation65_spill] sm:$0xff] %v5255_v12  ;;  %v5259_v15 = vpop.f32.mrf.mxu1  ;;  %v1166_v20 = vmul.f32 %v4213_v17, %v1164_v21  ;;  %v814_v21 = vadd.f32 %v5290_v8, %v5152_v27 }
 0x166   : > { %6593 = vst [vmem:[#allocation67_spill] sm:$0xff] %v5259_v15 }
 0x167   : > { %v1170_v10 = vadd.f32 %v1168_v39, %v1166_v20  ;;  %6595 = vst [vmem:[#allocation69_spill] sm:$0xff] %v5267_v23  ;;  %v1194_v20 = vpop.f32.mrf.mxu3 }
 0x169   : > { %v1357_v40 = vmul.f32 %v5264_v38, %v1170_v10 }
 0x16b   : > { %v5269_v14 = vadd.f32 %v1371_v7, %v1357_v40 }
 0x16c   : > { %v5271_v18 = vpop.f32.mrf.mxu0 }
 0x16d   : > { %6596 = vst [vmem:[#allocation70_spill] sm:$0xff] %v5269_v14  ;;  %v1404_v36 = vpack.c.bf16 %v5269_v14, %v5267_v23  ;;  %v5275_v35 = vpop.f32.mrf.mxu1 }
 0x16e   : > { %6597 = vst [vmem:[#allocation71_spill] sm:$0xff] %v5271_v18 }
 0x16f   : > { %6598 = vst [vmem:[#allocation72_spill] sm:$0xff] %v5275_v35  ;;  %3974 = vmatmul.msk.bf16.vlgmr.msra.gmra.mxu2 %vm531_vm0, %v1404_v36  ;;  %3975 = vmatmul.msk.bf16.vlgmr.msra.gmra.mxu3 %vm531_vm0, %v1404_v36  ;;  %v1327_v35 = vpop.f32.mrf.mxu3 }
 0x170   : > { %1568 = vmatpush.bf16.msra.mxu2 %v5064_v13  ;;  %1662 = vmatpush.bf16.msra.mxu3 %v5005_v61  ;;  %v1223_v61 = vadd.f32 %v1192_v25, %v814_v21  ;;  %v4632_v21 = vmov 2  }
 0x171   : > { %4172 = vset.pattern.permute.xlu1 %v4632_v21  ;;  %4173 = vset.pattern.permute.xlu2 %v4632_v21 }
 0x172   : > { %v3962_v9 = vmul.f32 -1.442695, %v1223_v61  ;;  %2021 = vperm.xlu1 %4172, %v4977_v52   ;;  %2027 = vperm.xlu2 %4173, %v4989_v57  }
 0x173   : > { %4171 = vset.pattern.permute.xlu0 %v4632_v21 }
 0x174   : > { %v5281_v42 = vpop.f32.mrf.mxu0  ;;  %1569 = vmatpush.bf16.msra.mxu2 %v5079_v16  ;;  %1663 = vmatpush.bf16.msra.mxu3 %v5018_v1  ;;  %v816_v1 = vadd.f32 %v5290_v8, %v5160_v26  ;;  %4214 = vpow2.f32 %v3962_v9  ;;  %v1218_v9 = vpop.f32.mrf.mxu2 }
 0x175   : > { %6599 = vst [vmem:[#allocation73_spill] sm:$0xff] %v5281_v42  ;;  %v5285_v37 = vpop.f32.mrf.mxu1  ;;  %2017 = vperm.xlu0 %4171, %v4959_v47  }
 0x176   : > { %6600 = vst [vmem:[#allocation74_spill] sm:$0xff] %v5285_v37  ;;  %v1224_v10 = vadd.f32 %v1194_v20, %v816_v1  ;;  %v5321_v20 = vld [vmem:[%s6488_s6 + $0x4] ss:$0 sm:$0xff] }
 0x178   : > { %v3963_v27 = vmul.f32 -1.442695, %v1224_v10 }
 0x17a   : > { %4216 = vpow2.f32 %v3963_v27  ;;  %2031 = vperm.xlu1 %4172, %v5012_v0  }
 0x17c   : > { %v5294_v17 = vpop.f32.mrf.mxu0  ;;  %v1220_v6 = vpop.f32.mrf.mxu2 }
 0x17d   : > { %6601 = vst [vmem:[#allocation75_spill] sm:$0xff] %v5294_v17  ;;  %v5300_v39 = vpop.f32.mrf.mxu1 }
 0x17e   : > { %6602 = vst [vmem:[#allocation76_spill] sm:$0xff] %v5300_v39  ;;  %v1329_v39 = vpop.f32.mrf.mxu3 }
 0x17f   : > { %3980 = vmatmul.msk.bf16.vlgmr.msrb.gmra.mxu2 %vm531_vm0, %v1404_v36  ;;  %v4215_v36 = vpop.eup %4214 }
 0x180   : > { %1746 = vmatpush.bf16.msrb.mxu2 %v4816_v22  ;;  %v1231_v22 = vadd.f32 1.0, %v4215_v36  ;;  %v4217_v25 = vpop.eup %4216 }
 0x181   : > { %v5311_v61 = vadd.f32 1.0, %v4217_v25 }
 0x182   : > { %4218 = vrcp.f32 %v1231_v22  ;;  %vm1238_vm2 = vweird.f32 %v1231_v22 }
 0x183   : > { %4220 = vrcp.f32 %v5311_v61  ;;  %vm1253_vm6 = vweird.f32 %v5311_v61 }
 0x184   : > { %v5302_v5 = vpop.f32.mrf.mxu0  ;;  %1747 = vmatpush.bf16.msrb.mxu2 %v4867_v29 }
 0x185   : > { %6603 = vst [vmem:[#allocation77_spill] sm:$0xff] %v5302_v5  ;;  %v5307_v40 = vpop.f32.mrf.mxu1 }
 0x186   : > { %6604 = vst [vmem:[#allocation78_spill] sm:$0xff] %v5307_v40  ;;  %v1242_v40 = vand.u32 2147483647, %v1231_v22 }
 0x188   : > { %v4219_v1 = vpop.eup %4218  ;;  %vm1243_vm5 = vcmp.eq.f32.partialorder %v1242_v40, 8.507059e+37 }
 0x189   : > { %v1234_v36 = vmul.f32 %v4219_v1, %v1231_v22  ;;  %v4221_v58 = vpop.eup %4220  ;;  %vm1239_vm3 = vweird.f32 %v4219_v1 }
 0x18a   : > { %v1249_v4 = vmul.f32 %v4221_v58, %v5311_v61  ;;  %vm5330_vm4 = vmor %vm1238_vm2, %vm1239_vm3  ;;  %vm1254_vm7 = vweird.f32 %v4221_v58 }
 0x18b   : > { %v1235_v43 = vsub.f32 1.0, %v1234_v36  ;;  %vm5350_vm8 = vmor %vm1253_vm6, %vm1254_vm7 }
 0x18c   : > { %v5305_v7 = vpop.f32.mrf.mxu0 }
 0x18d   : > { %v5313_v29 = vpop.f32.mrf.mxu1  ;;  %v1236_v12 = vmul.f32 %v4219_v1, %v1235_v43  ;;  %v5337_v43 = vld [vmem:[%s6489_s7 + $0x1] ss:$0 sm:$0xff] }
 0x18f   : > { %v1237_v18 = vadd.f32 %v4219_v1, %v1236_v12  ;;  %v1259_v12 = vand.u32 2147483648, %v5311_v61 }
 0x194   : > { %v5309_v26 = vpop.f32.mrf.mxu0 }
 0x195   : > { %v5326_v21 = vpop.f32.mrf.mxu1 }
 0x19c   : > { %v884_v10 = vpop.f32.mrf.mxu0 }
 0x19d   : > { %v885_v27 = vadd.f32 %v5321_v20, %v884_v10  ;;  %v1250_v10 = vsub.f32 1.0, %v1249_v4  ;;  %v955_v36 = vpop.f32.mrf.mxu1  ;;  %v1241_v4 = vsel %vm5330_vm4, %v4219_v1, %v1237_v18 }
 0x19f   : > { %v1263_v25 = vadd.f32 %v1218_v9, %v885_v27  ;;  %v1244_v27 = vand.u32 2147483648, %v1231_v22  ;;  %v1257_v22 = vand.u32 2147483647, %v5311_v61 }
 0x1a1   : > { %v3964_v38 = vmul.f32 -1.442695, %v1263_v25  ;;  %vm1258_vm9 = vcmp.eq.f32.partialorder %v1257_v22, 8.507059e+37 }
 0x1a3   : > { %4222 = vpow2.f32 %v3964_v38  ;;  %v1260_v38 = vor.u32 1.1754944e-38, %v1259_v12 }
 0x1a4   : > { %v886_v15 = vpop.f32.mrf.mxu0 }
 0x1a5   : > { %v887_v11 = vadd.f32 %v5321_v20, %v886_v15  ;;  %v5346_v15 = vld [vmem:[%s6488_s6 + $0x5] ss:$0 sm:$0xff] }
 0x1a6   : > { %v956_v1 = vadd.f32 %v5346_v15, %v955_v36 }
 0x1a7   : > { %v1264_v37 = vadd.f32 %v1220_v6, %v887_v11  ;;  %v1251_v6 = vmul.f32 %v4221_v58, %v1250_v10  ;;  %v1245_v11 = vor.u32 1.1754944e-38, %v1244_v27 }
 0x1a9   : > { %v4223_v9 = vpop.eup %4222  ;;  %v3965_v42 = vmul.f32 -1.442695, %v1264_v37  ;;  %v1252_v37 = vadd.f32 %v4221_v58, %v1251_v6  ;;  %v957_v6 = vpop.f32.mrf.mxu1 }
 0x1aa   : > { %v1271_v25 = vadd.f32 1.0, %v4223_v9  ;;  %v1246_v9 = vsel %vm1243_vm5, %v1245_v11, %v1241_v4  ;;  %v1330_v11 = vadd.f32 %v5337_v43, %v1329_v39  ;;  %v958_v12 = vadd.f32 %v5346_v15, %v957_v6  ;;  %v5359_v6 = vpop.permute.xlu2 %1375 }
 0x1ab   : > { %4224 = vpow2.f32 %v3965_v42  ;;  %v1328_v42 = vadd.f32 %v5337_v43, %v1327_v35  ;;  %v1256_v35 = vsel %vm5350_vm8, %v4221_v58, %v1252_v37  ;;  %6609 = vst [vmem:[#allocation79_spill] sm:$0xff] %v5359_v6 }
 0x1ac   : > { %4226 = vrcp.f32 %v1271_v25  ;;  %v1284_v4 = vand.u32 2147483648, %v1271_v25  ;;  %v1261_v17 = vsel %vm1258_vm9, %v1260_v38, %v1256_v35  ;;  %v1282_v36 = vand.u32 2147483647, %v1271_v25 }
 0x1ad   : > { %v1332_v5 = vmul.f32 %v1328_v42, %v1246_v9  ;;  %vm1278_vm11 = vweird.f32 %v1271_v25  ;;  %v1333_v9 = vmul.f32 %v1330_v11, %v1261_v17 }
 0x1ae   : > { %v1285_v58 = vor.u32 1.1754944e-38, %v1284_v4  ;;  %vm1283_vm13 = vcmp.eq.f32.partialorder %v1282_v36, 8.507059e+37 }
 0x1af   : > { %v1334_v2 = vadd.f32 %v1332_v5, %v956_v1  ;;  %v1335_v39 = vadd.f32 %v1333_v9, %v958_v12 }
 0x1b1   : > { %v4225_v10 = vpop.eup %4224 }
 0x1b2   : > { %v4227_v40 = vpop.eup %4226  ;;  %v1272_v27 = vadd.f32 1.0, %v4225_v10 }
 0x1b3   : > { %v1274_v54 = vmul.f32 %v4227_v40, %v1271_v25  ;;  %vm1279_vm10 = vweird.f32 %v4227_v40 }
 0x1b4   : > { %4228 = vrcp.f32 %v1272_v27  ;;  %vm1280_vm12 = vmor %vm1278_vm11, %vm1279_vm10  ;;  %v1299_v1 = vand.u32 2147483648, %v1272_v27  ;;  %v1297_v35 = vand.u32 2147483647, %v1272_v27  ;;  %vm1293_vm15 = vweird.f32 %v1272_v27 }
 0x1b5   : > { %v1275_v61 = vsub.f32 1.0, %v1274_v54  ;;  %4230 = vtanh.f32 %v1334_v2 }
 0x1b6   : > { %4232 = vtanh.f32 %v1335_v39  ;;  %v1300_v2 = vor.u32 1.1754944e-38, %v1299_v1  ;;  %vm1298_vm2 = vcmp.eq.f32.partialorder %v1297_v35, 8.507059e+37  ;;  %v571_v35 = vadd.f32 %v5169_v32, %v4953_v45 }
 0x1b7   : > { %v1276_v3 = vmul.f32 %v4227_v40, %v1275_v61 }
 0x1b9   : > { %v1277_v10 = vadd.f32 %v4227_v40, %v1276_v3 }
 0x1ba   : > { %v4229_v42 = vpop.eup %4228 }
 0x1bb   : > { %v1281_v37 = vsel %vm1280_vm12, %v4227_v40, %v1277_v10  ;;  %v1289_v54 = vmul.f32 %v4229_v42, %v1272_v27  ;;  %vm1294_vm14 = vweird.f32 %v4229_v42  ;;  %v4231_v61 = vpop.eup %4230 }
 0x1bc   : > { %v1286_v22 = vsel %vm1283_vm13, %v1285_v58, %v1281_v37  ;;  %vm1295_vm1 = vmor %vm1293_vm15, %vm1294_vm14  ;;  %v4233_v12 = vpop.eup %4232  ;;  %v5361_v58 = vpop.permute.xlu0 %1385 }
 0x1bd   : > { %v1338_v18 = vsub.f32 1.0, %v1286_v22  ;;  %v1290_v5 = vsub.f32 1.0, %v1289_v54  ;;  %v1342_v25 = vmul.f32 0.0, %v1286_v22  ;;  %6610 = vst [vmem:[#allocation80_spill] sm:$0xff] %v5361_v58  ;;  %v5363_v37 = vpop.permute.xlu1 %1389  ;;  %v1392_v54 = vmul.f32 0.0, %v5361_v58  ;;  %v5368_v22 = vpop.permute.xlu2 %1379 }
 0x1be   : > { %6611 = vst [vmem:[#allocation81_spill] sm:$0xff] %v5363_v37  ;;  %v1393_v27 = vmul.f32 0.0, %v5363_v37 }
 0x1bf   : > { %v1291_v38 = vmul.f32 %v4229_v42, %v1290_v5  ;;  %v1340_v3 = vmul.f32 %v4231_v61, %v1338_v18  ;;  %6612 = vst [vmem:[#allocation82_spill] sm:$0xff] %v5368_v22  ;;  %v642_v61 = vadd.f32 %v5174_v28, %v4955_v46 }
 0x1c1   : > { %v1292_v17 = vadd.f32 %v4229_v42, %v1291_v38  ;;  %v1344_v4 = vadd.f32 %v1342_v25, %v1340_v3 }
 0x1c3   : > { %v1296_v40 = vsel %vm1295_vm1, %v4229_v42, %v1292_v17  ;;  %v1382_v18 = vmul.f32 %v5359_v6, %v1344_v4 }
 0x1c4   : > { %v1301_v11 = vsel %vm1298_vm2, %v1300_v2, %v1296_v40 }
 0x1c5   : > { %v1339_v36 = vsub.f32 1.0, %v1301_v11  ;;  %v1343_v9 = vmul.f32 0.0, %v1301_v11  ;;  %v5373_v1 = vadd.f32 %v1392_v54, %v1382_v18 }
 0x1c7   : > { %v1341_v10 = vmul.f32 %v4233_v12, %v1339_v36  ;;  %6614 = vst [vmem:[#allocation84_spill] sm:$0xff] %v5373_v1 }
 0x1c9   : > { %v1345_v39 = vadd.f32 %v1343_v9, %v1341_v10 }
 0x1cb   : > { %v1383_v42 = vmul.f32 %v5368_v22, %v1345_v39 }
 0x1cd   : > { %v5371_v5 = vadd.f32 %v1393_v27, %v1383_v42 }
 0x1cf   : > { %6613 = vst [vmem:[#allocation83_spill] sm:$0xff] %v5371_v5  ;;  %v1544_v38 = vpack.c.bf16 %v5371_v5, %v5373_v1 }
 0x1d1   : > { %3981 = vmatmul.msk.bf16.vlgmr.msrb.gmra.mxu3 %vm531_vm0, %v1544_v38  ;;  %3982 = vmatmul.msk.bf16.vlgmr.msra.gmra.mxu2 %vm531_vm0, %v1544_v38 }
 0x1d2   : > { %1760 = vmatpush.bf16.msrb.mxu3 %v4833_v24  ;;  %1854 = vmatpush.bf16.msra.mxu2 %v4900_v33 }
 0x1d6   : > { %1761 = vmatpush.bf16.msrb.mxu3 %v4872_v30  ;;  %1855 = vmatpush.bf16.msra.mxu2 %v4906_v34  ;;  %v573_v34 = vadd.f32 %v5169_v32, %v4972_v50 }
 0x1e1   : > { %3987 = vmatmul.msk.bf16.vlgmr.msra.gmra.mxu3 %vm531_vm0, %v1544_v38 }
 0x1e2   : > { %1886 = vmatpush.bf16.msra.mxu3 %v4933_v41  ;;  %v644_v41 = vadd.f32 %v5174_v28, %v4974_v51 }
 0x1e6   : > { %1887 = vmatpush.bf16.msra.mxu3 %v4951_v44  ;;  %v4633_v44 = vmov 5  }
 0x1e7   : > { %4176 = vset.pattern.permute.xlu1 %v4633_v44  ;;  %4174 = vset.pattern.permute.xlu2 %v4633_v44 }
 0x1e8   : > { %2049 = vperm.xlu1 %4176, %v4989_v57   ;;  %2039 = vperm.xlu2 %4174, %v4959_v47  }
 0x1e9   : > { %4175 = vset.pattern.permute.xlu0 %v4633_v44 }
 0x1ea   : > { %2043 = vperm.xlu0 %4175, %v4977_v52  }
 0x1f0   : > { %2053 = vperm.xlu2 %4174, %v5012_v0  }
 0x1f2   : > { %v1417_v3 = vpop.f32.mrf.mxu2  ;;  %v1431_v24 = vpop.f32.mrf.mxu3 }
 0x1f3   : > { %v1436_v17 = vadd.f32 %v1417_v3, %v571_v35  ;;  %v1476_v33 = vadd.f32 %v1431_v24, %v642_v61 }
 0x1f5   : > { %v3976_v2 = vmul.f32 -1.442695, %v1436_v17  ;;  %v3978_v30 = vmul.f32 -1.442695, %v1476_v33  ;;  %v713_v33 = vadd.f32 %v5223_v49, %v4968_v48 }
 0x1f7   : > { %4234 = vpow2.f32 %v3976_v2 }
 0x1f8   : > { %4236 = vpow2.f32 %v3978_v30 }
 0x1fa   : > { %v1419_v45 = vpop.f32.mrf.mxu2  ;;  %v1433_v25 = vpop.f32.mrf.mxu3 }
 0x1fb   : > { %v1437_v46 = vadd.f32 %v1419_v45, %v573_v34  ;;  %v1477_v40 = vadd.f32 %v1433_v25, %v644_v41 }
 0x1fd   : > { %v4235_v11 = vpop.eup %4234  ;;  %v3977_v4 = vmul.f32 -1.442695, %v1437_v46  ;;  %v3979_v36 = vmul.f32 -1.442695, %v1477_v40 }
 0x1fe   : > { %v4237_v50 = vpop.eup %4236  ;;  %v1444_v32 = vadd.f32 1.0, %v4235_v11 }
 0x1ff   : > { %v1484_v51 = vadd.f32 1.0, %v4237_v50  ;;  %4238 = vpow2.f32 %v3977_v4 }
 0x200   : > { %4240 = vrcp.f32 %v1444_v32  ;;  %v1457_v38 = vand.u32 2147483648, %v1444_v32  ;;  %v1455_v61 = vand.u32 2147483647, %v1444_v32  ;;  %vm1451_vm4 = vweird.f32 %v1444_v32 }
 0x201   : > { %4242 = vrcp.f32 %v1484_v51  ;;  %vm1491_vm6 = vweird.f32 %v1484_v51  ;;  %v1497_v40 = vand.u32 2147483648, %v1484_v51 }
 0x202   : > { %4244 = vpow2.f32 %v3979_v36  ;;  %v1525_v42 = vpop.f32.mrf.mxu2  ;;  %v1458_v2 = vor.u32 1.1754944e-38, %v1457_v38  ;;  %vm1456_vm7 = vcmp.eq.f32.partialorder %v1455_v61, 8.507059e+37 }
 0x203   : > { %v1526_v41 = vadd.f32 %v5212_v19, %v1525_v42 }
 0x205   : > { %v4239_v28 = vpop.eup %4238 }
 0x206   : > { %v4241_v12 = vpop.eup %4240  ;;  %v1445_v47 = vadd.f32 1.0, %v4239_v28 }
 0x207   : > { %v4243_v10 = vpop.eup %4242  ;;  %v1447_v9 = vmul.f32 %v4241_v12, %v1444_v32  ;;  %vm1452_vm3 = vweird.f32 %v4241_v12  ;;  %v1495_v32 = vand.u32 2147483647, %v1484_v51 }
 0x208   : > { %v4245_v54 = vpop.eup %4244  ;;  %v1487_v39 = vmul.f32 %v4243_v10, %v1484_v51  ;;  %4246 = vrcp.f32 %v1445_v47  ;;  %vm1453_vm5 = vmor %vm1451_vm4, %vm1452_vm3  ;;  %vm1492_vm8 = vweird.f32 %v4243_v10  ;;  %v1472_v50 = vand.u32 2147483648, %v1445_v47 }
 0x209   : > { %v5398_v52 = vadd.f32 1.0, %v4245_v54  ;;  %v1448_v27 = vsub.f32 1.0, %v1447_v9  ;;  %v1470_v36 = vand.u32 2147483647, %v1445_v47  ;;  %vm5406_vm10 = vmor %vm1491_vm6, %vm1492_vm8  ;;  %vm1466_vm11 = vweird.f32 %v1445_v47 }
 0x20a   : > { %v1488_v18 = vsub.f32 1.0, %v1487_v39  ;;  %v1527_v54 = vpop.f32.mrf.mxu2  ;;  %v1473_v38 = vor.u32 1.1754944e-38, %v1472_v50  ;;  %vm1496_vm13 = vcmp.eq.f32.partialorder %v1495_v32, 8.507059e+37  ;;  %v5424_v32 = vpop.permute.xlu0 %1699 }
 0x20b   : > { %4248 = vrcp.f32 %v5398_v52  ;;  %v1449_v35 = vmul.f32 %v4241_v12, %v1448_v27  ;;  %vm1471_vm14 = vcmp.eq.f32.partialorder %v1470_v36, 8.507059e+37  ;;  %v1528_v51 = vadd.f32 %v5212_v19, %v1527_v54  ;;  %6619 = vst [vmem:[#allocation87_spill] sm:$0xff] %v5424_v32  ;;  %v5427_v36 = vpop.permute.xlu1 %1689 }
 0x20c   : > { %v1489_v3 = vmul.f32 %v4243_v10, %v1488_v18  ;;  %v1498_v18 = vor.u32 1.1754944e-38, %v1497_v40  ;;  %vm1506_vm1 = vweird.f32 %v5398_v52  ;;  %6620 = vst [vmem:[#allocation88_spill] sm:$0xff] %v5427_v36 }
 0x20d   : > { %v1450_v17 = vadd.f32 %v4241_v12, %v1449_v35 }
 0x20e   : > { %v4247_v24 = vpop.eup %4246  ;;  %v1490_v45 = vadd.f32 %v4243_v10, %v1489_v3 }
 0x20f   : > { %v1462_v30 = vmul.f32 %v4247_v24, %v1445_v47  ;;  %v1454_v34 = vsel %vm1453_vm5, %v4241_v12, %v1450_v17  ;;  %vm1467_vm9 = vweird.f32 %v4247_v24 }
 0x210   : > { %v1459_v25 = vsel %vm1456_vm7, %v1458_v2, %v1454_v34  ;;  %v1494_v39 = vsel %vm5406_vm10, %v4243_v10, %v1490_v45  ;;  %vm1468_vm12 = vmor %vm1466_vm11, %vm1467_vm9  ;;  %v1512_v10 = vand.u32 2147483648, %v5398_v52  ;;  %v1510_v2 = vand.u32 2147483647, %v5398_v52 }
 0x211   : > { %v4249_v44 = vpop.eup %4248  ;;  %v1463_v46 = vsub.f32 1.0, %v1462_v30  ;;  %v1530_v4 = vmul.f32 %v1526_v41, %v1459_v25  ;;  %v1499_v3 = vsel %vm1496_vm13, %v1498_v18, %v1494_v39  ;;  %v5418_v30 = vpop.permute.xlu2 %1685  ;;  %v5445_v18 = vld [vmem:[%s6486_s4 + $0x8] sm:$0xff] }
 0x212   : > { %v1502_v11 = vmul.f32 %v4249_v44, %v5398_v52  ;;  %vm1507_vm15 = vweird.f32 %v4249_v44  ;;  %6617 = vst [vmem:[#allocation85_spill] sm:$0xff] %v5418_v30  ;;  %v1513_v45 = vor.u32 1.1754944e-38, %v1512_v10  ;;  %vm1511_vm3 = vcmp.eq.f32.partialorder %v1510_v2, 8.507059e+37  ;;  %v5475_v2 = vld [vmem:[%s4942_s22] sm:$0xff] }
 0x213   : > { %v1464_v48 = vmul.f32 %v4247_v24, %v1463_v46  ;;  %v1532_v9 = vadd.f32 %v1530_v4, %v713_v33  ;;  %v715_v33 = vadd.f32 %v5223_v49, %v4980_v53  ;;  %vm1508_vm2 = vmor %vm1506_vm1, %vm1507_vm15  ;;  %v1540_v46 = vmul.f32 %v1499_v3, %v5267_v23 }
 0x214   : > { %v1503_v12 = vsub.f32 1.0, %v1502_v11 }
 0x215   : > { %v1465_v27 = vadd.f32 %v4247_v24, %v1464_v48  ;;  %4250 = vtanh.f32 %v1532_v9 }
 0x216   : > { %v1504_v42 = vmul.f32 %v4249_v44, %v1503_v12  ;;  %v1703_v12 = vmul.f32 %v5424_v32, %v5269_v14 }
 0x217   : > { %v1469_v35 = vsel %vm1468_vm12, %v4247_v24, %v1465_v27  ;;  %v1536_v24 = vsub.f32 1.0, %v1499_v3 }
 0x218   : > { %v1505_v61 = vadd.f32 %v4249_v44, %v1504_v42  ;;  %v1474_v17 = vsel %vm1471_vm14, %v1473_v38, %v1469_v35  ;;  %v5451_v42 = vld [vmem:[%s6486_s4 + $0x18] sm:$0xff]  ;;  %v5457_v38 = vld [vmem:[%s6486_s4] sm:$0xff]  ;;  %v5463_v35 = vld [vmem:[%s6486_s4 + $0x10] sm:$0xff] }
 0x219   : > { %v1531_v47 = vmul.f32 %v1528_v51, %v1474_v17  ;;  %v5422_v50 = vpop.permute.xlu2 %1695  ;;  %v809_v51 = vadd.f32 %v5290_v8, %v5132_v60  ;;  %v5479_v60 = vld [vmem:[%s4942_s22 + $0x8] sm:$0xff] }
 0x21a   : > { %v1509_v41 = vsel %vm1508_vm2, %v4249_v44, %v1505_v61  ;;  %6618 = vst [vmem:[#allocation86_spill] sm:$0xff] %v5422_v50  ;;  %v1702_v28 = vmul.f32 %v5422_v50, %v5267_v23  ;;  %v880_v61 = vadd.f32 %v5321_v20, %v5305_v7  ;;  %v811_v7 = vadd.f32 %v5290_v8, %v5140_v31 }
 0x21b   : > { %v1533_v34 = vadd.f32 %v1531_v47, %v715_v33  ;;  %v4251_v19 = vpop.eup %4250  ;;  %v1514_v53 = vsel %vm1511_vm3, %v1513_v45, %v1509_v41  ;;  %v4634_v47 = vmov 3  }
 0x21c   : > { %v1538_v25 = vmul.f32 %v4251_v19, %v1536_v24  ;;  %v1537_v40 = vsub.f32 1.0, %v1514_v53  ;;  %v1541_v52 = vmul.f32 %v1514_v53, %v5269_v14  ;;  %4179 = vset.pattern.permute.xlu0 %v4634_v47  ;;  %4177 = vset.pattern.permute.xlu1 %v4634_v47  ;;  %v882_v24 = vadd.f32 %v5321_v20, %v5309_v26 }
 0x21d   : > { %4252 = vtanh.f32 %v1533_v34  ;;  %2359 = vperm.xlu0 %4179, %v4989_v57   ;;  %2349 = vperm.xlu1 %4177, %v5475_v2  }
 0x21e   : > { %v1542_v49 = vadd.f32 %v1540_v46, %v1538_v25  ;;  %4178 = vset.pattern.permute.xlu2 %v4634_v47 }
 0x21f   : > { %2353 = vperm.xlu2 %4178, %v5479_v60  }
 0x220   : > { %v1692_v48 = vmul.f32 %v5418_v30, %v1542_v49 }
 0x222   : > { %v5434_v54 = vadd.f32 %v1702_v28, %v1692_v48 }
 0x223   : > { %v4253_v11 = vpop.eup %4252 }
 0x224   : > { %v1539_v4 = vmul.f32 %v4253_v11, %v1537_v40  ;;  %6621 = vst [vmem:[#allocation89_spill] sm:$0xff] %v5434_v54 }
 0x225   : > { %2363 = vperm.xlu1 %4177, %v5012_v0  }
 0x226   : > { %v1543_v44 = vadd.f32 %v1541_v52, %v1539_v4 }
 0x228   : > { %v1693_v9 = vmul.f32 %v5427_v36, %v1543_v44 }
 0x22a   : > { %v5436_v39 = vadd.f32 %v1703_v12, %v1693_v9 }
 0x22c   : > { %6622 = vst [vmem:[#allocation90_spill] sm:$0xff] %v5436_v39  ;;  %v1736_v27 = vpack.c.bf16 %v5436_v39, %v5434_v54 }
 0x22e   : > { %3988 = vmatmul.msk.bf16.vlgmr.msrb.gmra.mxu2 %vm531_vm0, %v1736_v27  ;;  %3989 = vmatmul.msk.bf16.vlgmr.msrb.gmra.mxu3 %vm531_vm0, %v1736_v27 }
 0x22f   : > { %2078 = vmatpush.bf16.msrb.mxu2 %v5445_v18  ;;  %2092 = vmatpush.bf16.msrb.mxu3 %v5451_v42 }
 0x233   : > { %2079 = vmatpush.bf16.msrb.mxu2 %v5457_v38  ;;  %2093 = vmatpush.bf16.msrb.mxu3 %v5463_v35 }
 0x23e   : > { %3994 = vmatmul.msk.bf16.vlgmr.msra.gmra.mxu2 %vm531_vm0, %v1736_v27 }
 0x23f   : > { %2232 = vmatpush.bf16.msra.mxu2 %v5064_v13 }
 0x243   : > { %2233 = vmatpush.bf16.msra.mxu2 %v5079_v16 }
 0x254   : > { %v1557_v3 = vpop.f32.mrf.mxu3  ;;  %v1571_v17 = vpop.f32.mrf.mxu2 }
 0x255   : > { %v1576_v33 = vadd.f32 %v1557_v3, %v809_v51  ;;  %v1616_v10 = vadd.f32 %v1571_v17, %v880_v61 }
 0x257   : > { %v3983_v13 = vmul.f32 -1.442695, %v1576_v33  ;;  %v3985_v16 = vmul.f32 -1.442695, %v1616_v10  ;;  %v951_v10 = vadd.f32 %v5346_v15, %v5313_v29 }
 0x259   : > { %4254 = vpow2.f32 %v3983_v13 }
 0x25a   : > { %4256 = vpow2.f32 %v3985_v16 }
 0x25c   : > { %v1559_v34 = vpop.f32.mrf.mxu3  ;;  %v1573_v19 = vpop.f32.mrf.mxu2 }
 0x25d   : > { %v1577_v41 = vadd.f32 %v1559_v34, %v811_v7  ;;  %v1617_v45 = vadd.f32 %v1573_v19, %v882_v24 }
 0x25f   : > { %v4255_v25 = vpop.eup %4254  ;;  %v3984_v46 = vmul.f32 -1.442695, %v1577_v41  ;;  %v3986_v40 = vmul.f32 -1.442695, %v1617_v45 }
 0x260   : > { %v4257_v53 = vpop.eup %4256  ;;  %v1584_v49 = vadd.f32 1.0, %v4255_v25 }
 0x261   : > { %v1624_v11 = vadd.f32 1.0, %v4257_v53  ;;  %4258 = vpow2.f32 %v3984_v46 }
 0x262   : > { %4260 = vrcp.f32 %v1584_v49  ;;  %v1597_v27 = vand.u32 2147483648, %v1584_v49  ;;  %v1595_v61 = vand.u32 2147483647, %v1584_v49  ;;  %vm1591_vm5 = vweird.f32 %v1584_v49 }
 0x263   : > { %4262 = vrcp.f32 %v1624_v11  ;;  %vm1631_vm7 = vweird.f32 %v1624_v11  ;;  %v1637_v45 = vand.u32 2147483648, %v1624_v11 }
 0x264   : > { %4264 = vpow2.f32 %v3986_v40  ;;  %v1665_v9 = vpop.f32.mrf.mxu3  ;;  %v1598_v47 = vor.u32 1.1754944e-38, %v1597_v27  ;;  %vm1596_vm8 = vcmp.eq.f32.partialorder %v1595_v61, 8.507059e+37 }
 0x265   : > { %v1666_v7 = vadd.f32 %v5337_v43, %v1665_v9 }
 0x267   : > { %v4259_v31 = vpop.eup %4258 }
 0x268   : > { %v4261_v8 = vpop.eup %4260  ;;  %v1585_v4 = vadd.f32 1.0, %v4259_v31 }
 0x269   : > { %v4263_v26 = vpop.eup %4262  ;;  %v1587_v20 = vmul.f32 %v4261_v8, %v1584_v49  ;;  %vm1592_vm4 = vweird.f32 %v4261_v8  ;;  %v1635_v49 = vand.u32 2147483647, %v1624_v11 }
 0x26a   : > { %v4265_v52 = vpop.eup %4264  ;;  %v1627_v48 = vmul.f32 %v4263_v26, %v1624_v11  ;;  %4266 = vrcp.f32 %v1585_v4  ;;  %vm1593_vm6 = vmor %vm1591_vm5, %vm1592_vm4  ;;  %vm1632_vm9 = vweird.f32 %v4263_v26  ;;  %v1612_v53 = vand.u32 2147483648, %v1585_v4 }
 0x26b   : > { %v5487_v44 = vadd.f32 1.0, %v4265_v52  ;;  %v1588_v28 = vsub.f32 1.0, %v1587_v20  ;;  %v1610_v40 = vand.u32 2147483647, %v1585_v4  ;;  %vm5495_vm11 = vmor %vm1631_vm7, %vm1632_vm9  ;;  %vm1606_vm12 = vweird.f32 %v1585_v4 }
 0x26c   : > { %v1628_v12 = vsub.f32 1.0, %v1627_v48  ;;  %v1667_v52 = vpop.f32.mrf.mxu3  ;;  %v1613_v27 = vor.u32 1.1754944e-38, %v1612_v53  ;;  %vm1636_vm14 = vcmp.eq.f32.partialorder %v1635_v49, 8.507059e+37 }
 0x26d   : > { %4268 = vrcp.f32 %v5487_v44  ;;  %v1589_v51 = vmul.f32 %v4261_v8, %v1588_v28  ;;  %vm1611_vm15 = vcmp.eq.f32.partialorder %v1610_v40, 8.507059e+37  ;;  %v1668_v11 = vadd.f32 %v5337_v43, %v1667_v52 }
 0x26e   : > { %v1629_v3 = vmul.f32 %v4263_v26, %v1628_v12  ;;  %v1638_v12 = vor.u32 1.1754944e-38, %v1637_v45  ;;  %vm1646_vm2 = vweird.f32 %v5487_v44 }
 0x26f   : > { %v1590_v33 = vadd.f32 %v4261_v8, %v1589_v51 }
 0x270   : > { %v4267_v17 = vpop.eup %4266  ;;  %v1630_v34 = vadd.f32 %v4263_v26, %v1629_v3 }
 0x271   : > { %v1602_v13 = vmul.f32 %v4267_v17, %v1585_v4  ;;  %v1594_v16 = vsel %vm1593_vm6, %v4261_v8, %v1590_v33  ;;  %vm1607_vm10 = vweird.f32 %v4267_v17 }
 0x272   : > { %v1599_v19 = vsel %vm1596_vm8, %v1598_v47, %v1594_v16  ;;  %v1634_v48 = vsel %vm5495_vm11, %v4263_v26, %v1630_v34  ;;  %vm1608_vm13 = vmor %vm1606_vm12, %vm1607_vm10  ;;  %v1652_v26 = vand.u32 2147483648, %v5487_v44  ;;  %v1650_v47 = vand.u32 2147483647, %v5487_v44 }
 0x273   : > { %v4269_v24 = vpop.eup %4268  ;;  %v1603_v41 = vsub.f32 1.0, %v1602_v13  ;;  %v1670_v46 = vmul.f32 %v1666_v7, %v1599_v19  ;;  %v1639_v3 = vsel %vm1636_vm14, %v1638_v12, %v1634_v48  ;;  %v5507_v13 = vpop.permute.xlu1 %1707  ;;  %v5535_v12 = vld [vmem:[%s6487_s5 + $0x28] sm:$0xff] }
 0x274   : > { %v1642_v25 = vmul.f32 %v4269_v24, %v5487_v44  ;;  %vm1647_vm1 = vweird.f32 %v4269_v24  ;;  %v1676_v43 = vsub.f32 1.0, %v1639_v3  ;;  %v1653_v19 = vor.u32 1.1754944e-38, %v1652_v26 }
 0x275   : > { %v1604_v29 = vmul.f32 %v4267_v17, %v1603_v41  ;;  %v1672_v20 = vadd.f32 %v1670_v46, %v951_v10  ;;  %v953_v10 = vadd.f32 %v5346_v15, %v5326_v21  ;;  %vm1648_vm3 = vmor %vm1646_vm2, %vm1647_vm1  ;;  %v1680_v21 = vmul.f32 %v1639_v3, %v5373_v1 }
 0x276   : > { %v1643_v8 = vsub.f32 1.0, %v1642_v25  ;;  %vm1651_vm4 = vcmp.eq.f32.partialorder %v1650_v47, 8.507059e+37 }
 0x277   : > { %v1605_v28 = vadd.f32 %v4267_v17, %v1604_v29  ;;  %4270 = vtanh.f32 %v1672_v20 }
 0x278   : > { %v1644_v9 = vmul.f32 %v4269_v24, %v1643_v8 }
 0x279   : > { %v1609_v51 = vsel %vm1608_vm13, %v4267_v17, %v1605_v28  ;;  %v5509_v17 = vpop.permute.xlu2 %1711 }
 0x27a   : > { %v1645_v61 = vadd.f32 %v4269_v24, %v1644_v9  ;;  %v1614_v33 = vsel %vm1611_vm15, %v1613_v27, %v1609_v51  ;;  %v5543_v9 = vld [vmem:[%s6487_s5 + $0x20] sm:$0xff] }
 0x27b   : > { %v1671_v4 = vmul.f32 %v1668_v11, %v1614_v33  ;;  %v5513_v49 = vpop.permute.xlu1 %1717  ;;  %v5551_v27 = vld [vmem:[%s6488_s6] ss:$0 sm:$0xff]  ;;  %v5558_v11 = vld [vmem:[%s6488_s6 + $0x1] ss:$0 sm:$0xff] }
 0x27c   : > { %v1649_v34 = vsel %vm1648_vm3, %v4269_v24, %v1645_v61  ;;  %v1724_v31 = vmul.f32 %v5513_v49, %v5373_v1  ;;  %v576_v51 = vadd.f32 %v5551_v27, %v4984_v55  ;;  %v647_v61 = vadd.f32 %v5558_v11, %v4986_v56 }
 0x27d   : > { %v1673_v16 = vadd.f32 %v1671_v4, %v953_v10  ;;  %v4271_v7 = vpop.eup %4270  ;;  %v1654_v15 = vsel %vm1651_vm4, %v1653_v19, %v1649_v34  ;;  %v649_v55 = vadd.f32 %v5558_v11, %v5009_v63 }
 0x27e   : > { %v1678_v41 = vmul.f32 %v4271_v7, %v1676_v43  ;;  %v1677_v25 = vsub.f32 1.0, %v1654_v15  ;;  %v1681_v53 = vmul.f32 %v1654_v15, %v5371_v5  ;;  %v578_v43 = vadd.f32 %v5551_v27, %v5007_v62 }
 0x27f   : > { %4272 = vtanh.f32 %v1673_v16  ;;  %v4635_v62 = vmov 4  }
 0x280   : > { %v1682_v45 = vadd.f32 %v1680_v21, %v1678_v41  ;;  %4182 = vset.pattern.permute.xlu0 %v4635_v62  ;;  %4180 = vset.pattern.permute.xlu2 %v4635_v62 }
 0x281   : > { %v5515_v29 = vpop.permute.xlu2 %1721  ;;  %2385 = vperm.xlu0 %4182, %v5012_v0   ;;  %2371 = vperm.xlu2 %4180, %v5475_v2  }
 0x282   : > { %6625 = vst [vmem:[#allocation91_spill] sm:$0xff] %v5515_v29  ;;  %v1714_v40 = vmul.f32 %v5507_v13, %v1682_v45  ;;  %v1725_v8 = vmul.f32 %v5515_v29, %v5371_v5  ;;  %4181 = vset.pattern.permute.xlu1 %v4635_v62 }
 0x283   : > { %2375 = vperm.xlu1 %4181, %v5479_v60   ;;  %v6628_v60 = vmov 0  }
 0x284   : > { %v5523_v52 = vadd.f32 %v1724_v31, %v1714_v40 }
 0x285   : > { %v4273_v46 = vpop.eup %4272 }
 0x286   : > { %v1679_v44 = vmul.f32 %v4273_v46, %v1677_v25  ;;  %6626 = vst [vmem:[#allocation92_spill] sm:$0xff] %v5523_v52 }
 0x288   : > { %v1683_v24 = vadd.f32 %v1681_v53, %v1679_v44 }
 0x289   : > { %2381 = vperm.xlu2 %4180, %v4989_v57   ;;  %4185 = vset.pattern.permute.xlu0 %v6628_v60 }
 0x28a   : > { %v1715_v20 = vmul.f32 %v5509_v17, %v1683_v24 }
 0x28b   : > { %4183 = vset.pattern.permute.xlu1 %v6628_v60 }
 0x28c   : > { %v5525_v48 = vadd.f32 %v1725_v8, %v1715_v20 }
 0x28e   : > { %6627 = vst [vmem:[#allocation93_spill] sm:$0xff] %v5525_v48  ;;  %v1876_v28 = vpack.c.bf16 %v5525_v48, %v5523_v52 }
 0x290   : > { %3995 = vmatmul.msk.bf16.vlgmr.msra.gmra.mxu3 %vm531_vm0, %v1876_v28  ;;  %3996 = vmatmul.msk.bf16.vlgmr.msra.gmra.mxu0 %vm531_vm0, %v1876_v28 }
 0x291   : > { %4001 = vmatmul.msk.bf16.vlgmr.msra.gmra.mxu1 %vm531_vm0, %v1876_v28  ;;  %2326 = vmatpush.bf16.msra.mxu3 %v5535_v12 }
 0x292   : > { %2410 = vmatpush.bf16.msra.mxu0 %v5445_v18  ;;  %2424 = vmatpush.bf16.msra.mxu1 %v5451_v42 }
 0x293   : > { %4184 = vset.pattern.permute.xlu2 %v6628_v60 }
 0x295   : > { %2327 = vmatpush.bf16.msra.mxu3 %v5543_v9 }
 0x296   : > { %2411 = vmatpush.bf16.msra.mxu0 %v5457_v38  ;;  %2425 = vmatpush.bf16.msra.mxu1 %v5463_v35 }
 0x2b1   : > { %v1749_v3 = vpop.f32.mrf.mxu2  ;;  %v1763_v33 = vpop.f32.mrf.mxu3 }
 0x2b2   : > { %v1768_v10 = vadd.f32 %v1749_v3, %v576_v51  ;;  %v1808_v26 = vadd.f32 %v1763_v33, %v647_v61 }
 0x2b4   : > { %v3990_v4 = vmul.f32 -1.442695, %v1768_v10  ;;  %v3992_v47 = vmul.f32 -1.442695, %v1808_v26  ;;  %v5586_v26 = vld [vmem:[%s6488_s6 + $0x2] ss:$0 sm:$0xff] }
 0x2b6   : > { %4274 = vpow2.f32 %v3990_v4  ;;  %v718_v4 = vadd.f32 %v5586_v26, %v4998_v59 }
 0x2b7   : > { %4276 = vpow2.f32 %v3992_v47 }
 0x2b9   : > { %v1751_v16 = vpop.f32.mrf.mxu2  ;;  %v1765_v7 = vpop.f32.mrf.mxu3 }
 0x2ba   : > { %v1769_v34 = vadd.f32 %v1751_v16, %v578_v43  ;;  %v1809_v19 = vadd.f32 %v1765_v7, %v649_v55  ;;  %v5594_v55 = vld [vmem:[%s6489_s7] ss:$0 sm:$0xff] }
 0x2bc   : > { %v4275_v41 = vpop.eup %4274  ;;  %v3991_v56 = vmul.f32 -1.442695, %v1769_v34  ;;  %v3993_v45 = vmul.f32 -1.442695, %v1809_v19 }
 0x2bd   : > { %v4277_v21 = vpop.eup %4276  ;;  %v1776_v15 = vadd.f32 1.0, %v4275_v41 }
 0x2be   : > { %v5566_v25 = vadd.f32 1.0, %v4277_v21  ;;  %4278 = vpow2.f32 %v3991_v56 }
 0x2bf   : > { %4280 = vrcp.f32 %v1776_v15  ;;  %v1789_v2 = vand.u32 2147483648, %v1776_v15  ;;  %v1787_v61 = vand.u32 2147483647, %v1776_v15  ;;  %vm1783_vm6 = vweird.f32 %v1776_v15 }
 0x2c0   : > { %4282 = vrcp.f32 %v5566_v25  ;;  %vm1823_vm8 = vweird.f32 %v5566_v25 }
 0x2c1   : > { %4284 = vpow2.f32 %v3993_v45  ;;  %v1857_v28 = vpop.f32.mrf.mxu2  ;;  %v1790_v47 = vor.u32 1.1754944e-38, %v1789_v2  ;;  %vm1788_vm9 = vcmp.eq.f32.partialorder %v1787_v61, 8.507059e+37 }
 0x2c2   : > { %v1858_v16 = vadd.f32 %v5594_v55, %v1857_v28 }
 0x2c4   : > { %v4279_v63 = vpop.eup %4278 }
 0x2c5   : > { %v4281_v46 = vpop.eup %4280  ;;  %v1777_v44 = vadd.f32 1.0, %v4279_v63  ;;  %v1827_v63 = vand.u32 2147483647, %v5566_v25 }
 0x2c6   : > { %v5572_v53 = vpop.eup %4282  ;;  %v1779_v40 = vmul.f32 %v4281_v46, %v1776_v15  ;;  %vm1784_vm5 = vweird.f32 %v4281_v46  ;;  %v1829_v15 = vand.u32 2147483648, %v5566_v25 }
 0x2c7   : > { %v4285_v24 = vpop.eup %4284  ;;  %v1819_v31 = vmul.f32 %v5572_v53, %v5566_v25  ;;  %4286 = vrcp.f32 %v1777_v44  ;;  %vm1785_vm7 = vmor %vm1783_vm6, %vm1784_vm5  ;;  %vm1824_vm10 = vweird.f32 %v5572_v53  ;;  %v1804_v21 = vand.u32 2147483648, %v1777_v44 }
 0x2c8   : > { %v5576_v8 = vadd.f32 1.0, %v4285_v24  ;;  %v1780_v20 = vsub.f32 1.0, %v1779_v40  ;;  %v1802_v62 = vand.u32 2147483647, %v1777_v44  ;;  %vm5604_vm12 = vmor %vm1823_vm8, %vm1824_vm10  ;;  %vm1798_vm13 = vweird.f32 %v1777_v44 }
 0x2c9   : > { %v1820_v0 = vsub.f32 1.0, %v1819_v31  ;;  %v1859_v24 = vpop.f32.mrf.mxu2  ;;  %v1805_v2 = vor.u32 1.1754944e-38, %v1804_v21  ;;  %vm1828_vm1 = vcmp.eq.f32.partialorder %v1827_v63, 8.507059e+37  ;;  %v5621_v63 = vpop.permute.xlu2 %2027 }
 0x2ca   : > { %4288 = vrcp.f32 %v5576_v8  ;;  %v1781_v51 = vmul.f32 %v4281_v46, %v1780_v20  ;;  %vm1803_vm15 = vcmp.eq.f32.partialorder %v1802_v62, 8.507059e+37  ;;  %v1860_v25 = vadd.f32 %v5594_v55, %v1859_v24  ;;  %v5626_v24 = vpop.permute.xlu0 %2017 }
 0x2cb   : > { %v1821_v3 = vmul.f32 %v5572_v53, %v1820_v0  ;;  %vm1838_vm3 = vweird.f32 %v5576_v8 }
 0x2cc   : > { %v1782_v10 = vadd.f32 %v4281_v46, %v1781_v51  ;;  %v1830_v51 = vor.u32 1.1754944e-38, %v1829_v15 }
 0x2cd   : > { %v4287_v33 = vpop.eup %4286  ;;  %v1822_v41 = vadd.f32 %v5572_v53, %v1821_v3 }
 0x2ce   : > { %v1794_v57 = vmul.f32 %v4287_v33, %v1777_v44  ;;  %v1786_v43 = vsel %vm1785_vm7, %v4281_v46, %v1782_v10  ;;  %vm1799_vm11 = vweird.f32 %v4287_v33 }
 0x2cf   : > { %v1791_v34 = vsel %vm1788_vm9, %v1790_v47, %v1786_v43  ;;  %v1826_v0 = vsel %vm5604_vm12, %v5572_v53, %v1822_v41  ;;  %vm1800_vm14 = vmor %vm1798_vm13, %vm1799_vm11  ;;  %v1844_v47 = vand.u32 2147483648, %v5576_v8  ;;  %v5618_v43 = vpop.permute.xlu1 %2021 }
 0x2d0   : > { %v4289_v7 = vpop.eup %4288  ;;  %v1795_v19 = vsub.f32 1.0, %v1794_v57  ;;  %v1862_v56 = vmul.f32 %v1858_v16, %v1791_v34  ;;  %v1831_v60 = vsel %vm1828_vm1, %v1830_v51, %v1826_v0  ;;  %v1842_v57 = vand.u32 2147483647, %v5576_v8 }
 0x2d1   : > { %v1834_v59 = vmul.f32 %v4289_v7, %v5576_v8  ;;  %vm1839_vm2 = vweird.f32 %v4289_v7  ;;  %v1868_v16 = vsub.f32 1.0, %v1831_v60  ;;  %v1845_v41 = vor.u32 1.1754944e-38, %v1844_v47  ;;  %v5682_v47 = vld [vmem:[%s6488_s6 + $0x4] ss:$0 sm:$0xff] }
 0x2d2   : > { %v1796_v45 = vmul.f32 %v4287_v33, %v1795_v19  ;;  %v1864_v40 = vadd.f32 %v1862_v56, %v718_v4  ;;  %v6631_v4 = vld [vmem:[#allocation11_spill] sm:$0xff]  ;;  %vm1840_vm4 = vmor %vm1838_vm3, %vm1839_vm2  ;;  %v1872_v56 = vmul.f32 %v1831_v60, %v5434_v54  ;;  %vm1843_vm5 = vcmp.eq.f32.partialorder %v1842_v57, 8.507059e+37  ;;  %v5664_v60 = vld [vmem:[%s6486_s4 + $0x20] sm:$0xff] }
 0x2d3   : > { %v1835_v46 = vsub.f32 1.0, %v1834_v59  ;;  %v720_v44 = vadd.f32 %v5586_v26, %v6631_v4  ;;  %v5670_v4 = vld [vmem:[%s6487_s5] sm:$0xff] }
 0x2d4   : > { %v1797_v20 = vadd.f32 %v4287_v33, %v1796_v45  ;;  %4290 = vtanh.f32 %v1864_v40 }
 0x2d5   : > { %v1836_v28 = vmul.f32 %v4289_v7, %v1835_v46 }
 0x2d6   : > { %v1801_v61 = vsel %vm1800_vm14, %v4287_v33, %v1797_v20  ;;  %v2034_v20 = vmul.f32 %v5621_v63, %v5434_v54 }
 0x2d7   : > { %v1837_v3 = vadd.f32 %v4289_v7, %v1836_v28  ;;  %v1806_v10 = vsel %vm1803_vm15, %v1805_v2, %v1801_v61  ;;  %v5624_v40 = vpop.permute.xlu1 %2031 }
 0x2d8   : > { %v1863_v53 = vmul.f32 %v1860_v25, %v1806_v10  ;;  %v2035_v0 = vmul.f32 %v5624_v40, %v5436_v39  ;;  %v5646_v25 = vld [vmem:[%s6486_s4 + $0x28] sm:$0xff]  ;;  %v5658_v10 = vld [vmem:[%s6487_s5 + $0x18] sm:$0xff] }
 0x2d9   : > { %v1841_v19 = vsel %vm1840_vm4, %v4289_v7, %v1837_v3  ;;  %v5652_v3 = vld [vmem:[%s6487_s5 + $0x8] sm:$0xff] }
 0x2da   : > { %v1865_v33 = vadd.f32 %v1863_v53, %v720_v44  ;;  %v4291_v34 = vpop.eup %4290  ;;  %v1846_v21 = vsel %vm1843_vm5, %v1845_v41, %v1841_v19  ;;  %v5676_v44 = vld [vmem:[%s6487_s5 + $0x10] sm:$0xff]  ;;  %v6634_v53 = vld [vmem:[#allocation75_spill] sm:$0xff]  ;;  %v5689_v19 = vld [vmem:[%s6488_s6 + $0x3] ss:$0 sm:$0xff] }
 0x2db   : > { %v1870_v59 = vmul.f32 %v4291_v34, %v1868_v16  ;;  %v1869_v45 = vsub.f32 1.0, %v1846_v21  ;;  %v1873_v46 = vmul.f32 %v1846_v21, %v5436_v39  ;;  %v875_v57 = vadd.f32 %v5682_v47, %v6634_v53  ;;  %v6635_v41 = vld [vmem:[#allocation32_spill] sm:$0xff]  ;;  %v6636_v21 = vld [vmem:[#allocation77_spill] sm:$0xff] }
 0x2dc   : > { %4292 = vtanh.f32 %v1865_v33 }
 0x2dd   : > { %v1874_v15 = vadd.f32 %v1872_v56, %v1870_v59  ;;  %v804_v59 = vadd.f32 %v5689_v19, %v6635_v41 }
 0x2df   : > { %v2024_v7 = vmul.f32 %v5626_v24, %v1874_v15  ;;  %v877_v15 = vadd.f32 %v5682_v47, %v6636_v21 }
 0x2e1   : > { %v5634_v2 = vadd.f32 %v2034_v20, %v2024_v7 }
 0x2e2   : > { %v4293_v62 = vpop.eup %4292 }
 0x2e3   : > { %v1871_v8 = vmul.f32 %v4293_v62, %v1869_v45  ;;  %6632 = vst [vmem:[#allocation11_spill] sm:$0xff] %v5634_v2 }
 0x2e5   : > { %v1875_v31 = vadd.f32 %v1873_v46, %v1871_v8 }
 0x2e7   : > { %v2025_v28 = vmul.f32 %v5618_v43, %v1875_v31 }
 0x2e9   : > { %v5636_v51 = vadd.f32 %v2035_v0, %v2025_v28  ;;  %v6637_v0 = vld [vmem:[#allocation36_spill] sm:$0xff] }
 0x2ea   : > { %v806_v28 = vadd.f32 %v5689_v19, %v6637_v0 }
 0x2eb   : > { %6633 = vst [vmem:[#allocation94_spill] sm:$0xff] %v5636_v51  ;;  %v2068_v61 = vpack.c.bf16 %v5636_v51, %v5634_v2 }
 0x2ed   : > { %4002 = vmatmul.msk.bf16.vlgmr.msrb.gmra.mxu2 %vm531_vm0, %v2068_v61  ;;  %4003 = vmatmul.msk.bf16.vlgmr.msrb.gmra.mxu3 %vm531_vm0, %v2068_v61 }
 0x2ee   : > { %4008 = vmatmul.msk.bf16.vlgmr.msrb.gmra.mxu0 %vm531_vm0, %v2068_v61  ;;  %2518 = vmatpush.bf16.msrb.mxu2 %v5646_v25 }
 0x2ef   : > { %2550 = vmatpush.bf16.msrb.mxu3 %v5652_v3  ;;  %2564 = vmatpush.bf16.msrb.mxu0 %v5658_v10 }
 0x2f2   : > { %2519 = vmatpush.bf16.msrb.mxu2 %v5664_v60 }
 0x2f3   : > { %2551 = vmatpush.bf16.msrb.mxu3 %v5670_v4  ;;  %2565 = vmatpush.bf16.msrb.mxu0 %v5676_v44 }
 0x30d   : > { %v1903_v33 = vpop.f32.mrf.mxu0 }
 0x30e   : > { %v1948_v16 = vadd.f32 %v1903_v33, %v875_v57 }
 0x310   : > { %v3999_v34 = vmul.f32 -1.442695, %v1948_v16 }
 0x312   : > { %4294 = vpow2.f32 %v3999_v34 }
 0x313   : > { %v1889_v56 = vpop.f32.mrf.mxu3 }
 0x314   : > { %v1908_v45 = vadd.f32 %v1889_v56, %v804_v59 }
 0x315   : > { %v1905_v62 = vpop.f32.mrf.mxu0 }
 0x316   : > { %v3997_v8 = vmul.f32 -1.442695, %v1908_v45  ;;  %v1949_v46 = vadd.f32 %v1905_v62, %v877_v15 }
 0x318   : > { %v4295_v7 = vpop.eup %4294  ;;  %4296 = vpow2.f32 %v3997_v8  ;;  %v4000_v31 = vmul.f32 -1.442695, %v1949_v46 }
 0x319   : > { %v5695_v20 = vadd.f32 1.0, %v4295_v7 }
 0x31a   : > { %4298 = vpow2.f32 %v4000_v31  ;;  %v1997_v31 = vpop.f32.mrf.mxu1 }
 0x31b   : > { %v1891_v61 = vpop.f32.mrf.mxu3  ;;  %4300 = vrcp.f32 %v5695_v20  ;;  %v1969_v37 = vand.u32 2147483648, %v5695_v20  ;;  %vm1963_vm11 = vweird.f32 %v5695_v20 }
 0x31c   : > { %v1909_v53 = vadd.f32 %v1891_v61, %v806_v28 }
 0x31e   : > { %v4297_v57 = vpop.eup %4296  ;;  %v3998_v33 = vmul.f32 -1.442695, %v1909_v53 }
 0x31f   : > { %v1916_v16 = vadd.f32 1.0, %v4297_v57 }
 0x320   : > { %v4299_v34 = vpop.eup %4298  ;;  %4302 = vpow2.f32 %v3998_v33 }
 0x321   : > { %4304 = vrcp.f32 %v1916_v16  ;;  %v4301_v41 = vpop.eup %4300  ;;  %v5700_v59 = vadd.f32 1.0, %v4299_v34  ;;  %v1929_v0 = vand.u32 2147483648, %v1916_v16  ;;  %v1927_v61 = vand.u32 2147483647, %v1916_v16 }
 0x322   : > { %v1959_v56 = vmul.f32 %v4301_v41, %v5695_v20  ;;  %vm1923_vm7 = vweird.f32 %v1916_v16  ;;  %vm1964_vm10 = vweird.f32 %v4301_v41 }
 0x323   : > { %4306 = vrcp.f32 %v5700_v59  ;;  %vm1928_vm9 = vcmp.eq.f32.partialorder %v1927_v61, 8.507059e+37  ;;  %vm5724_vm12 = vmor %vm1963_vm11, %vm1964_vm10  ;;  %vm1978_vm4 = vweird.f32 %v5700_v59 }
 0x324   : > { %v1960_v8 = vsub.f32 1.0, %v1959_v56  ;;  %v5711_v56 = vld [vmem:[%s6489_s7 + $0x1] ss:$0 sm:$0xff] }
 0x326   : > { %v4303_v21 = vpop.eup %4302  ;;  %v1961_v53 = vmul.f32 %v4301_v41, %v1960_v8 }
 0x327   : > { %v4305_v15 = vpop.eup %4304  ;;  %v1917_v45 = vadd.f32 1.0, %v4303_v21  ;;  %v1930_v21 = vor.u32 1.1754944e-38, %v1929_v0  ;;  %v6638_v0 = vld [vmem:[#allocation76_spill] sm:$0xff] }
 0x328   : > { %v1919_v62 = vmul.f32 %v4305_v15, %v1916_v16  ;;  %vm1924_vm6 = vweird.f32 %v4305_v15  ;;  %v1962_v23 = vadd.f32 %v4301_v41, %v1961_v53  ;;  %v5717_v16 = vld [vmem:[%s6488_s6 + $0x5] ss:$0 sm:$0xff] }
 0x329   : > { %4308 = vrcp.f32 %v1917_v45  ;;  %v5704_v46 = vpop.eup %4306  ;;  %vm1925_vm8 = vmor %vm1923_vm7, %vm1924_vm6  ;;  %vm1938_vm14 = vweird.f32 %v1917_v45 }
 0x32a   : > { %v1920_v7 = vsub.f32 1.0, %v1919_v62  ;;  %v1974_v57 = vmul.f32 %v5704_v46, %v5700_v59  ;;  %v1998_v62 = vadd.f32 %v5711_v56, %v1997_v31  ;;  %v1944_v31 = vand.u32 2147483648, %v1917_v45 }
 0x32b   : > { %vm1979_vm3 = vweird.f32 %v5704_v46 }
 0x32c   : > { %v1921_v28 = vmul.f32 %v4305_v15, %v1920_v7  ;;  %v1975_v54 = vsub.f32 1.0, %v1974_v57  ;;  %v1942_v57 = vand.u32 2147483647, %v1917_v45  ;;  %vm1980_vm5 = vmor %vm1978_vm4, %vm1979_vm3 }
 0x32e   : > { %v1922_v33 = vadd.f32 %v4305_v15, %v1921_v28  ;;  %v946_v28 = vadd.f32 %v5717_v16, %v6638_v0  ;;  %vm1943_vm2 = vcmp.eq.f32.partialorder %v1942_v57, 8.507059e+37 }
 0x32f   : > { %v4309_v34 = vpop.eup %4308 }
 0x330   : > { %v1926_v58 = vsel %vm1925_vm8, %v4305_v15, %v1922_v33  ;;  %v1934_v7 = vmul.f32 %v4309_v34, %v1917_v45  ;;  %v1967_v15 = vand.u32 2147483647, %v5695_v20  ;;  %vm1939_vm13 = vweird.f32 %v4309_v34 }
 0x331   : > { %v1931_v8 = vsel %vm1928_vm9, %v1930_v21, %v1926_v58  ;;  %v1976_v33 = vmul.f32 %v5704_v46, %v1975_v54  ;;  %v1999_v21 = vpop.f32.mrf.mxu1  ;;  %vm1940_vm1 = vmor %vm1938_vm14, %vm1939_vm13  ;;  %v1945_v20 = vor.u32 1.1754944e-38, %v1944_v31  ;;  %v1982_v45 = vand.u32 2147483647, %v5700_v59 }
 0x332   : > { %v2002_v14 = vmul.f32 %v1998_v62, %v1931_v8  ;;  %v1935_v39 = vsub.f32 1.0, %v1934_v7  ;;  %v1966_v62 = vsel %vm5724_vm12, %v4301_v41, %v1962_v23  ;;  %v1970_v7 = vor.u32 1.1754944e-38, %v1969_v37 }
 0x333   : > { %vm1968_vm15 = vcmp.eq.f32.partialorder %v1967_v15, 8.507059e+37  ;;  %v2000_v0 = vadd.f32 %v5711_v56, %v1999_v21  ;;  %v1984_v37 = vand.u32 2147483648, %v5700_v59  ;;  %vm1983_vm6 = vcmp.eq.f32.partialorder %v1982_v45, 8.507059e+37 }
 0x334   : > { %v2004_v61 = vadd.f32 %v2002_v14, %v946_v28  ;;  %v1936_v53 = vmul.f32 %v4309_v34, %v1935_v39  ;;  %v1971_v14 = vsel %vm1968_vm15, %v1970_v7, %v1966_v62  ;;  %v1977_v39 = vadd.f32 %v5704_v46, %v1976_v33  ;;  %v6641_v28 = vld [vmem:[#allocation78_spill] sm:$0xff] }
 0x335   : > { %v948_v23 = vadd.f32 %v5717_v16, %v6641_v28  ;;  %v2008_v15 = vsub.f32 1.0, %v1971_v14  ;;  %v1985_v57 = vor.u32 1.1754944e-38, %v1984_v37 }
 0x336   : > { %4310 = vtanh.f32 %v2004_v61  ;;  %v1937_v8 = vadd.f32 %v4309_v34, %v1936_v53  ;;  %v2012_v53 = vmul.f32 %v1971_v14, %v5523_v52  ;;  %v5749_v14 = vpop.permute.xlu0 %2043 }
 0x338   : > { %v1941_v5 = vsel %vm1940_vm1, %v4309_v34, %v1937_v8  ;;  %v5739_v34 = vpop.permute.xlu2 %2039 }
 0x339   : > { %v1946_v54 = vsel %vm1943_vm2, %v1945_v20, %v1941_v5  ;;  %v1981_v5 = vsel %vm1980_vm5, %v5704_v46, %v1977_v39  ;;  %v5744_v20 = vpop.permute.xlu1 %2049 }
 0x33a   : > { %v2003_v41 = vmul.f32 %v2000_v0, %v1946_v54  ;;  %v1986_v21 = vsel %vm1983_vm6, %v1985_v57, %v1981_v5  ;;  %v2056_v46 = vmul.f32 %v5744_v20, %v5523_v52 }
 0x33b   : > { %v2009_v62 = vsub.f32 1.0, %v1986_v21  ;;  %v2013_v59 = vmul.f32 %v1986_v21, %v5525_v48 }
 0x33c   : > { %v4311_v31 = vpop.eup %4310  ;;  %v2005_v58 = vadd.f32 %v2003_v41, %v948_v23 }
 0x33d   : > { %v2010_v61 = vmul.f32 %v4311_v31, %v2008_v15  ;;  %v6644_v15 = vld [vmem:[#allocation13_spill] sm:$0xff] }
 0x33e   : > { %4312 = vtanh.f32 %v2005_v58  ;;  %v581_v31 = vadd.f32 %v5551_v27, %v6644_v15  ;;  %v6645_v58 = vld [vmem:[#allocation14_spill] sm:$0xff] }
 0x33f   : > { %v2014_v33 = vadd.f32 %v2012_v53, %v2010_v61  ;;  %v652_v61 = vadd.f32 %v5558_v11, %v6645_v58 }
 0x340   : > { %v5746_v0 = vpop.permute.xlu2 %2053 }
 0x341   : > { %v2046_v54 = vmul.f32 %v5739_v34, %v2014_v33  ;;  %v2057_v39 = vmul.f32 %v5746_v0, %v5525_v48 }
 0x343   : > { %v5756_v37 = vadd.f32 %v2056_v46, %v2046_v54 }
 0x344   : > { %v4313_v7 = vpop.eup %4312 }
 0x345   : > { %v2011_v8 = vmul.f32 %v4313_v7, %v2009_v62  ;;  %6642 = vst [vmem:[#allocation75_spill] sm:$0xff] %v5756_v37 }
 0x347   : > { %v2015_v28 = vadd.f32 %v2013_v59, %v2011_v8 }
 0x349   : > { %v2047_v23 = vmul.f32 %v5749_v14, %v2015_v28 }
 0x34b   : > { %v5758_v41 = vadd.f32 %v2057_v39, %v2047_v23 }
 0x34d   : > { %6643 = vst [vmem:[#allocation32_spill] sm:$0xff] %v5758_v41  ;;  %v2208_v45 = vpack.c.bf16 %v5758_v41, %v5756_v37 }
 0x34f   : > { %4009 = vmatmul.msk.bf16.vlgmr.msrb.gmra.mxu1 %vm531_vm0, %v2208_v45  ;;  %4010 = vmatmul.msk.bf16.vlgmr.msra.gmra.mxu2 %vm531_vm0, %v2208_v45 }
 0x350   : > { %4015 = vmatmul.msk.bf16.vlgmr.msra.gmra.mxu3 %vm531_vm0, %v2208_v45  ;;  %2658 = vmatpush.bf16.msrb.mxu1 %v5535_v12 }
 0x351   : > { %2710 = vmatpush.bf16.msra.mxu2 %v5445_v18  ;;  %2724 = vmatpush.bf16.msra.mxu3 %v5451_v42  ;;  %v6646_v42 = vld [vmem:[#allocation17_spill] sm:$0xff] }
 0x354   : > { %2659 = vmatpush.bf16.msrb.mxu1 %v5543_v9  ;;  %v583_v9 = vadd.f32 %v5551_v27, %v6646_v42 }
 0x355   : > { %2711 = vmatpush.bf16.msra.mxu2 %v5457_v38  ;;  %2725 = vmatpush.bf16.msra.mxu3 %v5463_v35  ;;  %v6647_v38 = vld [vmem:[#allocation18_spill] sm:$0xff] }
 0x356   : > { %v654_v35 = vadd.f32 %v5558_v11, %v6647_v38 }
 0x370   : > { %v2081_v53 = vpop.f32.mrf.mxu2  ;;  %v2095_v5 = vpop.f32.mrf.mxu3 }
 0x371   : > { %v2100_v57 = vadd.f32 %v2081_v53, %v581_v31  ;;  %v2140_v12 = vadd.f32 %v2095_v5, %v652_v61 }
 0x373   : > { %v4004_v33 = vmul.f32 -1.442695, %v2100_v57  ;;  %v4006_v18 = vmul.f32 -1.442695, %v2140_v12  ;;  %v2189_v57 = vpop.f32.mrf.mxu0 }
 0x375   : > { %4314 = vpow2.f32 %v4004_v33 }
 0x376   : > { %4316 = vpow2.f32 %v4006_v18 }
 0x378   : > { %v2083_v21 = vpop.f32.mrf.mxu2  ;;  %v2097_v62 = vpop.f32.mrf.mxu3 }
 0x379   : > { %v2101_v7 = vadd.f32 %v2083_v21, %v583_v9  ;;  %v2141_v8 = vadd.f32 %v2097_v62, %v654_v35  ;;  %v2190_v62 = vadd.f32 %v5594_v55, %v2189_v57 }
 0x37b   : > { %v4315_v59 = vpop.eup %4314  ;;  %v4005_v54 = vmul.f32 -1.442695, %v2101_v7  ;;  %v4007_v39 = vmul.f32 -1.442695, %v2141_v8 }
 0x37c   : > { %v4317_v28 = vpop.eup %4316  ;;  %v2108_v46 = vadd.f32 1.0, %v4315_v59 }
 0x37d   : > { %v2148_v23 = vadd.f32 1.0, %v4317_v28  ;;  %4318 = vpow2.f32 %v4005_v54 }
 0x37e   : > { %4320 = vrcp.f32 %v2108_v46  ;;  %v2121_v12 = vand.u32 2147483648, %v2108_v46  ;;  %v2119_v42 = vand.u32 2147483647, %v2108_v46  ;;  %vm2115_vm8 = vweird.f32 %v2108_v46 }
 0x37f   : > { %4322 = vrcp.f32 %v2148_v23  ;;  %vm2155_vm12 = vweird.f32 %v2148_v23 }
 0x380   : > { %4324 = vpow2.f32 %v4007_v39  ;;  %v2122_v21 = vor.u32 1.1754944e-38, %v2121_v12  ;;  %vm2120_vm10 = vcmp.eq.f32.partialorder %v2119_v42, 8.507059e+37  ;;  %v6648_v39 = vld [vmem:[#allocation15_spill] sm:$0xff] }
 0x383   : > { %v4319_v45 = vpop.eup %4318 }
 0x384   : > { %v4321_v15 = vpop.eup %4320  ;;  %v2109_v27 = vadd.f32 1.0, %v4319_v45  ;;  %v723_v45 = vadd.f32 %v5586_v26, %v6648_v39 }
 0x385   : > { %v4323_v31 = vpop.eup %4322  ;;  %v2111_v58 = vmul.f32 %v4321_v15, %v2108_v46  ;;  %vm2116_vm7 = vweird.f32 %v4321_v15  ;;  %v2159_v46 = vand.u32 2147483647, %v2148_v23 }
 0x386   : > { %v4325_v11 = vpop.eup %4324  ;;  %v2151_v61 = vmul.f32 %v4323_v31, %v2148_v23  ;;  %4326 = vrcp.f32 %v2109_v27  ;;  %vm2117_vm9 = vmor %vm2115_vm8, %vm2116_vm7  ;;  %vm2156_vm11 = vweird.f32 %v4323_v31  ;;  %vm2130_vm15 = vweird.f32 %v2109_v27 }
 0x387   : > { %v2112_v53 = vsub.f32 1.0, %v2111_v58  ;;  %v5779_v5 = vadd.f32 1.0, %v4325_v11  ;;  %v2161_v11 = vand.u32 2147483648, %v2148_v23  ;;  %vm5786_vm13 = vmor %vm2155_vm12, %vm2156_vm11  ;;  %vm2160_vm1 = vcmp.eq.f32.partialorder %v2159_v46, 8.507059e+37 }
 0x388   : > { %v2152_v33 = vsub.f32 1.0, %v2151_v61 }
 0x389   : > { %v2113_v18 = vmul.f32 %v4321_v15, %v2112_v53  ;;  %4328 = vrcp.f32 %v5779_v5  ;;  %v2136_v53 = vand.u32 2147483648, %v2109_v27  ;;  %vm2170_vm5 = vweird.f32 %v5779_v5 }
 0x38a   : > { %v2153_v9 = vmul.f32 %v4323_v31, %v2152_v33 }
 0x38b   : > { %v2114_v38 = vadd.f32 %v4321_v15, %v2113_v18  ;;  %v2134_v18 = vand.u32 2147483647, %v2109_v27  ;;  %v2137_v23 = vor.u32 1.1754944e-38, %v2136_v53  ;;  %v5798_v53 = vpop.permute.xlu1 %2349 }
 0x38c   : > { %v4327_v35 = vpop.eup %4326  ;;  %v2154_v54 = vadd.f32 %v4323_v31, %v2153_v9  ;;  %v2191_v9 = vpop.f32.mrf.mxu0 }
 0x38d   : > { %v2118_v7 = vsel %vm2117_vm9, %v4321_v15, %v2114_v38  ;;  %v2126_v8 = vmul.f32 %v4327_v35, %v2109_v27  ;;  %vm2131_vm14 = vweird.f32 %v4327_v35  ;;  %vm2135_vm3 = vcmp.eq.f32.partialorder %v2134_v18, 8.507059e+37 }
 0x38e   : > { %v2123_v59 = vsel %vm2120_vm10, %v2122_v21, %v2118_v7  ;;  %v2158_v42 = vsel %vm5786_vm13, %v4323_v31, %v2154_v54  ;;  %v2162_v21 = vor.u32 1.1754944e-38, %v2161_v11  ;;  %vm2132_vm2 = vmor %vm2130_vm15, %vm2131_vm14  ;;  %v2176_v11 = vand.u32 2147483648, %v5779_v5 }
 0x38f   : > { %v4329_v28 = vpop.eup %4328  ;;  %v2194_v58 = vmul.f32 %v2190_v62, %v2123_v59  ;;  %v2127_v61 = vsub.f32 1.0, %v2126_v8  ;;  %v2192_v59 = vadd.f32 %v5594_v55, %v2191_v9  ;;  %v2174_v27 = vand.u32 2147483647, %v5779_v5 }
 0x390   : > { %v2166_v12 = vmul.f32 %v4329_v28, %v5779_v5  ;;  %v2163_v8 = vsel %vm2160_vm1, %v2162_v21, %v2158_v42  ;;  %vm2171_vm4 = vweird.f32 %v4329_v28  ;;  %v5802_v5 = vpop.permute.xlu0 %2359 }
 0x391   : > { %v2196_v33 = vadd.f32 %v2194_v58, %v723_v45  ;;  %v2128_v57 = vmul.f32 %v4327_v35, %v2127_v61  ;;  %v6651_v61 = vld [vmem:[#allocation19_spill] sm:$0xff]  ;;  %vm2172_vm6 = vmor %vm2170_vm5, %vm2171_vm4  ;;  %vm2175_vm7 = vcmp.eq.f32.partialorder %v2174_v27, 8.507059e+37 }
 0x392   : > { %v2167_v38 = vsub.f32 1.0, %v2166_v12  ;;  %v725_v31 = vadd.f32 %v5586_v26, %v6651_v61  ;;  %v2200_v12 = vsub.f32 1.0, %v2163_v8 }
 0x393   : > { %4330 = vtanh.f32 %v2196_v33  ;;  %v2129_v62 = vadd.f32 %v4327_v35, %v2128_v57  ;;  %v2204_v33 = vmul.f32 %v2163_v8, %v5634_v2  ;;  %v2177_v57 = vor.u32 1.1754944e-38, %v2176_v11 }
 0x394   : > { %v2168_v7 = vmul.f32 %v4329_v28, %v2167_v38 }
 0x395   : > { %v2133_v39 = vsel %vm2132_vm2, %v4327_v35, %v2129_v62  ;;  %v5804_v62 = vpop.permute.xlu1 %2363 }
 0x396   : > { %v2138_v45 = vsel %vm2135_vm3, %v2137_v23, %v2133_v39  ;;  %v2169_v58 = vadd.f32 %v4329_v28, %v2168_v7  ;;  %v2367_v8 = vmul.f32 %v5804_v62, %v5636_v51 }
 0x397   : > { %v2195_v54 = vmul.f32 %v2192_v59, %v2138_v45  ;;  %v5807_v59 = vpop.permute.xlu2 %2353 }
 0x398   : > { %v2173_v15 = vsel %vm2172_vm6, %v4329_v28, %v2169_v58  ;;  %v2366_v28 = vmul.f32 %v5802_v5, %v5634_v2 }
 0x399   : > { %v4331_v46 = vpop.eup %4330  ;;  %v2197_v55 = vadd.f32 %v2195_v54, %v725_v31  ;;  %v2178_v18 = vsel %vm2175_vm7, %v2177_v57, %v2173_v15  ;;  %v6654_v31 = vld [vmem:[#allocation24_spill] sm:$0xff] }
 0x39a   : > { %v2202_v35 = vmul.f32 %v4331_v46, %v2200_v12  ;;  %v2201_v42 = vsub.f32 1.0, %v2178_v18  ;;  %v2205_v21 = vmul.f32 %v2178_v18, %v5636_v51  ;;  %v799_v54 = vadd.f32 %v5689_v19, %v6654_v31  ;;  %v6655_v46 = vld [vmem:[#allocation71_spill] sm:$0xff] }
 0x39b   : > { %4332 = vtanh.f32 %v2197_v55  ;;  %v870_v55 = vadd.f32 %v5682_v47, %v6655_v46 }
 0x39c   : > { %v2206_v26 = vadd.f32 %v2204_v33, %v2202_v35 }
 0x39e   : > { %v2356_v23 = vmul.f32 %v5798_v53, %v2206_v26  ;;  %v6657_v26 = vld [vmem:[#allocation73_spill] sm:$0xff] }
 0x39f   : > { %v872_v18 = vadd.f32 %v5682_v47, %v6657_v26 }
 0x3a0   : > { %v5814_v45 = vadd.f32 %v2366_v28, %v2356_v23 }
 0x3a1   : > { %v4333_v9 = vpop.eup %4332 }
 0x3a2   : > { %v2203_v38 = vmul.f32 %v4333_v9, %v2201_v42  ;;  %6652 = vst [vmem:[#allocation77_spill] sm:$0xff] %v5814_v45 }
 0x3a4   : > { %v2207_v7 = vadd.f32 %v2205_v21, %v2203_v38 }
 0x3a6   : > { %v2357_v39 = vmul.f32 %v5807_v59, %v2207_v7 }
 0x3a8   : > { %v5816_v58 = vadd.f32 %v2367_v8, %v2357_v39 }
 0x3aa   : > { %6653 = vst [vmem:[#allocation36_spill] sm:$0xff] %v5816_v58  ;;  %v2400_v61 = vpack.c.bf16 %v5816_v58, %v5814_v45 }
 0x3ac   : > { %4016 = vmatmul.msk.bf16.vlgmr.msra.gmra.mxu0 %vm531_vm0, %v2400_v61  ;;  %4017 = vmatmul.msk.bf16.vlgmr.msra.gmra.mxu1 %vm531_vm0, %v2400_v61 }
 0x3ad   : > { %4022 = vmatmul.msk.bf16.vlgmr.msrb.gmra.mxu2 %vm531_vm0, %v2400_v61  ;;  %2818 = vmatpush.bf16.msra.mxu0 %v5646_v25 }
 0x3ae   : > { %2850 = vmatpush.bf16.msra.mxu1 %v5652_v3  ;;  %2864 = vmatpush.bf16.msrb.mxu2 %v5658_v10  ;;  %v6656_v3 = vld [vmem:[#allocation28_spill] sm:$0xff] }
 0x3af   : > { %v801_v10 = vadd.f32 %v5689_v19, %v6656_v3 }
 0x3b1   : > { %2819 = vmatpush.bf16.msra.mxu0 %v5664_v60 }
 0x3b2   : > { %2851 = vmatpush.bf16.msra.mxu1 %v5670_v4  ;;  %2865 = vmatpush.bf16.msrb.mxu2 %v5676_v44 }
 0x3cc   : > { %v2221_v11 = vpop.f32.mrf.mxu1 }
 0x3cd   : > { %v2240_v12 = vadd.f32 %v2221_v11, %v799_v54 }
 0x3cf   : > { %v4011_v27 = vmul.f32 -1.442695, %v2240_v12 }
 0x3d1   : > { %4334 = vpow2.f32 %v4011_v27 }
 0x3d2   : > { %v2235_v25 = vpop.f32.mrf.mxu2 }
 0x3d3   : > { %v2280_v35 = vadd.f32 %v2235_v25, %v870_v55  ;;  %v2329_v11 = vpop.f32.mrf.mxu3 }
 0x3d4   : > { %v2223_v60 = vpop.f32.mrf.mxu1 }
 0x3d5   : > { %v4013_v33 = vmul.f32 -1.442695, %v2280_v35  ;;  %v2241_v4 = vadd.f32 %v2223_v60, %v801_v10  ;;  %v2330_v60 = vadd.f32 %v5711_v56, %v2329_v11 }
 0x3d7   : > { %v4335_v15 = vpop.eup %4334  ;;  %4336 = vpow2.f32 %v4013_v33  ;;  %v4012_v44 = vmul.f32 -1.442695, %v2241_v4  ;;  %v6658_v33 = vld [vmem:[#allocation72_spill] sm:$0xff] }
 0x3d8   : > { %v2248_v57 = vadd.f32 1.0, %v4335_v15  ;;  %v941_v4 = vadd.f32 %v5717_v16, %v6658_v33  ;;  %v6659_v33 = vld [vmem:[#allocation74_spill] sm:$0xff] }
 0x3d9   : > { %4338 = vpow2.f32 %v4012_v44 }
 0x3da   : > { %4340 = vrcp.f32 %v2248_v57  ;;  %v2237_v42 = vpop.f32.mrf.mxu2  ;;  %v2261_v61 = vand.u32 2147483648, %v2248_v57  ;;  %v2259_v47 = vand.u32 2147483647, %v2248_v57  ;;  %vm2255_vm9 = vweird.f32 %v2248_v57 }
 0x3db   : > { %v2281_v9 = vadd.f32 %v2237_v42, %v872_v18 }
 0x3dc   : > { %v2262_v25 = vor.u32 1.1754944e-38, %v2261_v61  ;;  %vm2260_vm11 = vcmp.eq.f32.partialorder %v2259_v47, 8.507059e+37  ;;  %v2331_v47 = vpop.f32.mrf.mxu3 }
 0x3dd   : > { %v4337_v38 = vpop.eup %4336  ;;  %v4014_v21 = vmul.f32 -1.442695, %v2281_v9 }
 0x3de   : > { %v2288_v23 = vadd.f32 1.0, %v4337_v38 }
 0x3df   : > { %v4339_v7 = vpop.eup %4338  ;;  %4342 = vpow2.f32 %v4014_v21 }
 0x3e0   : > { %v4341_v19 = vpop.eup %4340  ;;  %4344 = vrcp.f32 %v2288_v23  ;;  %v2249_v8 = vadd.f32 1.0, %v4339_v7  ;;  %v2301_v18 = vand.u32 2147483648, %v2288_v23  ;;  %vm2295_vm13 = vweird.f32 %v2288_v23 }
 0x3e1   : > { %v2251_v28 = vmul.f32 %v4341_v19, %v2248_v57  ;;  %vm2256_vm8 = vweird.f32 %v4341_v19  ;;  %v2299_v57 = vand.u32 2147483647, %v2288_v23 }
 0x3e2   : > { %4346 = vrcp.f32 %v2249_v8  ;;  %vm2257_vm10 = vmor %vm2255_vm9, %vm2256_vm8  ;;  %v2276_v7 = vand.u32 2147483648, %v2249_v8  ;;  %v2302_v61 = vor.u32 1.1754944e-38, %v2301_v18  ;;  %vm2270_vm2 = vweird.f32 %v2249_v8 }
 0x3e3   : > { %v2252_v39 = vsub.f32 1.0, %v2251_v28  ;;  %vm2300_vm1 = vcmp.eq.f32.partialorder %v2299_v57, 8.507059e+37 }
 0x3e5   : > { %v4343_v31 = vpop.eup %4342  ;;  %v2253_v54 = vmul.f32 %v4341_v19, %v2252_v39  ;;  %v2274_v39 = vand.u32 2147483647, %v2249_v8 }
 0x3e6   : > { %v4345_v12 = vpop.eup %4344  ;;  %v5837_v27 = vadd.f32 1.0, %v4343_v31 }
 0x3e7   : > { %v2291_v46 = vmul.f32 %v4345_v12, %v2288_v23  ;;  %v2254_v55 = vadd.f32 %v4341_v19, %v2253_v54  ;;  %vm2296_vm12 = vweird.f32 %v4345_v12  ;;  %v2277_v23 = vor.u32 1.1754944e-38, %v2276_v7 }
 0x3e8   : > { %4348 = vrcp.f32 %v5837_v27  ;;  %v4347_v3 = vpop.eup %4346  ;;  %vm2297_vm14 = vmor %vm2295_vm13, %vm2296_vm12  ;;  %vm2275_vm4 = vcmp.eq.f32.partialorder %v2274_v39, 8.507059e+37  ;;  %vm2310_vm6 = vweird.f32 %v5837_v27 }
 0x3e9   : > { %v2292_v10 = vsub.f32 1.0, %v2291_v46  ;;  %v2258_v35 = vsel %vm2257_vm10, %v4341_v19, %v2254_v55  ;;  %v2266_v44 = vmul.f32 %v4347_v3, %v2249_v8  ;;  %vm2271_vm15 = vweird.f32 %v4347_v3  ;;  %v5848_v8 = vpop.permute.xlu2 %2371 }
 0x3ea   : > { %v2263_v15 = vsel %vm2260_vm11, %v2262_v25, %v2258_v35  ;;  %vm2272_vm3 = vmor %vm2270_vm2, %vm2271_vm15  ;;  %6660 = vst [vmem:[#allocation76_spill] sm:$0xff] %v5848_v8 }
 0x3eb   : > { %v2293_v26 = vmul.f32 %v4345_v12, %v2292_v10  ;;  %v2334_v42 = vmul.f32 %v2330_v60, %v2263_v15  ;;  %v2267_v9 = vsub.f32 1.0, %v2266_v44  ;;  %v2332_v10 = vadd.f32 %v5711_v56, %v2331_v47 }
 0x3ec   : > { %v2316_v44 = vand.u32 2147483648, %v5837_v27 }
 0x3ed   : > { %v2294_v38 = vadd.f32 %v4345_v12, %v2293_v26  ;;  %v2336_v21 = vadd.f32 %v2334_v42, %v941_v4  ;;  %v2268_v19 = vmul.f32 %v4347_v3, %v2267_v9 }
 0x3ee   : > { %v4349_v28 = vpop.eup %4348 }
 0x3ef   : > { %v2298_v31 = vsel %vm2297_vm14, %v4345_v12, %v2294_v38  ;;  %4350 = vtanh.f32 %v2336_v21  ;;  %v2306_v54 = vmul.f32 %v4349_v28, %v5837_v27  ;;  %v2269_v11 = vadd.f32 %v4347_v3, %v2268_v19 }
 0x3f0   : > { %v2303_v46 = vsel %vm2300_vm1, %v2302_v61, %v2298_v31  ;;  %vm2311_vm5 = vweird.f32 %v4349_v28  ;;  %v943_v12 = vadd.f32 %v5717_v16, %v6659_v33  ;;  %v2317_v16 = vor.u32 1.1754944e-38, %v2316_v44  ;;  %v5890_v33 = vld [vmem:[%s6486_s4 + $0x18] sm:$0xff]  ;;  %v5914_v44 = vld [vmem:[%s6488_s6] ss:$0 sm:$0xff] }
 0x3f1   : > { %v2307_v55 = vsub.f32 1.0, %v2306_v54  ;;  %v2273_v25 = vsel %vm2272_vm3, %v4347_v3, %v2269_v11  ;;  %v2340_v4 = vsub.f32 1.0, %v2303_v46  ;;  %v2314_v3 = vand.u32 2147483647, %v5837_v27  ;;  %vm2312_vm7 = vmor %vm2310_vm6, %vm2311_vm5  ;;  %v5853_v39 = vpop.permute.xlu2 %2381  ;;  %v5856_v54 = vpop.permute.xlu0 %2385 }
 0x3f2   : > { %v2278_v60 = vsel %vm2275_vm4, %v2277_v23, %v2273_v25  ;;  %v2344_v56 = vmul.f32 %v2303_v46, %v5756_v37  ;;  %v5858_v27 = vpop.permute.xlu1 %2375  ;;  %v2389_v46 = vmul.f32 %v5856_v54, %v5758_v41 }
 0x3f3   : > { %v2308_v35 = vmul.f32 %v4349_v28, %v2307_v55  ;;  %v2335_v15 = vmul.f32 %v2332_v10, %v2278_v60  ;;  %vm2315_vm8 = vcmp.eq.f32.partialorder %v2314_v3, 8.507059e+37  ;;  %6661 = vst [vmem:[#allocation78_spill] sm:$0xff] %v5858_v27  ;;  %v5884_v60 = vld [vmem:[%s6486_s4 + $0x8] sm:$0xff]  ;;  %v5921_v3 = vld [vmem:[%s6488_s6 + $0x1] ss:$0 sm:$0xff] }
 0x3f5   : > { %v4351_v26 = vpop.eup %4350  ;;  %v2309_v18 = vadd.f32 %v4349_v28, %v2308_v35  ;;  %v2337_v57 = vadd.f32 %v2335_v15, %v943_v12  ;;  %v5878_v35 = vld [vmem:[%s6487_s5 + $0x28] sm:$0xff]  ;;  %v5896_v12 = vld [vmem:[%s6487_s5 + $0x20] sm:$0xff]  ;;  %v5908_v15 = vld [vmem:[%s6486_s4 + $0x10] sm:$0xff] }
 0x3f6   : > { %v2342_v42 = vmul.f32 %v4351_v26, %v2340_v4  ;;  %v5902_v4 = vld [vmem:[%s6486_s4] sm:$0xff]  ;;  %v6662_v26 = vld [vmem:[#allocation21_spill] sm:$0xff] }
 0x3f7   : > { %v2313_v9 = vsel %vm2312_vm7, %v4349_v28, %v2309_v18  ;;  %4352 = vtanh.f32 %v2337_v57  ;;  %v2388_v28 = vmul.f32 %v5853_v39, %v5756_v37  ;;  %v586_v18 = vadd.f32 %v5914_v44, %v6662_v26 }
 0x3f8   : > { %v2346_v38 = vadd.f32 %v2344_v56, %v2342_v42  ;;  %v2318_v21 = vsel %vm2315_vm8, %v2317_v16, %v2313_v9  ;;  %v6663_v42 = vld [vmem:[#allocation22_spill] sm:$0xff] }
 0x3f9   : > { %v2341_v7 = vsub.f32 1.0, %v2318_v21  ;;  %v2345_v31 = vmul.f32 %v2318_v21, %v5758_v41  ;;  %v657_v56 = vadd.f32 %v5921_v3, %v6663_v42 }
 0x3fa   : > { %v2378_v47 = vmul.f32 %v5848_v8, %v2346_v38 }
 0x3fc   : > { %v5866_v23 = vadd.f32 %v2388_v28, %v2378_v47 }
 0x3fd   : > { %v4353_v19 = vpop.eup %4352 }
 0x3fe   : > { %v2343_v61 = vmul.f32 %v4353_v19, %v2341_v7  ;;  %v6664_v19 = vld [vmem:[#allocation25_spill] sm:$0xff] }
 0x400   : > { %v2347_v11 = vadd.f32 %v2345_v31, %v2343_v61  ;;  %v588_v61 = vadd.f32 %v5914_v44, %v6664_v19  ;;  %v6665_v31 = vld [vmem:[#allocation26_spill] sm:$0xff] }
 0x401   : > { %v659_v47 = vadd.f32 %v5921_v3, %v6665_v31 }
 0x402   : > { %v2379_v55 = vmul.f32 %v5858_v27, %v2347_v11 }
 0x404   : > { %v5868_v25 = vadd.f32 %v2389_v46, %v2379_v55 }
 0x406   : > { %v2540_v10 = vpack.c.bf16 %v5868_v25, %v5866_v23 }
 0x408   : > { %4023 = vmatmul.msk.bf16.vlgmr.msrb.gmra.mxu3 %vm531_vm0, %v2540_v10  ;;  %4024 = vmatmul.msk.bf16.vlgmr.msrb.gmra.mxu0 %vm531_vm0, %v2540_v10 }
 0x409   : > { %4029 = vmatmul.msk.bf16.vlgmr.msrb.gmra.mxu1 %vm531_vm0, %v2540_v10  ;;  %2958 = vmatpush.bf16.msrb.mxu3 %v5878_v35 }
 0x40a   : > { %3010 = vmatpush.bf16.msrb.mxu0 %v5884_v60  ;;  %3024 = vmatpush.bf16.msrb.mxu1 %v5890_v33 }
 0x40d   : > { %2959 = vmatpush.bf16.msrb.mxu3 %v5896_v12 }
 0x40e   : > { %3011 = vmatpush.bf16.msrb.mxu0 %v5902_v4  ;;  %3025 = vmatpush.bf16.msrb.mxu1 %v5908_v15 }
 0x429   : > { %v2413_v57 = vpop.f32.mrf.mxu0  ;;  %v2427_v9 = vpop.f32.mrf.mxu1 }
 0x42a   : > { %v2432_v38 = vadd.f32 %v2413_v57, %v586_v18  ;;  %v2472_v16 = vadd.f32 %v2427_v9, %v657_v56 }
 0x42c   : > { %v4018_v21 = vmul.f32 -1.442695, %v2432_v38  ;;  %v4020_v7 = vmul.f32 -1.442695, %v2472_v16 }
 0x42e   : > { %4354 = vpow2.f32 %v4018_v21 }
 0x42f   : > { %4356 = vpow2.f32 %v4020_v7 }
 0x431   : > { %v2415_v11 = vpop.f32.mrf.mxu0  ;;  %v2429_v28 = vpop.f32.mrf.mxu1 }
 0x432   : > { %v2433_v46 = vadd.f32 %v2415_v11, %v588_v61  ;;  %v2473_v55 = vadd.f32 %v2429_v28, %v659_v47  ;;  %v2521_v28 = vpop.f32.mrf.mxu2 }
 0x434   : > { %v4355_v10 = vpop.eup %4354  ;;  %v4019_v26 = vmul.f32 -1.442695, %v2433_v46  ;;  %v4021_v18 = vmul.f32 -1.442695, %v2473_v55 }
 0x435   : > { %v4357_v42 = vpop.eup %4356  ;;  %v2440_v2 = vadd.f32 1.0, %v4355_v10 }
 0x436   : > { %v2480_v56 = vadd.f32 1.0, %v4357_v42  ;;  %4358 = vpow2.f32 %v4019_v26 }
 0x437   : > { %4360 = vrcp.f32 %v2440_v2  ;;  %v2453_v11 = vand.u32 2147483648, %v2440_v2  ;;  %v2451_v55 = vand.u32 2147483647, %v2440_v2  ;;  %vm2447_vm10 = vweird.f32 %v2440_v2 }
 0x438   : > { %4362 = vrcp.f32 %v2480_v56  ;;  %vm2487_vm14 = vweird.f32 %v2480_v56 }
 0x439   : > { %4364 = vpow2.f32 %v4021_v18  ;;  %v2454_v18 = vor.u32 1.1754944e-38, %v2453_v11  ;;  %vm2452_vm12 = vcmp.eq.f32.partialorder %v2451_v55, 8.507059e+37  ;;  %v2493_v11 = vand.u32 2147483648, %v2480_v56 }
 0x43a   : > { %v2523_v52 = vpop.f32.mrf.mxu2 }
 0x43c   : > { %v4359_v57 = vpop.eup %4358 }
 0x43d   : > { %v4361_v9 = vpop.eup %4360  ;;  %v2441_v38 = vadd.f32 1.0, %v4359_v57 }
 0x43e   : > { %v4363_v16 = vpop.eup %4362  ;;  %v2443_v21 = vmul.f32 %v4361_v9, %v2440_v2  ;;  %vm2448_vm9 = vweird.f32 %v4361_v9  ;;  %v5941_v2 = vld [vmem:[%s6488_s6 + $0x2] ss:$0 sm:$0xff] }
 0x43f   : > { %v4365_v7 = vpop.eup %4364  ;;  %v2483_v19 = vmul.f32 %v4363_v16, %v2480_v56  ;;  %4366 = vrcp.f32 %v2441_v38  ;;  %vm2449_vm11 = vmor %vm2447_vm10, %vm2448_vm9  ;;  %vm2488_vm13 = vweird.f32 %v4363_v16  ;;  %v2468_v22 = vand.u32 2147483648, %v2441_v38 }
 0x440   : > { %v2444_v61 = vsub.f32 1.0, %v2443_v21  ;;  %v5929_v31 = vadd.f32 1.0, %v4365_v7  ;;  %v5935_v21 = vld [vmem:[%s6489_s7] ss:$0 sm:$0xff]  ;;  %vm5946_vm15 = vmor %vm2487_vm14, %vm2488_vm13  ;;  %v2466_v48 = vand.u32 2147483647, %v2441_v38  ;;  %vm2462_vm2 = vweird.f32 %v2441_v38 }
 0x441   : > { %v2484_v47 = vsub.f32 1.0, %v2483_v19  ;;  %v2522_v7 = vadd.f32 %v5935_v21, %v2521_v28 }
 0x442   : > { %v2445_v46 = vmul.f32 %v4361_v9, %v2444_v61  ;;  %4368 = vrcp.f32 %v5929_v31  ;;  %vm2467_vm5 = vcmp.eq.f32.partialorder %v2466_v48, 8.507059e+37  ;;  %vm2502_vm7 = vweird.f32 %v5929_v31 }
 0x443   : > { %v2485_v10 = vmul.f32 %v4363_v16, %v2484_v47  ;;  %v6666_v47 = vld [vmem:[#allocation23_spill] sm:$0xff] }
 0x444   : > { %v2446_v26 = vadd.f32 %v4361_v9, %v2445_v46 }
 0x445   : > { %v4367_v42 = vpop.eup %4366  ;;  %v2486_v61 = vadd.f32 %v4363_v16, %v2485_v10  ;;  %v6669_v10 = vld [vmem:[#allocation27_spill] sm:$0xff] }
 0x446   : > { %v2450_v57 = vsel %vm2449_vm11, %v4361_v9, %v2446_v26  ;;  %v2458_v19 = vmul.f32 %v4367_v42, %v2441_v38  ;;  %v728_v9 = vadd.f32 %v5941_v2, %v6666_v47  ;;  %v2491_v26 = vand.u32 2147483647, %v2480_v56 }
 0x447   : > { %v2455_v51 = vsel %vm2452_vm12, %v2454_v18, %v2450_v57  ;;  %vm2463_vm1 = vweird.f32 %v4367_v42  ;;  %v2490_v37 = vsel %vm5946_vm15, %v4363_v16, %v2486_v61  ;;  %v730_v16 = vadd.f32 %v5941_v2, %v6669_v10  ;;  %v5990_v10 = vld [vmem:[%s6487_s5 + $0x18] sm:$0xff] }
 0x448   : > { %v4369_v41 = vpop.eup %4368  ;;  %v2526_v46 = vmul.f32 %v2522_v7, %v2455_v51  ;;  %v2459_v55 = vsub.f32 1.0, %v2458_v19  ;;  %v2494_v51 = vor.u32 1.1754944e-38, %v2493_v11  ;;  %vm2492_vm3 = vcmp.eq.f32.partialorder %v2491_v26, 8.507059e+37  ;;  %vm2464_vm4 = vmor %vm2462_vm2, %vm2463_vm1 }
 0x449   : > { %v2498_v28 = vmul.f32 %v4369_v41, %v5929_v31  ;;  %v2469_v19 = vor.u32 1.1754944e-38, %v2468_v22  ;;  %vm2503_vm6 = vweird.f32 %v4369_v41  ;;  %v2508_v61 = vand.u32 2147483648, %v5929_v31 }
 0x44a   : > { %v2528_v18 = vadd.f32 %v2526_v46, %v728_v9  ;;  %v2460_v57 = vmul.f32 %v4367_v42, %v2459_v55  ;;  %v2495_v1 = vsel %vm2492_vm3, %v2494_v51, %v2490_v37  ;;  %v2524_v9 = vadd.f32 %v5935_v21, %v2523_v52  ;;  %vm2504_vm8 = vmor %vm2502_vm7, %vm2503_vm6 }
 0x44b   : > { %v2499_v47 = vsub.f32 1.0, %v2498_v28  ;;  %v2532_v28 = vsub.f32 1.0, %v2495_v1  ;;  %v2506_v38 = vand.u32 2147483647, %v5929_v31  ;;  %v2536_v52 = vmul.f32 %v2495_v1, %v5814_v45 }
 0x44c   : > { %4370 = vtanh.f32 %v2528_v18  ;;  %v2461_v7 = vadd.f32 %v4367_v42, %v2460_v57  ;;  %v2509_v26 = vor.u32 1.1754944e-38, %v2508_v61  ;;  %v2683_v1 = vmul.f32 %v5856_v54, %v5816_v58  ;;  %v5984_v54 = vld [vmem:[%s6487_s5 + $0x8] sm:$0xff]  ;;  %v6002_v61 = vld [vmem:[%s6487_s5] sm:$0xff] }
 0x44d   : > { %v2500_v56 = vmul.f32 %v4369_v41, %v2499_v47  ;;  %vm2507_vm9 = vcmp.eq.f32.partialorder %v2506_v38, 8.507059e+37  ;;  %v6670_v38 = vld [vmem:[#allocation62_spill] sm:$0xff] }
 0x44e   : > { %v2465_v6 = vsel %vm2464_vm4, %v4367_v42, %v2461_v7 }
 0x44f   : > { %v2501_v46 = vadd.f32 %v4369_v41, %v2500_v56  ;;  %v2470_v55 = vsel %vm2467_vm5, %v2469_v19, %v2465_v6  ;;  %v2682_v19 = vmul.f32 %v5853_v39, %v5814_v45  ;;  %v5978_v39 = vld [vmem:[%s6486_s4 + $0x28] sm:$0xff] }
 0x450   : > { %v2527_v11 = vmul.f32 %v2524_v9, %v2470_v55 }
 0x451   : > { %v2505_v42 = vsel %vm2504_vm8, %v4369_v41, %v2501_v46 }
 0x452   : > { %v4371_v22 = vpop.eup %4370  ;;  %v2529_v37 = vadd.f32 %v2527_v11, %v730_v16  ;;  %v2510_v18 = vsel %vm2507_vm9, %v2509_v26, %v2505_v42  ;;  %v5996_v16 = vld [vmem:[%s6486_s4 + $0x20] sm:$0xff]  ;;  %v6008_v11 = vld [vmem:[%s6487_s5 + $0x10] sm:$0xff] }
 0x453   : > { %v2534_v48 = vmul.f32 %v4371_v22, %v2532_v28  ;;  %v2533_v57 = vsub.f32 1.0, %v2510_v18  ;;  %v2537_v7 = vmul.f32 %v2510_v18, %v5816_v58  ;;  %v6014_v28 = vld [vmem:[%s6488_s6 + $0x4] ss:$0 sm:$0xff]  ;;  %v6021_v42 = vld [vmem:[%s6488_s6 + $0x3] ss:$0 sm:$0xff]  ;;  %v6671_v26 = vld [vmem:[#allocation16_spill] sm:$0xff] }
 0x454   : > { %4372 = vtanh.f32 %v2529_v37  ;;  %v865_v22 = vadd.f32 %v6014_v28, %v6670_v38 }
 0x455   : > { %v2538_v6 = vadd.f32 %v2536_v52, %v2534_v48 }
 0x457   : > { %v2680_v56 = vmul.f32 %v2538_v6, %v5848_v8  ;;  %v794_v6 = vadd.f32 %v6021_v42, %v6671_v26 }
 0x459   : > { %v5966_v41 = vadd.f32 %v2682_v19, %v2680_v56 }
 0x45a   : > { %v4373_v47 = vpop.eup %4372 }
 0x45b   : > { %v2535_v51 = vmul.f32 %v4373_v47, %v2533_v57  ;;  %v6672_v57 = vld [vmem:[#allocation65_spill] sm:$0xff] }
 0x45c   : > { %v867_v47 = vadd.f32 %v6014_v28, %v6672_v57 }
 0x45d   : > { %v2539_v31 = vadd.f32 %v2537_v7, %v2535_v51 }
 0x45f   : > { %v2681_v9 = vmul.f32 %v2539_v31, %v5858_v27 }
 0x461   : > { %v5968_v46 = vadd.f32 %v2683_v1, %v2681_v9 }
 0x463   : > { %v2700_v55 = vpack.c.bf16 %v5968_v46, %v5966_v41 }
 0x465   : > { %4030 = vmatmul.msk.bf16.vlgmr.msra.gmra.mxu2 %vm531_vm0, %v2700_v55  ;;  %4031 = vmatmul.msk.bf16.vlgmr.msra.gmra.mxu3 %vm531_vm0, %v2700_v55 }
 0x466   : > { %4036 = vmatmul.msk.bf16.vlgmr.msra.gmra.mxu0 %vm531_vm0, %v2700_v55  ;;  %3118 = vmatpush.bf16.msra.mxu2 %v5978_v39  ;;  %v6673_v55 = vld [vmem:[#allocation20_spill] sm:$0xff] }
 0x467   : > { %3150 = vmatpush.bf16.msra.mxu3 %v5984_v54  ;;  %3164 = vmatpush.bf16.msra.mxu0 %v5990_v10  ;;  %v796_v38 = vadd.f32 %v6021_v42, %v6673_v55 }
 0x46a   : > { %3119 = vmatpush.bf16.msra.mxu2 %v5996_v16 }
 0x46b   : > { %3151 = vmatpush.bf16.msra.mxu3 %v6002_v61  ;;  %3165 = vmatpush.bf16.msra.mxu0 %v6008_v11 }
 0x485   : > { %v2567_v37 = vpop.f32.mrf.mxu0 }
 0x486   : > { %v2612_v48 = vadd.f32 %v2567_v37, %v865_v22 }
 0x488   : > { %v4027_v52 = vmul.f32 -1.442695, %v2612_v48 }
 0x48a   : > { %4374 = vpow2.f32 %v4027_v52 }
 0x48b   : > { %v2553_v18 = vpop.f32.mrf.mxu3 }
 0x48c   : > { %v2572_v51 = vadd.f32 %v2553_v18, %v794_v6 }
 0x48d   : > { %v2569_v7 = vpop.f32.mrf.mxu0 }
 0x48e   : > { %v4025_v56 = vmul.f32 -1.442695, %v2572_v51  ;;  %v2613_v31 = vadd.f32 %v2569_v7, %v867_v47 }
 0x490   : > { %v4375_v19 = vpop.eup %4374  ;;  %4376 = vpow2.f32 %v4025_v56  ;;  %v4028_v9 = vmul.f32 -1.442695, %v2613_v31 }
 0x491   : > { %v6027_v1 = vadd.f32 1.0, %v4375_v19 }
 0x492   : > { %4378 = vpow2.f32 %v4028_v9 }
 0x493   : > { %v2555_v22 = vpop.f32.mrf.mxu3  ;;  %4380 = vrcp.f32 %v6027_v1  ;;  %v2633_v32 = vand.u32 2147483648, %v6027_v1  ;;  %vm2627_vm15 = vweird.f32 %v6027_v1 }
 0x494   : > { %v2573_v37 = vadd.f32 %v2555_v22, %v796_v38  ;;  %v2661_v38 = vpop.f32.mrf.mxu1 }
 0x496   : > { %v4377_v48 = vpop.eup %4376  ;;  %v4026_v52 = vmul.f32 -1.442695, %v2573_v37 }
 0x497   : > { %v2580_v26 = vadd.f32 1.0, %v4377_v48 }
 0x498   : > { %v4379_v6 = vpop.eup %4378  ;;  %4382 = vpow2.f32 %v4026_v52 }
 0x499   : > { %4384 = vrcp.f32 %v2580_v26  ;;  %v4381_v18 = vpop.eup %4380  ;;  %v6032_v57 = vadd.f32 1.0, %v4379_v6  ;;  %v2593_v22 = vand.u32 2147483648, %v2580_v26  ;;  %v2591_v48 = vand.u32 2147483647, %v2580_v26 }
 0x49a   : > { %v2623_v47 = vmul.f32 %v4381_v18, %v6027_v1  ;;  %vm2587_vm11 = vweird.f32 %v2580_v26  ;;  %vm2628_vm14 = vweird.f32 %v4381_v18 }
 0x49b   : > { %4386 = vrcp.f32 %v6032_v57  ;;  %vm2592_vm13 = vcmp.eq.f32.partialorder %v2591_v48, 8.507059e+37  ;;  %vm6056_vm1 = vmor %vm2627_vm15, %vm2628_vm14  ;;  %vm2642_vm8 = vweird.f32 %v6032_v57 }
 0x49c   : > { %v2624_v19 = vsub.f32 1.0, %v2623_v47  ;;  %v6043_v47 = vld [vmem:[%s6489_s7 + $0x1] ss:$0 sm:$0xff] }
 0x49e   : > { %v4383_v51 = vpop.eup %4382  ;;  %v2625_v52 = vmul.f32 %v4381_v18, %v2624_v19 }
 0x49f   : > { %v4385_v7 = vpop.eup %4384  ;;  %v2581_v56 = vadd.f32 1.0, %v4383_v51  ;;  %v2594_v51 = vor.u32 1.1754944e-38, %v2593_v22  ;;  %v6674_v22 = vld [vmem:[#allocation63_spill] sm:$0xff] }
 0x4a0   : > { %v2583_v31 = vmul.f32 %v4385_v7, %v2580_v26  ;;  %vm2588_vm10 = vweird.f32 %v4385_v7  ;;  %v2626_v8 = vadd.f32 %v4381_v18, %v2625_v52  ;;  %v6049_v26 = vld [vmem:[%s6488_s6 + $0x5] ss:$0 sm:$0xff] }
 0x4a1   : > { %4388 = vrcp.f32 %v2581_v56  ;;  %v6036_v9 = vpop.eup %4386  ;;  %vm2589_vm12 = vmor %vm2587_vm11, %vm2588_vm10  ;;  %v2606_v52 = vand.u32 2147483647, %v2581_v56  ;;  %vm2602_vm3 = vweird.f32 %v2581_v56 }
 0x4a2   : > { %v2584_v55 = vsub.f32 1.0, %v2583_v31  ;;  %v2638_v6 = vmul.f32 %v6036_v9, %v6032_v57  ;;  %v2662_v31 = vadd.f32 %v6043_v47, %v2661_v38  ;;  %vm2643_vm7 = vweird.f32 %v6036_v9 }
 0x4a3   : > { %vm2607_vm6 = vcmp.eq.f32.partialorder %v2606_v52, 8.507059e+37  ;;  %vm2644_vm9 = vmor %vm2642_vm8, %vm2643_vm7 }
 0x4a4   : > { %v2585_v37 = vmul.f32 %v4385_v7, %v2584_v55  ;;  %v2639_v36 = vsub.f32 1.0, %v2638_v6  ;;  %v2630_v6 = vsel %vm6056_vm1, %v4381_v18, %v2626_v8  ;;  %v6677_v18 = vld [vmem:[#allocation67_spill] sm:$0xff] }
 0x4a6   : > { %v2586_v45 = vadd.f32 %v4385_v7, %v2585_v37  ;;  %v936_v37 = vadd.f32 %v6049_v26, %v6674_v22 }
 0x4a7   : > { %v4389_v58 = vpop.eup %4388 }
 0x4a8   : > { %v2590_v27 = vsel %vm2589_vm12, %v4385_v7, %v2586_v45  ;;  %v2598_v55 = vmul.f32 %v4389_v58, %v2581_v56  ;;  %v2631_v45 = vand.u32 2147483647, %v6027_v1  ;;  %v2608_v7 = vand.u32 2147483648, %v2581_v56 }
 0x4a9   : > { %v2595_v19 = vsel %vm2592_vm13, %v2594_v51, %v2590_v27  ;;  %vm2603_vm2 = vweird.f32 %v4389_v58  ;;  %v2640_v51 = vmul.f32 %v6036_v9, %v2639_v36  ;;  %v938_v36 = vadd.f32 %v6049_v26, %v6677_v18 }
 0x4aa   : > { %v2666_v50 = vmul.f32 %v2662_v31, %v2595_v19  ;;  %v2599_v30 = vsub.f32 1.0, %v2598_v55  ;;  %v2663_v31 = vpop.f32.mrf.mxu1  ;;  %v2634_v55 = vor.u32 1.1754944e-38, %v2633_v32  ;;  %vm2632_vm4 = vcmp.eq.f32.partialorder %v2631_v45, 8.507059e+37  ;;  %vm2604_vm5 = vmor %vm2602_vm3, %vm2603_vm2 }
 0x4ab   : > { %v2609_v1 = vor.u32 1.1754944e-38, %v2608_v7  ;;  %v2664_v29 = vadd.f32 %v6043_v47, %v2663_v31  ;;  %v2648_v32 = vand.u32 2147483648, %v6032_v57  ;;  %v2646_v45 = vand.u32 2147483647, %v6032_v57 }
 0x4ac   : > { %v2668_v38 = vadd.f32 %v2666_v50, %v936_v37  ;;  %v2600_v48 = vmul.f32 %v4389_v58, %v2599_v30  ;;  %v2635_v22 = vsel %vm2632_vm4, %v2634_v55, %v2630_v6  ;;  %v2641_v30 = vadd.f32 %v6036_v9, %v2640_v51 }
 0x4ad   : > { %v2672_v56 = vsub.f32 1.0, %v2635_v22  ;;  %v2676_v27 = vmul.f32 %v2635_v22, %v5866_v23  ;;  %v2649_v52 = vor.u32 1.1754944e-38, %v2648_v32  ;;  %vm2647_vm10 = vcmp.eq.f32.partialorder %v2646_v45, 8.507059e+37 }
 0x4ae   : > { %4390 = vtanh.f32 %v2668_v38  ;;  %v2601_v19 = vadd.f32 %v4389_v58, %v2600_v48  ;;  %v2645_v48 = vsel %vm2644_vm9, %v6036_v9, %v2641_v30  ;;  %v2689_v22 = vmul.f32 %v5868_v25, %v5804_v62 }
 0x4af   : > { %v2650_v51 = vsel %vm2647_vm10, %v2649_v52, %v2645_v48 }
 0x4b0   : > { %v2605_v50 = vsel %vm2604_vm5, %v4389_v58, %v2601_v19  ;;  %v2673_v31 = vsub.f32 1.0, %v2650_v51  ;;  %v2677_v55 = vmul.f32 %v2650_v51, %v5868_v25 }
 0x4b1   : > { %v2610_v8 = vsel %vm2607_vm6, %v2609_v1, %v2605_v50  ;;  %v2688_v50 = vmul.f32 %v5866_v23, %v5802_v5  ;;  %v6678_v5 = vld [vmem:[#allocation29_spill] sm:$0xff] }
 0x4b2   : > { %v2667_v37 = vmul.f32 %v2664_v29, %v2610_v8  ;;  %v591_v62 = vadd.f32 %v5914_v44, %v6678_v5 }
 0x4b4   : > { %v4391_v7 = vpop.eup %4390  ;;  %v2669_v58 = vadd.f32 %v2667_v37, %v938_v36  ;;  %v6679_v36 = vld [vmem:[#allocation30_spill] sm:$0xff] }
 0x4b5   : > { %v2674_v38 = vmul.f32 %v4391_v7, %v2672_v56  ;;  %v662_v32 = vadd.f32 %v5921_v3, %v6679_v36 }
 0x4b6   : > { %4392 = vtanh.f32 %v2669_v58 }
 0x4b7   : > { %v2678_v6 = vadd.f32 %v2676_v27, %v2674_v38 }
 0x4b9   : > { %v2686_v57 = vmul.f32 %v2678_v6, %v5798_v53 }
 0x4bb   : > { %v6080_v30 = vadd.f32 %v2688_v50, %v2686_v57 }
 0x4bc   : > { %v4393_v29 = vpop.eup %4392 }
 0x4bd   : > { %v2675_v19 = vmul.f32 %v4393_v29, %v2673_v31 }
 0x4bf   : > { %v2679_v1 = vadd.f32 %v2677_v55, %v2675_v19 }
 0x4c1   : > { %v2687_v9 = vmul.f32 %v2679_v1, %v5807_v59 }
 0x4c3   : > { %v6082_v8 = vadd.f32 %v2689_v22, %v2687_v9 }
 0x4c5   : > { %v2840_v18 = vpack.c.bf16 %v6082_v8, %v6080_v30 }
 0x4c7   : > { %4037 = vmatmul.msk.bf16.vlgmr.msra.gmra.mxu1 %vm531_vm0, %v2840_v18  ;;  %4038 = vmatmul.msk.bf16.vlgmr.msrb.gmra.mxu2 %vm531_vm0, %v2840_v18 }
 0x4c8   : > { %4043 = vmatmul.msk.bf16.vlgmr.msrb.gmra.mxu3 %vm531_vm0, %v2840_v18  ;;  %3258 = vmatpush.bf16.msra.mxu1 %v5878_v35 }
 0x4c9   : > { %3310 = vmatpush.bf16.msrb.mxu2 %v5884_v60  ;;  %3324 = vmatpush.bf16.msrb.mxu3 %v5890_v33  ;;  %v6680_v33 = vld [vmem:[#allocation33_spill] sm:$0xff] }
 0x4ca   : > { %v593_v27 = vadd.f32 %v5914_v44, %v6680_v33 }
 0x4cc   : > { %3259 = vmatpush.bf16.msra.mxu1 %v5896_v12 }
 0x4cd   : > { %3311 = vmatpush.bf16.msrb.mxu2 %v5902_v4  ;;  %3325 = vmatpush.bf16.msrb.mxu3 %v5908_v15  ;;  %v6681_v4 = vld [vmem:[#allocation34_spill] sm:$0xff] }
 0x4ce   : > { %v664_v15 = vadd.f32 %v5921_v3, %v6681_v4 }
 0x4e8   : > { %v2713_v37 = vpop.f32.mrf.mxu2  ;;  %v2727_v56 = vpop.f32.mrf.mxu3 }
 0x4e9   : > { %v2732_v45 = vadd.f32 %v2713_v37, %v591_v62  ;;  %v2772_v7 = vadd.f32 %v2727_v56, %v662_v32  ;;  %v2821_v37 = vpop.f32.mrf.mxu0 }
 0x4eb   : > { %v4032_v58 = vmul.f32 -1.442695, %v2732_v45  ;;  %v4034_v60 = vmul.f32 -1.442695, %v2772_v7 }
 0x4ed   : > { %4394 = vpow2.f32 %v4032_v58 }
 0x4ee   : > { %4396 = vpow2.f32 %v4034_v60 }
 0x4f0   : > { %v2715_v38 = vpop.f32.mrf.mxu2  ;;  %v2729_v48 = vpop.f32.mrf.mxu3 }
 0x4f1   : > { %v2733_v52 = vadd.f32 %v2715_v38, %v593_v27  ;;  %v2773_v6 = vadd.f32 %v2729_v48, %v664_v15  ;;  %v2822_v15 = vadd.f32 %v5935_v21, %v2821_v37 }
 0x4f3   : > { %v4395_v51 = vpop.eup %4394  ;;  %v4033_v31 = vmul.f32 -1.442695, %v2733_v52  ;;  %v4035_v19 = vmul.f32 -1.442695, %v2773_v6 }
 0x4f4   : > { %v4397_v29 = vpop.eup %4396  ;;  %v2740_v55 = vadd.f32 1.0, %v4395_v51 }
 0x4f5   : > { %v2780_v1 = vadd.f32 1.0, %v4397_v29  ;;  %4398 = vpow2.f32 %v4033_v31  ;;  %v6682_v31 = vld [vmem:[#allocation31_spill] sm:$0xff] }
 0x4f6   : > { %4400 = vrcp.f32 %v2740_v55  ;;  %v2753_v56 = vand.u32 2147483648, %v2740_v55  ;;  %v2751_v58 = vand.u32 2147483647, %v2740_v55  ;;  %vm2747_vm12 = vweird.f32 %v2740_v55 }
 0x4f7   : > { %4402 = vrcp.f32 %v2780_v1  ;;  %v733_v29 = vadd.f32 %v5941_v2, %v6682_v31  ;;  %vm2787_vm1 = vweird.f32 %v2780_v1 }
 0x4f8   : > { %4404 = vpow2.f32 %v4035_v19  ;;  %v2754_v4 = vor.u32 1.1754944e-38, %v2753_v56  ;;  %vm2752_vm14 = vcmp.eq.f32.partialorder %v2751_v58, 8.507059e+37 }
 0x4fb   : > { %v4399_v57 = vpop.eup %4398 }
 0x4fc   : > { %v4401_v50 = vpop.eup %4400  ;;  %v2741_v22 = vadd.f32 1.0, %v4399_v57  ;;  %v2793_v57 = vand.u32 2147483648, %v2780_v1 }
 0x4fd   : > { %v4403_v9 = vpop.eup %4402  ;;  %v2743_v18 = vmul.f32 %v4401_v50, %v2740_v55  ;;  %vm2748_vm11 = vweird.f32 %v4401_v50  ;;  %v2791_v55 = vand.u32 2147483647, %v2780_v1 }
 0x4fe   : > { %v4405_v5 = vpop.eup %4404  ;;  %v2783_v62 = vmul.f32 %v4403_v9, %v2780_v1  ;;  %4406 = vrcp.f32 %v2741_v22  ;;  %vm2749_vm13 = vmor %vm2747_vm12, %vm2748_vm11  ;;  %vm2788_vm15 = vweird.f32 %v4403_v9  ;;  %v2766_v56 = vand.u32 2147483647, %v2741_v22 }
 0x4ff   : > { %v2744_v36 = vsub.f32 1.0, %v2743_v18  ;;  %v6103_v32 = vadd.f32 1.0, %v4405_v5  ;;  %v2768_v5 = vand.u32 2147483648, %v2741_v22  ;;  %vm6110_vm2 = vmor %vm2787_vm1, %vm2788_vm15  ;;  %vm2762_vm4 = vweird.f32 %v2741_v22 }
 0x500   : > { %v2784_v45 = vsub.f32 1.0, %v2783_v62  ;;  %vm2792_vm5 = vcmp.eq.f32.partialorder %v2791_v55, 8.507059e+37  ;;  %vm2767_vm7 = vcmp.eq.f32.partialorder %v2766_v56, 8.507059e+37 }
 0x501   : > { %v2745_v7 = vmul.f32 %v4401_v50, %v2744_v36  ;;  %4408 = vrcp.f32 %v6103_v32  ;;  %v2769_v1 = vor.u32 1.1754944e-38, %v2768_v5  ;;  %vm2802_vm9 = vweird.f32 %v6103_v32 }
 0x502   : > { %v2785_v60 = vmul.f32 %v4403_v9, %v2784_v45 }
 0x503   : > { %v2746_v33 = vadd.f32 %v4401_v50, %v2745_v7  ;;  %v2823_v7 = vpop.f32.mrf.mxu0 }
 0x504   : > { %v4407_v27 = vpop.eup %4406  ;;  %v2786_v6 = vadd.f32 %v4403_v9, %v2785_v60  ;;  %v2794_v60 = vor.u32 1.1754944e-38, %v2793_v57 }
 0x505   : > { %v2750_v38 = vsel %vm2749_vm13, %v4401_v50, %v2746_v33  ;;  %v2758_v48 = vmul.f32 %v4407_v27, %v2741_v22  ;;  %vm2763_vm3 = vweird.f32 %v4407_v27  ;;  %v2806_v22 = vand.u32 2147483647, %v6103_v32 }
 0x506   : > { %v2755_v52 = vsel %vm2752_vm14, %v2754_v4, %v2750_v38  ;;  %v2790_v45 = vsel %vm6110_vm2, %v4403_v9, %v2786_v6  ;;  %vm2764_vm6 = vmor %vm2762_vm4, %vm2763_vm3  ;;  %v2824_v38 = vadd.f32 %v5935_v21, %v2823_v7 }
 0x507   : > { %v4409_v51 = vpop.eup %4408  ;;  %v2826_v19 = vmul.f32 %v2822_v15, %v2755_v52  ;;  %v2759_v18 = vsub.f32 1.0, %v2758_v48  ;;  %v2795_v15 = vsel %vm2792_vm5, %v2794_v60, %v2790_v45  ;;  %vm2807_vm11 = vcmp.eq.f32.partialorder %v2806_v22, 8.507059e+37 }
 0x508   : > { %v2798_v62 = vmul.f32 %v4409_v51, %v6103_v32  ;;  %vm2803_vm8 = vweird.f32 %v4409_v51  ;;  %v2832_v57 = vsub.f32 1.0, %v2795_v15 }
 0x509   : > { %v2828_v36 = vadd.f32 %v2826_v19, %v733_v29  ;;  %v2760_v37 = vmul.f32 %v4407_v27, %v2759_v18  ;;  %v6685_v29 = vld [vmem:[#allocation35_spill] sm:$0xff]  ;;  %v2808_v19 = vand.u32 2147483648, %v6103_v32  ;;  %vm2804_vm10 = vmor %vm2802_vm9, %vm2803_vm8 }
 0x50a   : > { %v2799_v58 = vsub.f32 1.0, %v2798_v62  ;;  %v735_v9 = vadd.f32 %v5941_v2, %v6685_v29  ;;  %v6687_v29 = vld [vmem:[#allocation57_spill] sm:$0xff] }
 0x50b   : > { %4410 = vtanh.f32 %v2828_v36  ;;  %v2761_v33 = vadd.f32 %v4407_v27, %v2760_v37  ;;  %v2809_v36 = vor.u32 1.1754944e-38, %v2808_v19 }
 0x50c   : > { %v2800_v4 = vmul.f32 %v4409_v51, %v2799_v58 }
 0x50d   : > { %v2765_v48 = vsel %vm2764_vm6, %v4407_v27, %v2761_v33  ;;  %v2836_v27 = vmul.f32 %v2795_v15, %v5966_v41  ;;  %v2982_v33 = vmul.f32 %v5966_v41, %v5744_v20  ;;  %v6686_v20 = vld [vmem:[#allocation10_spill] sm:$0xff] }
 0x50e   : > { %v2770_v52 = vsel %vm2767_vm7, %v2769_v1, %v2765_v48  ;;  %v2801_v31 = vadd.f32 %v4409_v51, %v2800_v4  ;;  %v2983_v1 = vmul.f32 %v5968_v46, %v5746_v0  ;;  %v789_v0 = vadd.f32 %v6021_v42, %v6686_v20 }
 0x50f   : > { %v2827_v6 = vmul.f32 %v2824_v38, %v2770_v52 }
 0x510   : > { %v2805_v62 = vsel %vm2804_vm10, %v4409_v51, %v2801_v31 }
 0x511   : > { %v4411_v18 = vpop.eup %4410  ;;  %v2829_v55 = vadd.f32 %v2827_v6, %v735_v9  ;;  %v2810_v37 = vsel %vm2807_vm11, %v2809_v36, %v2805_v62  ;;  %v860_v9 = vadd.f32 %v6014_v28, %v6687_v29 }
 0x512   : > { %v2834_v5 = vmul.f32 %v4411_v18, %v2832_v57  ;;  %v2833_v56 = vsub.f32 1.0, %v2810_v37  ;;  %v2837_v58 = vmul.f32 %v2810_v37, %v5968_v46  ;;  %v6689_v18 = vld [vmem:[#allocation59_spill] sm:$0xff] }
 0x513   : > { %4412 = vtanh.f32 %v2829_v55  ;;  %v862_v55 = vadd.f32 %v6014_v28, %v6689_v18 }
 0x514   : > { %v2838_v50 = vadd.f32 %v2836_v27, %v2834_v5 }
 0x516   : > { %v2980_v60 = vmul.f32 %v2838_v50, %v5739_v34 }
 0x518   : > { %v6130_v4 = vadd.f32 %v2982_v33, %v2980_v60 }
 0x519   : > { %v4413_v45 = vpop.eup %4412 }
 0x51a   : > { %v2835_v7 = vmul.f32 %v4413_v45, %v2833_v56 }
 0x51c   : > { %v2839_v32 = vadd.f32 %v2837_v58, %v2835_v7 }
 0x51e   : > { %v2981_v51 = vmul.f32 %v2839_v32, %v5749_v14 }
 0x520   : > { %v6132_v15 = vadd.f32 %v2983_v1, %v2981_v51 }
 0x522   : > { %v3000_v38 = vpack.c.bf16 %v6132_v15, %v6130_v4 }
 0x524   : > { %4044 = vmatmul.msk.bf16.vlgmr.msrb.gmra.mxu0 %vm531_vm0, %v3000_v38  ;;  %4045 = vmatmul.msk.bf16.vlgmr.msrb.gmra.mxu1 %vm531_vm0, %v3000_v38 }
 0x525   : > { %4050 = vmatmul.msk.bf16.vlgmr.msra.gmra.mxu2 %vm531_vm0, %v3000_v38  ;;  %3418 = vmatpush.bf16.msrb.mxu0 %v5978_v39 }
 0x526   : > { %3450 = vmatpush.bf16.msrb.mxu1 %v5984_v54  ;;  %3464 = vmatpush.bf16.msra.mxu2 %v5990_v10  ;;  %v6688_v54 = vld [vmem:[#allocation12_spill] sm:$0xff] }
 0x527   : > { %v791_v10 = vadd.f32 %v6021_v42, %v6688_v54  ;;  %v6690_v54 = vld [vmem:[#allocation58_spill] sm:$0xff] }
 0x529   : > { %3419 = vmatpush.bf16.msrb.mxu0 %v5996_v16 }
 0x52a   : > { %3451 = vmatpush.bf16.msrb.mxu1 %v6002_v61  ;;  %3465 = vmatpush.bf16.msra.mxu2 %v6008_v11 }
 0x544   : > { %v2853_v48 = vpop.f32.mrf.mxu1 }
 0x545   : > { %v2872_v52 = vadd.f32 %v2853_v48, %v789_v0 }
 0x547   : > { %v4039_v31 = vmul.f32 -1.442695, %v2872_v52 }
 0x549   : > { %4414 = vpow2.f32 %v4039_v31 }
 0x54a   : > { %v2867_v39 = vpop.f32.mrf.mxu2 }
 0x54b   : > { %v2912_v6 = vadd.f32 %v2867_v39, %v860_v9  ;;  %v2961_v51 = vpop.f32.mrf.mxu3 }
 0x54c   : > { %v2855_v16 = vpop.f32.mrf.mxu1  ;;  %v2962_v39 = vadd.f32 %v6043_v47, %v2961_v51 }
 0x54d   : > { %v4041_v19 = vmul.f32 -1.442695, %v2912_v6  ;;  %v2873_v61 = vadd.f32 %v2855_v16, %v791_v10  ;;  %v931_v10 = vadd.f32 %v6049_v26, %v6690_v54 }
 0x54f   : > { %v4415_v57 = vpop.eup %4414  ;;  %4416 = vpow2.f32 %v4041_v19  ;;  %v4040_v11 = vmul.f32 -1.442695, %v2873_v61 }
 0x550   : > { %v2880_v22 = vadd.f32 1.0, %v4415_v57 }
 0x551   : > { %4418 = vpow2.f32 %v4040_v11 }
 0x552   : > { %4420 = vrcp.f32 %v2880_v22  ;;  %v2869_v5 = vpop.f32.mrf.mxu2  ;;  %v2893_v60 = vand.u32 2147483648, %v2880_v22  ;;  %v2891_v1 = vand.u32 2147483647, %v2880_v22  ;;  %vm2887_vm13 = vweird.f32 %v2880_v22 }
 0x553   : > { %v2913_v27 = vadd.f32 %v2869_v5, %v862_v55 }
 0x554   : > { %v2894_v52 = vor.u32 1.1754944e-38, %v2893_v60  ;;  %vm2892_vm15 = vcmp.eq.f32.partialorder %v2891_v1, 8.507059e+37 }
 0x555   : > { %v4417_v62 = vpop.eup %4416  ;;  %v4042_v36 = vmul.f32 -1.442695, %v2913_v27 }
 0x556   : > { %v2920_v50 = vadd.f32 1.0, %v4417_v62 }
 0x557   : > { %v4419_v37 = vpop.eup %4418  ;;  %4422 = vpow2.f32 %v4042_v36 }
 0x558   : > { %v4421_v56 = vpop.eup %4420  ;;  %4424 = vrcp.f32 %v2920_v50  ;;  %v2881_v7 = vadd.f32 1.0, %v4419_v37  ;;  %v2933_v61 = vand.u32 2147483648, %v2920_v50  ;;  %v2931_v11 = vand.u32 2147483647, %v2920_v50 }
 0x559   : > { %v2883_v45 = vmul.f32 %v4421_v56, %v2880_v22  ;;  %vm2888_vm12 = vweird.f32 %v4421_v56  ;;  %vm2927_vm2 = vweird.f32 %v2920_v50 }
 0x55a   : > { %4426 = vrcp.f32 %v2881_v7  ;;  %vm2889_vm14 = vmor %vm2887_vm13, %vm2888_vm12  ;;  %v2908_v5 = vand.u32 2147483648, %v2881_v7  ;;  %v2906_v36 = vand.u32 2147483647, %v2881_v7  ;;  %v2934_v37 = vor.u32 1.1754944e-38, %v2933_v61 }
 0x55b   : > { %v2884_v58 = vsub.f32 1.0, %v2883_v45  ;;  %vm2932_vm5 = vcmp.eq.f32.partialorder %v2931_v11, 8.507059e+37  ;;  %vm2902_vm6 = vweird.f32 %v2881_v7 }
 0x55c   : > { %vm2907_vm8 = vcmp.eq.f32.partialorder %v2906_v36, 8.507059e+37 }
 0x55d   : > { %v4423_v32 = vpop.eup %4422  ;;  %v2885_v33 = vmul.f32 %v4421_v56, %v2884_v58  ;;  %v2963_v58 = vpop.f32.mrf.mxu3 }
 0x55e   : > { %v4425_v38 = vpop.eup %4424  ;;  %v6153_v20 = vadd.f32 1.0, %v4423_v32  ;;  %v2964_v51 = vadd.f32 %v6043_v47, %v2963_v58 }
 0x55f   : > { %v2923_v0 = vmul.f32 %v4425_v38, %v2920_v50  ;;  %v2886_v48 = vadd.f32 %v4421_v56, %v2885_v33  ;;  %vm2928_vm1 = vweird.f32 %v4425_v38  ;;  %v2909_v50 = vor.u32 1.1754944e-38, %v2908_v5 }
 0x560   : > { %4428 = vrcp.f32 %v6153_v20  ;;  %v4427_v31 = vpop.eup %4426  ;;  %vm2929_vm3 = vmor %vm2927_vm2, %vm2928_vm1  ;;  %vm2942_vm10 = vweird.f32 %v6153_v20 }
 0x561   : > { %v2924_v29 = vsub.f32 1.0, %v2923_v0  ;;  %v2890_v9 = vsel %vm2889_vm14, %v4421_v56, %v2886_v48  ;;  %v2898_v16 = vmul.f32 %v4427_v31, %v2881_v7  ;;  %vm2903_vm4 = vweird.f32 %v4427_v31 }
 0x562   : > { %v2895_v6 = vsel %vm2892_vm15, %v2894_v52, %v2890_v9  ;;  %vm2904_vm7 = vmor %vm2902_vm6, %vm2903_vm4  ;;  %v6691_v52 = vld [vmem:[#allocation60_spill] sm:$0xff]  ;;  %v2948_v9 = vand.u32 2147483648, %v6153_v20 }
 0x563   : > { %v2925_v19 = vmul.f32 %v4425_v38, %v2924_v29  ;;  %v2966_v57 = vmul.f32 %v2962_v39, %v2895_v6  ;;  %v2899_v22 = vsub.f32 1.0, %v2898_v16 }
 0x565   : > { %v2926_v18 = vadd.f32 %v4425_v38, %v2925_v19  ;;  %v2968_v55 = vadd.f32 %v2966_v57, %v931_v10  ;;  %v2900_v62 = vmul.f32 %v4427_v31, %v2899_v22  ;;  %v2946_v10 = vand.u32 2147483647, %v6153_v20 }
 0x566   : > { %v4429_v27 = vpop.eup %4428  ;;  %v2949_v57 = vor.u32 1.1754944e-38, %v2948_v9 }
 0x567   : > { %v2930_v56 = vsel %vm2929_vm3, %v4425_v38, %v2926_v18  ;;  %4430 = vtanh.f32 %v2968_v55  ;;  %v2938_v45 = vmul.f32 %v4429_v27, %v6153_v20  ;;  %v2901_v60 = vadd.f32 %v4427_v31, %v2900_v62 }
 0x568   : > { %v2935_v32 = vsel %vm2932_vm5, %v2934_v37, %v2930_v56  ;;  %vm2943_vm9 = vweird.f32 %v4429_v27  ;;  %v933_v38 = vadd.f32 %v6049_v26, %v6691_v52  ;;  %vm2947_vm12 = vcmp.eq.f32.partialorder %v2946_v10, 8.507059e+37  ;;  %v6694_v52 = vld [vmem:[#allocation40_spill] sm:$0xff] }
 0x569   : > { %v2939_v33 = vsub.f32 1.0, %v2938_v45  ;;  %v2905_v1 = vsel %vm2904_vm7, %v4427_v31, %v2901_v60  ;;  %v2972_v29 = vsub.f32 1.0, %v2935_v32  ;;  %v2976_v6 = vmul.f32 %v2935_v32, %v6080_v30  ;;  %vm2944_vm11 = vmor %vm2942_vm10, %vm2943_vm9  ;;  %v6693_v60 = vld [vmem:[#allocation38_spill] sm:$0xff] }
 0x56a   : > { %v2910_v48 = vsel %vm2907_vm8, %v2909_v50, %v2905_v1  ;;  %v2988_v20 = vmul.f32 %v6080_v30, %v5621_v63  ;;  %v6692_v63 = vld [vmem:[#allocation37_spill] sm:$0xff]  ;;  %v667_v32 = vadd.f32 %v5921_v3, %v6693_v60 }
 0x56b   : > { %v2940_v0 = vmul.f32 %v4429_v27, %v2939_v33  ;;  %v2967_v39 = vmul.f32 %v2964_v51, %v2910_v48 }
 0x56d   : > { %v4431_v54 = vpop.eup %4430  ;;  %v2941_v7 = vadd.f32 %v4429_v27, %v2940_v0  ;;  %v2969_v16 = vadd.f32 %v2967_v39, %v933_v38  ;;  %v598_v38 = vadd.f32 %v5914_v44, %v6694_v52 }
 0x56e   : > { %v2974_v31 = vmul.f32 %v4431_v54, %v2972_v29 }
 0x56f   : > { %v2945_v19 = vsel %vm2944_vm11, %v4429_v27, %v2941_v7  ;;  %4432 = vtanh.f32 %v2969_v16  ;;  %v2989_v27 = vmul.f32 %v6082_v8, %v5624_v40  ;;  %v596_v40 = vadd.f32 %v5914_v44, %v6692_v63 }
 0x570   : > { %v2978_v61 = vadd.f32 %v2976_v6, %v2974_v31  ;;  %v2950_v11 = vsel %vm2947_vm12, %v2949_v57, %v2945_v19 }
 0x571   : > { %v2973_v22 = vsub.f32 1.0, %v2950_v11  ;;  %v2977_v5 = vmul.f32 %v2950_v11, %v6082_v8 }
 0x572   : > { %v2986_v62 = vmul.f32 %v2978_v61, %v5626_v24 }
 0x574   : > { %v6174_v56 = vadd.f32 %v2988_v20, %v2986_v62 }
 0x575   : > { %v4433_v18 = vpop.eup %4432 }
 0x576   : > { %v2975_v55 = vmul.f32 %v4433_v18, %v2973_v22 }
 0x578   : > { %v2979_v36 = vadd.f32 %v2977_v5, %v2975_v55 }
 0x57a   : > { %v2987_v37 = vmul.f32 %v2979_v36, %v5618_v43 }
 0x57c   : > { %v6176_v45 = vadd.f32 %v2989_v27, %v2987_v37 }
 0x57e   : > { %v3140_v58 = vpack.c.bf16 %v6176_v45, %v6174_v56 }
 0x580   : > { %4051 = vmatmul.msk.bf16.vlgmr.msra.gmra.mxu3 %vm531_vm0, %v3140_v58  ;;  %4052 = vmatmul.msk.bf16.vlgmr.msra.gmra.mxu0 %vm531_vm0, %v3140_v58 }
 0x581   : > { %4057 = vmatmul.msk.bf16.vlgmr.msra.gmra.mxu1 %vm531_vm0, %v3140_v58  ;;  %3558 = vmatpush.bf16.msra.mxu3 %v5878_v35  ;;  %v6695_v35 = vld [vmem:[#allocation41_spill] sm:$0xff] }
 0x585   : > { %3559 = vmatpush.bf16.msra.mxu3 %v5896_v12  ;;  %v669_v12 = vadd.f32 %v5921_v3, %v6695_v35 }
 0x5a1   : > { %v3013_v33 = vpop.f32.mrf.mxu0  ;;  %v3027_v50 = vpop.f32.mrf.mxu1 }
 0x5a2   : > { %v3032_v1 = vadd.f32 %v3013_v33, %v596_v40  ;;  %v3072_v51 = vadd.f32 %v3027_v50, %v667_v32 }
 0x5a4   : > { %v4046_v0 = vmul.f32 -1.442695, %v3032_v1  ;;  %v4048_v48 = vmul.f32 -1.442695, %v3072_v51 }
 0x5a6   : > { %4434 = vpow2.f32 %v4046_v0 }
 0x5a7   : > { %4436 = vpow2.f32 %v4048_v48  ;;  %v6696_v48 = vld [vmem:[#allocation39_spill] sm:$0xff] }
 0x5a8   : > { %v3121_v20 = vpop.f32.mrf.mxu2  ;;  %v738_v52 = vadd.f32 %v5941_v2, %v6696_v48 }
 0x5a9   : > { %v3015_v29 = vpop.f32.mrf.mxu0  ;;  %v3029_v9 = vpop.f32.mrf.mxu1  ;;  %v3122_v33 = vadd.f32 %v5935_v21, %v3121_v20 }
 0x5aa   : > { %v3033_v39 = vadd.f32 %v3015_v29, %v598_v38  ;;  %v3073_v54 = vadd.f32 %v3029_v9, %v669_v12 }
 0x5ac   : > { %v4435_v7 = vpop.eup %4434  ;;  %v4047_v10 = vmul.f32 -1.442695, %v3033_v39  ;;  %v4049_v16 = vmul.f32 -1.442695, %v3073_v54  ;;  %v6700_v54 = vld [vmem:[#allocation91_spill] sm:$0xff] }
 0x5ad   : > { %v4437_v31 = vpop.eup %4436  ;;  %v3040_v6 = vadd.f32 1.0, %v4435_v7 }
 0x5ae   : > { %v3080_v19 = vadd.f32 1.0, %v4437_v31  ;;  %4438 = vpow2.f32 %v4047_v10 }
 0x5af   : > { %4440 = vrcp.f32 %v3040_v6  ;;  %v3053_v36 = vand.u32 2147483648, %v3040_v6  ;;  %v3051_v27 = vand.u32 2147483647, %v3040_v6  ;;  %vm3047_vm14 = vweird.f32 %v3040_v6 }
 0x5b0   : > { %4442 = vrcp.f32 %v3080_v19  ;;  %v3093_v38 = vand.u32 2147483648, %v3080_v19  ;;  %vm3087_vm3 = vweird.f32 %v3080_v19  ;;  %v3091_v29 = vand.u32 2147483647, %v3080_v19 }
 0x5b1   : > { %4444 = vpow2.f32 %v4049_v16  ;;  %v3054_v60 = vor.u32 1.1754944e-38, %v3053_v36  ;;  %vm3052_vm1 = vcmp.eq.f32.partialorder %v3051_v27, 8.507059e+37  ;;  %v6699_v36 = vld [vmem:[#allocation42_spill] sm:$0xff] }
 0x5b2   : > { %v3094_v16 = vor.u32 1.1754944e-38, %v3093_v38  ;;  %vm3092_vm7 = vcmp.eq.f32.partialorder %v3091_v29, 8.507059e+37 }
 0x5b4   : > { %v4439_v61 = vpop.eup %4438 }
 0x5b5   : > { %v4441_v57 = vpop.eup %4440  ;;  %v3041_v44 = vadd.f32 1.0, %v4439_v61 }
 0x5b6   : > { %v4443_v11 = vpop.eup %4442  ;;  %v3043_v22 = vmul.f32 %v4441_v57, %v3040_v6  ;;  %vm3048_vm13 = vweird.f32 %v4441_v57  ;;  %v3123_v6 = vpop.f32.mrf.mxu2 }
 0x5b7   : > { %v4445_v3 = vpop.eup %4444  ;;  %v3083_v18 = vmul.f32 %v4443_v11, %v3080_v19  ;;  %4446 = vrcp.f32 %v3041_v44  ;;  %vm3049_vm15 = vmor %vm3047_vm14, %vm3048_vm13  ;;  %vm3088_vm2 = vweird.f32 %v4443_v11  ;;  %v3068_v39 = vand.u32 2147483648, %v3041_v44 }
 0x5b8   : > { %v3044_v55 = vsub.f32 1.0, %v3043_v22  ;;  %v6193_v5 = vadd.f32 1.0, %v4445_v3  ;;  %vm6200_vm4 = vmor %vm3087_vm3, %vm3088_vm2  ;;  %v3066_v10 = vand.u32 2147483647, %v3041_v44  ;;  %vm3062_vm6 = vweird.f32 %v3041_v44 }
 0x5b9   : > { %v3084_v62 = vsub.f32 1.0, %v3083_v18  ;;  %v6209_v18 = vld [vmem:[%s6489_s7] ss:$0 sm:$0xff] }
 0x5ba   : > { %v3045_v37 = vmul.f32 %v4441_v57, %v3044_v55  ;;  %4448 = vrcp.f32 %v6193_v5  ;;  %vm3067_vm9 = vcmp.eq.f32.partialorder %v3066_v10, 8.507059e+37  ;;  %vm3102_vm11 = vweird.f32 %v6193_v5 }
 0x5bb   : > { %v3085_v58 = vmul.f32 %v4443_v11, %v3084_v62 }
 0x5bc   : > { %v3046_v63 = vadd.f32 %v4441_v57, %v3045_v37  ;;  %v3108_v37 = vand.u32 2147483648, %v6193_v5 }
 0x5bd   : > { %v4447_v40 = vpop.eup %4446  ;;  %v3086_v1 = vadd.f32 %v4443_v11, %v3085_v58 }
 0x5be   : > { %v3050_v32 = vsel %vm3049_vm15, %v4441_v57, %v3046_v63  ;;  %v3058_v50 = vmul.f32 %v4447_v40, %v3041_v44  ;;  %vm3063_vm5 = vweird.f32 %v4447_v40  ;;  %v3069_v57 = vor.u32 1.1754944e-38, %v3068_v39  ;;  %v6215_v44 = vld [vmem:[%s6488_s6 + $0x2] ss:$0 sm:$0xff] }
 0x5bf   : > { %v3055_v51 = vsel %vm3052_vm1, %v3054_v60, %v3050_v32  ;;  %v3090_v31 = vsel %vm6200_vm4, %v4443_v11, %v3086_v1  ;;  %vm3064_vm8 = vmor %vm3062_vm6, %vm3063_vm5  ;;  %v3124_v11 = vadd.f32 %v6209_v18, %v3123_v6  ;;  %v740_v20 = vadd.f32 %v6215_v44, %v6699_v36 }
 0x5c0   : > { %v4449_v0 = vpop.eup %4448  ;;  %v3126_v35 = vmul.f32 %v3122_v33, %v3055_v51  ;;  %v3059_v12 = vsub.f32 1.0, %v3058_v50  ;;  %v3095_v22 = vsel %vm3092_vm7, %v3094_v16, %v3090_v31  ;;  %v3106_v63 = vand.u32 2147483647, %v6193_v5  ;;  %v6701_v31 = vld [vmem:[#allocation53_spill] sm:$0xff] }
 0x5c1   : > { %v3098_v9 = vmul.f32 %v4449_v0, %v6193_v5  ;;  %vm3103_vm10 = vweird.f32 %v4449_v0  ;;  %v3132_v58 = vsub.f32 1.0, %v3095_v22  ;;  %v3136_v33 = vmul.f32 %v3095_v22, %v6130_v4  ;;  %v6703_v22 = vld [vmem:[#allocation55_spill] sm:$0xff] }
 0x5c2   : > { %v3128_v21 = vadd.f32 %v3126_v35, %v738_v52  ;;  %v3060_v7 = vmul.f32 %v4447_v40, %v3059_v12  ;;  %vm3104_vm12 = vmor %vm3102_vm11, %vm3103_vm10  ;;  %v3109_v1 = vor.u32 1.1754944e-38, %v3108_v37  ;;  %vm3107_vm13 = vcmp.eq.f32.partialorder %v3106_v63, 8.507059e+37 }
 0x5c3   : > { %v3099_v2 = vsub.f32 1.0, %v3098_v9  ;;  %v3282_v9 = vmul.f32 %v6130_v4, %v5513_v49  ;;  %v855_v49 = vadd.f32 %v6014_v28, %v6701_v31 }
 0x5c4   : > { %4450 = vtanh.f32 %v3128_v21  ;;  %v3061_v61 = vadd.f32 %v4447_v40, %v3060_v7 }
 0x5c5   : > { %v3100_v19 = vmul.f32 %v4449_v0, %v3099_v2 }
 0x5c6   : > { %v3065_v3 = vsel %vm3064_vm8, %v4447_v40, %v3061_v61  ;;  %v6702_v61 = vld [vmem:[#allocation8_spill] sm:$0xff] }
 0x5c7   : > { %v3101_v55 = vadd.f32 %v4449_v0, %v3100_v19  ;;  %v3070_v62 = vsel %vm3067_vm9, %v3069_v57, %v3065_v3  ;;  %v784_v19 = vadd.f32 %v6021_v42, %v6702_v61  ;;  %v857_v3 = vadd.f32 %v6014_v28, %v6703_v22 }
 0x5c8   : > { %v3127_v27 = vmul.f32 %v3124_v11, %v3070_v62 }
 0x5c9   : > { %v3105_v50 = vsel %vm3104_vm12, %v4449_v0, %v3101_v55  ;;  %v3283_v0 = vmul.f32 %v6132_v15, %v6700_v54 }
 0x5ca   : > { %v4451_v40 = vpop.eup %4450  ;;  %v3129_v60 = vadd.f32 %v3127_v27, %v740_v20  ;;  %v3110_v48 = vsel %vm3107_vm13, %v3109_v1, %v3105_v50 }
 0x5cb   : > { %v3134_v32 = vmul.f32 %v4451_v40, %v3132_v58  ;;  %v3133_v52 = vsub.f32 1.0, %v3110_v48  ;;  %v3137_v12 = vmul.f32 %v3110_v48, %v6132_v15  ;;  %v6704_v58 = vld [vmem:[#allocation9_spill] sm:$0xff] }
 0x5cc   : > { %4452 = vtanh.f32 %v3129_v60  ;;  %v786_v63 = vadd.f32 %v6021_v42, %v6704_v58 }
 0x5cd   : > { %v3138_v51 = vadd.f32 %v3136_v33, %v3134_v32 }
 0x5cf   : > { %v3280_v29 = vmul.f32 %v3138_v51, %v5507_v13 }
 0x5d1   : > { %v6230_v21 = vadd.f32 %v3282_v9, %v3280_v29 }
 0x5d2   : > { %v4453_v38 = vpop.eup %4452 }
 0x5d3   : > { %v3135_v35 = vmul.f32 %v4453_v38, %v3133_v52 }
 0x5d5   : > { %v3139_v5 = vadd.f32 %v3137_v12, %v3135_v35 }
 0x5d7   : > { %v3281_v39 = vmul.f32 %v3139_v5, %v5509_v17 }
 0x5d9   : > { %v6232_v7 = vadd.f32 %v3283_v0, %v3281_v39 }
 0x5db   : > { %v3300_v10 = vpack.c.bf16 %v6232_v7, %v6230_v21 }
 0x5dd   : > { %4058 = vmatmul.msk.bf16.vlgmr.msrb.gmra.mxu2 %vm531_vm0, %v3300_v10  ;;  %4059 = vmatmul.msk.bf16.vlgmr.msrb.gmra.mxu3 %vm531_vm0, %v3300_v10 }
 0x5de   : > { %4064 = vmatmul.msk.bf16.vlgmr.msrb.gmra.mxu0 %vm531_vm0, %v3300_v10 }
 0x5fd   : > { %v3167_v2 = vpop.f32.mrf.mxu0 }
 0x5fe   : > { %v3212_v6 = vadd.f32 %v3167_v2, %v855_v49  ;;  %v3261_v9 = vpop.f32.mrf.mxu1 }
 0x600   : > { %v4055_v16 = vmul.f32 -1.442695, %v3212_v6 }
 0x602   : > { %4454 = vpow2.f32 %v4055_v16  ;;  %v3262_v16 = vadd.f32 %v6043_v47, %v3261_v9 }
 0x603   : > { %v3153_v57 = vpop.f32.mrf.mxu3 }
 0x604   : > { %v3172_v11 = vadd.f32 %v3153_v57, %v784_v19 }
 0x605   : > { %v3169_v55 = vpop.f32.mrf.mxu0 }
 0x606   : > { %v4053_v62 = vmul.f32 -1.442695, %v3172_v11  ;;  %v3213_v36 = vadd.f32 %v3169_v55, %v857_v3  ;;  %v6705_v11 = vld [vmem:[#allocation54_spill] sm:$0xff] }
 0x607   : > { %v926_v55 = vadd.f32 %v6049_v26, %v6705_v11 }
 0x608   : > { %v4455_v20 = vpop.eup %4454  ;;  %4456 = vpow2.f32 %v4053_v62  ;;  %v4056_v37 = vmul.f32 -1.442695, %v3213_v36 }
 0x609   : > { %v6245_v27 = vadd.f32 1.0, %v4455_v20 }
 0x60a   : > { %4458 = vpow2.f32 %v4056_v37 }
 0x60b   : > { %v3155_v40 = vpop.f32.mrf.mxu3  ;;  %4460 = vrcp.f32 %v6245_v27  ;;  %v3233_v62 = vand.u32 2147483648, %v6245_v27  ;;  %vm3227_vm4 = vweird.f32 %v6245_v27  ;;  %v3231_v37 = vand.u32 2147483647, %v6245_v27 }
 0x60c   : > { %v3173_v60 = vadd.f32 %v3155_v40, %v786_v63 }
 0x60d   : > { %vm3232_vm8 = vcmp.eq.f32.partialorder %v3231_v37, 8.507059e+37 }
 0x60e   : > { %v4457_v32 = vpop.eup %4456  ;;  %v4054_v33 = vmul.f32 -1.442695, %v3173_v60 }
 0x60f   : > { %v3180_v28 = vadd.f32 1.0, %v4457_v32 }
 0x610   : > { %v4459_v50 = vpop.eup %4458  ;;  %4462 = vpow2.f32 %v4054_v33  ;;  %v3263_v33 = vpop.f32.mrf.mxu1 }
 0x611   : > { %4464 = vrcp.f32 %v3180_v28  ;;  %v4461_v1 = vpop.eup %4460  ;;  %v6250_v51 = vadd.f32 1.0, %v4459_v50  ;;  %v3193_v39 = vand.u32 2147483648, %v3180_v28  ;;  %v3191_v0 = vand.u32 2147483647, %v3180_v28 }
 0x612   : > { %v3223_v48 = vmul.f32 %v4461_v1, %v6245_v27  ;;  %vm3187_vm15 = vweird.f32 %v3180_v28  ;;  %vm3228_vm3 = vweird.f32 %v4461_v1 }
 0x613   : > { %4466 = vrcp.f32 %v6250_v51  ;;  %v3194_v6 = vor.u32 1.1754944e-38, %v3193_v39  ;;  %vm3192_vm2 = vcmp.eq.f32.partialorder %v3191_v0, 8.507059e+37  ;;  %vm6264_vm5 = vmor %vm3227_vm4, %vm3228_vm3  ;;  %v3248_v39 = vand.u32 2147483648, %v6250_v51 }
 0x614   : > { %v3224_v12 = vsub.f32 1.0, %v3223_v48  ;;  %vm3242_vm12 = vweird.f32 %v6250_v51 }
 0x616   : > { %v4463_v52 = vpop.eup %4462  ;;  %v3225_v10 = vmul.f32 %v4461_v1, %v3224_v12 }
 0x617   : > { %v4465_v42 = vpop.eup %4464  ;;  %v3181_v38 = vadd.f32 1.0, %v4463_v52  ;;  %v6274_v52 = vld [vmem:[%s6489_s7 + $0x1] ss:$0 sm:$0xff] }
 0x618   : > { %v3183_v35 = vmul.f32 %v4465_v42, %v3180_v28  ;;  %vm3188_vm14 = vweird.f32 %v4465_v42  ;;  %v3226_v57 = vadd.f32 %v4461_v1, %v3225_v10  ;;  %v3234_v28 = vor.u32 1.1754944e-38, %v3233_v62 }
 0x619   : > { %4468 = vrcp.f32 %v3181_v38  ;;  %v6254_v29 = vpop.eup %4466  ;;  %vm3189_vm1 = vmor %vm3187_vm15, %vm3188_vm14  ;;  %v3208_v58 = vand.u32 2147483648, %v3181_v38  ;;  %v3206_v60 = vand.u32 2147483647, %v3181_v38  ;;  %vm3202_vm7 = vweird.f32 %v3181_v38 }
 0x61a   : > { %v3184_v5 = vsub.f32 1.0, %v3183_v35  ;;  %v3238_v31 = vmul.f32 %v6254_v29, %v6250_v51  ;;  %v3230_v26 = vsel %vm6264_vm5, %v4461_v1, %v3226_v57  ;;  %vm3243_vm11 = vweird.f32 %v6254_v29 }
 0x61b   : > { %v3209_v27 = vor.u32 1.1754944e-38, %v3208_v58  ;;  %v3235_v48 = vsel %vm3232_vm8, %v3234_v28, %v3230_v26  ;;  %vm3207_vm10 = vcmp.eq.f32.partialorder %v3206_v60, 8.507059e+37  ;;  %v3246_v10 = vand.u32 2147483647, %v6250_v51  ;;  %vm3244_vm13 = vmor %vm3242_vm12, %vm3243_vm11  ;;  %v6709_v51 = vld [vmem:[#allocation85_spill] sm:$0xff]  ;;  %v6711_v58 = vld [vmem:[#allocation87_spill] sm:$0xff] }
 0x61c   : > { %v3185_v54 = vmul.f32 %v4465_v42, %v3184_v5  ;;  %v3239_v3 = vsub.f32 1.0, %v3238_v31  ;;  %v6708_v5 = vld [vmem:[#allocation56_spill] sm:$0xff]  ;;  %v3272_v0 = vsub.f32 1.0, %v3235_v48  ;;  %v3289_v47 = vmul.f32 %v6176_v45, %v6711_v58 }
 0x61d   : > { %vm3247_vm14 = vcmp.eq.f32.partialorder %v3246_v10, 8.507059e+37 }
 0x61e   : > { %v3186_v49 = vadd.f32 %v4465_v42, %v3185_v54  ;;  %v3240_v32 = vmul.f32 %v6254_v29, %v3239_v3 }
 0x61f   : > { %v4469_v2 = vpop.eup %4468 }
 0x620   : > { %v3190_v61 = vsel %vm3189_vm1, %v4465_v42, %v3186_v49  ;;  %v3198_v19 = vmul.f32 %v4469_v2, %v3181_v38  ;;  %vm3203_vm6 = vweird.f32 %v4469_v2  ;;  %v3264_v42 = vadd.f32 %v6274_v52, %v3263_v33  ;;  %v6282_v38 = vld [vmem:[%s6488_s6 + $0x5] ss:$0 sm:$0xff]  ;;  %v6713_v33 = vld [vmem:[#allocation43_spill] sm:$0xff] }
 0x621   : > { %v3195_v22 = vsel %vm3192_vm2, %v3194_v6, %v3190_v61  ;;  %vm3204_vm9 = vmor %vm3202_vm7, %vm3203_vm6  ;;  %v3241_v1 = vadd.f32 %v6254_v29, %v3240_v32  ;;  %v928_v9 = vadd.f32 %v6282_v38, %v6708_v5  ;;  %v3249_v61 = vor.u32 1.1754944e-38, %v3248_v39  ;;  %v6310_v32 = vld [vmem:[%s6488_s6] ss:$0 sm:$0xff] }
 0x622   : > { %v3266_v36 = vmul.f32 %v3262_v16, %v3195_v22  ;;  %v3199_v20 = vsub.f32 1.0, %v3198_v19  ;;  %v601_v28 = vadd.f32 %v6310_v32, %v6713_v33 }
 0x623   : > { %v3245_v16 = vsel %vm3244_vm13, %v6254_v29, %v3241_v1  ;;  %v6712_v29 = vld [vmem:[#allocation88_spill] sm:$0xff] }
 0x624   : > { %v3268_v63 = vadd.f32 %v3266_v36, %v926_v55  ;;  %v3200_v40 = vmul.f32 %v4469_v2, %v3199_v20  ;;  %v3250_v57 = vsel %vm3247_vm14, %v3249_v61, %v3245_v16  ;;  %v6710_v20 = vld [vmem:[#allocation86_spill] sm:$0xff] }
 0x625   : > { %v3273_v22 = vsub.f32 1.0, %v3250_v57  ;;  %v3277_v11 = vmul.f32 %v3250_v57, %v6176_v45  ;;  %v3288_v37 = vmul.f32 %v6174_v56, %v6710_v20 }
 0x626   : > { %4470 = vtanh.f32 %v3268_v63  ;;  %v3201_v50 = vadd.f32 %v4469_v2, %v3200_v40 }
 0x628   : > { %v3205_v35 = vsel %vm3204_vm9, %v4469_v2, %v3201_v50  ;;  %v3276_v2 = vmul.f32 %v3235_v48, %v6174_v56  ;;  %v6317_v50 = vld [vmem:[%s6488_s6 + $0x1] ss:$0 sm:$0xff] }
 0x629   : > { %v3210_v12 = vsel %vm3207_vm10, %v3209_v27, %v3205_v35  ;;  %v6714_v27 = vld [vmem:[#allocation44_spill] sm:$0xff] }
 0x62a   : > { %v3267_v54 = vmul.f32 %v3264_v42, %v3210_v12  ;;  %v672_v48 = vadd.f32 %v6317_v50, %v6714_v27 }
 0x62c   : > { %v4471_v31 = vpop.eup %4470  ;;  %v3269_v49 = vadd.f32 %v3267_v54, %v928_v9 }
 0x62d   : > { %v3274_v6 = vmul.f32 %v4471_v31, %v3272_v0 }
 0x62e   : > { %4472 = vtanh.f32 %v3269_v49 }
 0x62f   : > { %v3278_v19 = vadd.f32 %v3276_v2, %v3274_v6 }
 0x631   : > { %v3286_v36 = vmul.f32 %v3278_v19, %v6709_v51 }
 0x633   : > { %v6298_v40 = vadd.f32 %v3288_v37, %v3286_v36 }
 0x634   : > { %v4473_v3 = vpop.eup %4472 }
 0x635   : > { %v3275_v55 = vmul.f32 %v4473_v3, %v3273_v22 }
 0x637   : > { %v3279_v62 = vadd.f32 %v3277_v11, %v3275_v55 }
 0x639   : > { %v3287_v63 = vmul.f32 %v3279_v62, %v6712_v29 }
 0x63b   : > { %v6300_v60 = vadd.f32 %v3289_v47, %v3287_v63  ;;  %v6715_v47 = vld [vmem:[#allocation45_spill] sm:$0xff] }
 0x63c   : > { %v743_v63 = vadd.f32 %v6215_v44, %v6715_v47  ;;  %v6719_v47 = vld [vmem:[#allocation51_spill] sm:$0xff] }
 0x63d   : > { %v3440_v26 = vpack.c.bf16 %v6300_v60, %v6298_v40 }
 0x63f   : > { %4065 = vmatmul.msk.bf16.vlgmr.msrb.gmra.mxu1 %vm531_vm0, %v3440_v26  ;;  %4066 = vmatmul.msk.bf16.vlgmr.msra.gmra.mxu2 %vm531_vm0, %v3440_v26 }
 0x640   : > { %4071 = vmatmul.msk.bf16.vlgmr.msra.gmra.mxu3 %vm531_vm0, %v3440_v26 }
 0x65b   : > { %v3421_v3 = vpop.f32.mrf.mxu0 }
 0x65c   : > { %v3422_v36 = vadd.f32 %v6209_v18, %v3421_v3 }
 0x660   : > { %v3313_v42 = vpop.f32.mrf.mxu2  ;;  %v3327_v35 = vpop.f32.mrf.mxu3 }
 0x661   : > { %v3332_v1 = vadd.f32 %v3313_v42, %v601_v28  ;;  %v3372_v12 = vadd.f32 %v3327_v35, %v672_v48 }
 0x663   : > { %v4060_v5 = vmul.f32 -1.442695, %v3332_v1  ;;  %v4062_v9 = vmul.f32 -1.442695, %v3372_v12 }
 0x665   : > { %4474 = vpow2.f32 %v4060_v5 }
 0x666   : > { %4476 = vpow2.f32 %v4062_v9 }
 0x66b   : > { %v4475_v39 = vpop.eup %4474 }
 0x66c   : > { %v4477_v54 = vpop.eup %4476  ;;  %v3340_v0 = vadd.f32 1.0, %v4475_v39 }
 0x66d   : > { %v3380_v10 = vadd.f32 1.0, %v4477_v54  ;;  %v6327_v54 = vpop.f32.mrf.mxu2 }
 0x66e   : > { %4478 = vrcp.f32 %v3340_v0  ;;  %v3353_v61 = vand.u32 2147483648, %v3340_v0  ;;  %v3351_v22 = vand.u32 2147483647, %v3340_v0  ;;  %vm3347_vm1 = vweird.f32 %v3340_v0 }
 0x66f   : > { %4480 = vrcp.f32 %v3380_v10  ;;  %v3393_v33 = vand.u32 2147483648, %v3380_v10  ;;  %vm3387_vm5 = vweird.f32 %v3380_v10  ;;  %v3391_v28 = vand.u32 2147483647, %v3380_v10 }
 0x670   : > { %v3354_v62 = vor.u32 1.1754944e-38, %v3353_v61  ;;  %vm3352_vm3 = vcmp.eq.f32.partialorder %v3351_v22, 8.507059e+37  ;;  %v6717_v61 = vld [vmem:[#allocation49_spill] sm:$0xff]  ;;  %v6718_v22 = vld [vmem:[#allocation7_spill] sm:$0xff] }
 0x671   : > { %v3394_v42 = vor.u32 1.1754944e-38, %v3393_v33  ;;  %vm3392_vm7 = vcmp.eq.f32.partialorder %v3391_v28, 8.507059e+37 }
 0x674   : > { %v4479_v31 = vpop.eup %4478 }
 0x675   : > { %v4481_v49 = vpop.eup %4480  ;;  %v3343_v2 = vmul.f32 %v4479_v31, %v3340_v0  ;;  %vm3348_vm15 = vweird.f32 %v4479_v31  ;;  %v4562_v0 = vld [vmem:[%s6488_s6 + $0x3] ss:$0 sm:$0xff] }
 0x676   : > { %v3383_v6 = vmul.f32 %v4481_v49, %v3380_v10  ;;  %vm3349_vm2 = vmor %vm3347_vm1, %vm3348_vm15  ;;  %vm3388_vm4 = vweird.f32 %v4481_v49  ;;  %v6716_v10 = vld [vmem:[#allocation6_spill] sm:$0xff]  ;;  %v781_v3 = vadd.f32 %v4562_v0, %v6718_v22 }
 0x677   : > { %v3344_v16 = vsub.f32 1.0, %v3343_v2  ;;  %vm3389_vm6 = vmor %vm3387_vm5, %vm3388_vm4 }
 0x678   : > { %v3384_v19 = vsub.f32 1.0, %v3383_v6 }
 0x679   : > { %v3345_v57 = vmul.f32 %v4479_v31, %v3344_v16  ;;  %v4563_v16 = vld [vmem:[%s6488_s6 + $0x4] ss:$0 sm:$0xff] }
 0x67a   : > { %v3385_v11 = vmul.f32 %v4481_v49, %v3384_v19  ;;  %v850_v19 = vadd.f32 %v4563_v16, %v6717_v61 }
 0x67b   : > { %v3346_v55 = vadd.f32 %v4479_v31, %v3345_v57 }
 0x67c   : > { %v3386_v58 = vadd.f32 %v4481_v49, %v3385_v11 }
 0x67d   : > { %v3350_v20 = vsel %vm3349_vm2, %v4479_v31, %v3346_v55  ;;  %v779_v31 = vadd.f32 %v4562_v0, %v6716_v10 }
 0x67e   : > { %v3355_v37 = vsel %vm3352_vm3, %v3354_v62, %v3350_v20  ;;  %v3390_v48 = vsel %vm3389_vm6, %v4481_v49, %v3386_v58 }
 0x67f   : > { %v3426_v26 = vmul.f32 %v3422_v36, %v3355_v37  ;;  %v3395_v35 = vsel %vm3392_vm7, %v3394_v42, %v3390_v48 }
 0x680   : > { %v3432_v1 = vsub.f32 1.0, %v3395_v35  ;;  %v3436_v9 = vmul.f32 %v3395_v35, %v6230_v21 }
 0x681   : > { %v3428_v27 = vadd.f32 %v3426_v26, %v743_v63  ;;  %v852_v63 = vadd.f32 %v4563_v16, %v6719_v47 }
 0x683   : > { %4482 = vtanh.f32 %v3428_v27  ;;  %v6339_v27 = vpop.f32.mrf.mxu3 }
 0x689   : > { %v4483_v12 = vpop.eup %4482 }
 0x68a   : > { %v3434_v5 = vmul.f32 %v4483_v12, %v3432_v1 }
 0x68c   : > { %v6325_v39 = vadd.f32 %v3436_v9, %v3434_v5 }
 0x6bc   : > { %v3453_v49 = vpop.f32.mrf.mxu1 }
 0x6bd   : > { %v3472_v2 = vadd.f32 %v3453_v49, %v779_v31 }
 0x6bf   : > { %v4067_v6 = vmul.f32 -1.442695, %v3472_v2 }
 0x6c1   : > { %4484 = vpow2.f32 %v4067_v6 }
 0x6c2   : > { %v3467_v57 = vpop.f32.mrf.mxu2 }
 0x6c3   : > { %v3512_v11 = vadd.f32 %v3467_v57, %v850_v19  ;;  %v3561_v2 = vpop.f32.mrf.mxu3 }
 0x6c4   : > { %v3455_v55 = vpop.f32.mrf.mxu1 }
 0x6c5   : > { %v4069_v62 = vmul.f32 -1.442695, %v3512_v11  ;;  %v3473_v36 = vadd.f32 %v3455_v55, %v781_v3  ;;  %v3562_v55 = vadd.f32 %v6274_v52, %v3561_v2 }
 0x6c7   : > { %v4485_v20 = vpop.eup %4484  ;;  %4486 = vpow2.f32 %v4069_v62  ;;  %v4068_v37 = vmul.f32 -1.442695, %v3473_v36  ;;  %v6720_v62 = vld [vmem:[#allocation50_spill] sm:$0xff] }
 0x6c8   : > { %v3480_v58 = vadd.f32 1.0, %v4485_v20  ;;  %v921_v36 = vadd.f32 %v6282_v38, %v6720_v62  ;;  %v6725_v62 = vld [vmem:[#allocation52_spill] sm:$0xff] }
 0x6c9   : > { %4488 = vpow2.f32 %v4068_v37 }
 0x6ca   : > { %4490 = vrcp.f32 %v3480_v58  ;;  %v3469_v26 = vpop.f32.mrf.mxu2  ;;  %v3493_v0 = vand.u32 2147483648, %v3480_v58  ;;  %v3491_v49 = vand.u32 2147483647, %v3480_v58  ;;  %vm3487_vm9 = vweird.f32 %v3480_v58 }
 0x6cb   : > { %v3513_v33 = vadd.f32 %v3469_v26, %v852_v63 }
 0x6cc   : > { %v3494_v57 = vor.u32 1.1754944e-38, %v3493_v0  ;;  %vm3492_vm11 = vcmp.eq.f32.partialorder %v3491_v49, 8.507059e+37 }
 0x6cd   : > { %v4487_v28 = vpop.eup %4486  ;;  %v4070_v48 = vmul.f32 -1.442695, %v3513_v33  ;;  %v6722_v33 = vld [vmem:[#allocation84_spill] sm:$0xff] }
 0x6ce   : > { %v3520_v42 = vadd.f32 1.0, %v4487_v28 }
 0x6cf   : > { %v4489_v35 = vpop.eup %4488  ;;  %4492 = vpow2.f32 %v4070_v48 }
 0x6d0   : > { %v4491_v1 = vpop.eup %4490  ;;  %4494 = vrcp.f32 %v3520_v42  ;;  %v3481_v5 = vadd.f32 1.0, %v4489_v35  ;;  %v3533_v63 = vand.u32 2147483648, %v3520_v42  ;;  %v3531_v48 = vand.u32 2147483647, %v3520_v42 }
 0x6d1   : > { %v3483_v12 = vmul.f32 %v4491_v1, %v3480_v58  ;;  %vm3488_vm8 = vweird.f32 %v4491_v1  ;;  %v6721_v58 = vld [vmem:[#allocation79_spill] sm:$0xff]  ;;  %vm3527_vm13 = vweird.f32 %v3520_v42 }
 0x6d2   : > { %4496 = vrcp.f32 %v3481_v5  ;;  %vm3489_vm10 = vmor %vm3487_vm9, %vm3488_vm8  ;;  %v1400_v28 = vmul.f32 %v6722_v33, %v6721_v58  ;;  %v3506_v2 = vand.u32 2147483647, %v3481_v5  ;;  %vm3532_vm1 = vcmp.eq.f32.partialorder %v3531_v48, 8.507059e+37 }
 0x6d3   : > { %v3484_v9 = vsub.f32 1.0, %v3483_v12  ;;  %vm3502_vm2 = vweird.f32 %v3481_v5 }
 0x6d4   : > { %vm3507_vm4 = vcmp.eq.f32.partialorder %v3506_v2, 8.507059e+37 }
 0x6d5   : > { %v4493_v10 = vpop.eup %4492  ;;  %v3485_v31 = vmul.f32 %v4491_v1, %v3484_v9  ;;  %v3508_v9 = vand.u32 2147483648, %v3481_v5 }
 0x6d6   : > { %v4495_v6 = vpop.eup %4494  ;;  %v6341_v16 = vadd.f32 1.0, %v4493_v10  ;;  %v6723_v10 = vld [vmem:[#allocation92_spill] sm:$0xff] }
 0x6d7   : > { %v3523_v61 = vmul.f32 %v4495_v6, %v3520_v42  ;;  %v3486_v19 = vadd.f32 %v4491_v1, %v3485_v31  ;;  %vm3528_vm12 = vweird.f32 %v4495_v6  ;;  %v1732_v31 = vmul.f32 %v6723_v10, %v5507_v13  ;;  %v6724_v42 = vld [vmem:[#allocation75_spill] sm:$0xff] }
 0x6d8   : > { %4498 = vrcp.f32 %v6341_v16  ;;  %v4497_v22 = vpop.eup %4496  ;;  %vm3529_vm14 = vmor %vm3527_vm13, %vm3528_vm12  ;;  %vm3542_vm6 = vweird.f32 %v6341_v16 }
 0x6d9   : > { %v3524_v3 = vsub.f32 1.0, %v3523_v61  ;;  %v3490_v11 = vsel %vm3489_vm10, %v4491_v1, %v3486_v19  ;;  %v3498_v37 = vmul.f32 %v4497_v22, %v3481_v5  ;;  %vm3503_vm15 = vweird.f32 %v4497_v22 }
 0x6da   : > { %v3495_v20 = vsel %vm3492_vm11, %v3494_v57, %v3490_v11  ;;  %v3534_v61 = vor.u32 1.1754944e-38, %v3533_v63  ;;  %vm3504_vm3 = vmor %vm3502_vm2, %vm3503_vm15  ;;  %v1734_v63 = vadd.f32 %v1732_v31, %v1400_v28  ;;  %vm3624_vm2 = vcmask 523264  }
 0x6db   : > { %v3525_v47 = vmul.f32 %v4495_v6, %v3524_v3  ;;  %v3566_v26 = vmul.f32 %v3562_v55, %v3495_v20  ;;  %v3499_v35 = vsub.f32 1.0, %v3498_v37  ;;  %v3563_v3 = vpop.f32.mrf.mxu3  ;;  %v2064_v55 = vmul.f32 %v6724_v42, %v5739_v34 }
 0x6dd   : > { %v3526_v12 = vadd.f32 %v4495_v6, %v3525_v47  ;;  %v3568_v1 = vadd.f32 %v3566_v26, %v921_v36  ;;  %v3500_v49 = vmul.f32 %v4497_v22, %v3499_v35  ;;  %v923_v36 = vadd.f32 %v6282_v38, %v6725_v62  ;;  %v6726_v35 = vld [vmem:[#allocation76_spill] sm:$0xff] }
 0x6de   : > { %v4499_v0 = vpop.eup %4498  ;;  %v3509_v47 = vor.u32 1.1754944e-38, %v3508_v9  ;;  %v2396_v5 = vmul.f32 %v5866_v23, %v6726_v35  ;;  %v2066_v38 = vadd.f32 %v2064_v55, %v1734_v63  ;;  %v6728_v62 = vld [vmem:[#allocation64_spill] sm:$0xff] }
 0x6df   : > { %v3530_v19 = vsel %vm3529_vm14, %v4495_v6, %v3526_v12  ;;  %4500 = vtanh.f32 %v3568_v1  ;;  %v3538_v57 = vmul.f32 %v4499_v0, %v6341_v16  ;;  %v3501_v11 = vadd.f32 %v4497_v22, %v3500_v49 }
 0x6e0   : > { %v3535_v20 = vsel %vm3532_vm1, %v3534_v61, %v3530_v19  ;;  %v3564_v6 = vadd.f32 %v6274_v52, %v3563_v3  ;;  %vm3543_vm5 = vweird.f32 %v4499_v0  ;;  %v3548_v1 = vand.u32 2147483648, %v6341_v16 }
 0x6e1   : > { %v3539_v37 = vsub.f32 1.0, %v3538_v57  ;;  %v3505_v26 = vsel %vm3504_vm3, %v4497_v22, %v3501_v11  ;;  %v3572_v12 = vsub.f32 1.0, %v3535_v20  ;;  %v3546_v22 = vand.u32 2147483647, %v6341_v16  ;;  %vm3544_vm7 = vmor %vm3542_vm6, %vm3543_vm5  ;;  %v6727_v11 = vld [vmem:[#allocation93_spill] sm:$0xff] }
 0x6e2   : > { %v3510_v48 = vsel %vm3507_vm4, %v3509_v47, %v3505_v26  ;;  %v2696_v52 = vmul.f32 %v6080_v30, %v5798_v53  ;;  %v3576_v31 = vmul.f32 %v3535_v20, %v6298_v40  ;;  %v2398_v2 = vadd.f32 %v2396_v5, %v2066_v38  ;;  %v6729_v20 = vld [vmem:[#allocation61_spill] sm:$0xff]  ;;  %v6731_v47 = vld [vmem:[#allocation83_spill] sm:$0xff]  ;;  %v6733_v5 = vld [vmem:[#allocation78_spill] sm:$0xff] }
 0x6e3   : > { %v3540_v33 = vmul.f32 %v4499_v0, %v3539_v37  ;;  %v3567_v10 = vmul.f32 %v3564_v6, %v3510_v48  ;;  %v3549_v19 = vor.u32 1.1754944e-38, %v3548_v1  ;;  %v2996_v57 = vmul.f32 %v6174_v56, %v5626_v24  ;;  %v6730_v37 = vld [vmem:[#allocation82_spill] sm:$0xff]  ;;  %v6732_v56 = vld [vmem:[#allocation32_spill] sm:$0xff] }
 0x6e4   : > { %v1733_v42 = vmul.f32 %v6727_v11, %v5509_v17  ;;  %vm3547_vm8 = vcmp.eq.f32.partialorder %v3546_v22, 8.507059e+37  ;;  %v2698_v16 = vadd.f32 %v2696_v52, %v2398_v2  ;;  %v3296_v30 = vmul.f32 %v6298_v40, %v6709_v51 }
 0x6e5   : > { %v4501_v49 = vpop.eup %4500  ;;  %v3541_v61 = vadd.f32 %v4499_v0, %v3540_v33  ;;  %v3569_v9 = vadd.f32 %v3567_v10, %v923_v36  ;;  %v1401_v26 = vmul.f32 %v6731_v47, %v6730_v37  ;;  %v2065_v6 = vmul.f32 %v6732_v56, %v5749_v14 }
 0x6e6   : > { %v3574_v28 = vmul.f32 %v4501_v49, %v3572_v12  ;;  %v2998_v63 = vadd.f32 %v2996_v57, %v2698_v16  ;;  %v2397_v12 = vmul.f32 %v5868_v25, %v6733_v5  ;;  %v2697_v22 = vmul.f32 %v6082_v8, %v5807_v59 }
 0x6e7   : > { %v3545_v23 = vsel %vm3544_vm7, %v4499_v0, %v3541_v61  ;;  %4502 = vtanh.f32 %v3569_v9  ;;  %v3588_v0 = vmul.f32 %v6298_v40, %v6729_v20  ;;  %v1735_v48 = vadd.f32 %v1733_v42, %v1401_v26  ;;  %v6737_v26 = vld [vmem:[#allocation47_spill] sm:$0xff] }
 0x6e8   : > { %v3578_v3 = vadd.f32 %v3576_v31, %v3574_v28  ;;  %v3550_v55 = vsel %vm3547_vm8, %v3549_v19, %v3545_v23  ;;  %v3298_v38 = vadd.f32 %v3296_v30, %v2998_v63  ;;  %v2997_v31 = vmul.f32 %v6176_v45, %v5618_v43  ;;  %v6734_v19 = vld [vmem:[#allocation68_spill] sm:$0xff]  ;;  %v3600_v45 = vld [vmem:[%s451_s19] sm:$0xff] }
 0x6e9   : > { %v3573_v1 = vsub.f32 1.0, %v3550_v55  ;;  %v2067_v61 = vadd.f32 %v2065_v6, %v1735_v48  ;;  %v3577_v52 = vmul.f32 %v3550_v55, %v6300_v60  ;;  %v3297_v2 = vmul.f32 %v6300_v60, %v6712_v29 }
 0x6ea   : > { %v3586_v36 = vmul.f32 %v3578_v3, %v6728_v62  ;;  %v6735_v3 = vld [vmem:[#allocation66_spill] sm:$0xff]  ;;  %v674_v56 = vadd.f32 %v6317_v50, %v6737_v26 }
 0x6eb   : > { %v2399_v9 = vadd.f32 %v2397_v12, %v2067_v61  ;;  %v3589_v11 = vmul.f32 %v6300_v60, %v6735_v3  ;;  %v6740_v26 = vld [vmem:[#allocation70_spill] sm:$0xff] }
 0x6ec   : > { %v3590_v33 = vadd.f32 %v3588_v0, %v3586_v36  ;;  %v6736_v36 = vld [vmem:[#allocation46_spill] sm:$0xff]  ;;  %v3601_v0 = vld [vmem:[%s451_s19 + $0x8] sm:$0xff]  ;;  %v3373_v63 = vadd.f32 %v6339_v27, %v674_v56  ;;  %v1397_v56 = vmul.f32 %v6740_v26, %v6734_v19 }
 0x6ed   : > { %v4503_v10 = vpop.eup %4502  ;;  %v2699_v25 = vadd.f32 %v2697_v22, %v2399_v9  ;;  %v603_v20 = vadd.f32 %v6310_v32, %v6736_v36 }
 0x6ee   : > { %v3596_v49 = vmul.f32 %v3590_v33, %v6728_v62  ;;  %v3575_v40 = vmul.f32 %v4503_v10, %v3573_v1  ;;  %v4063_v48 = vmul.f32 -1.442695, %v3373_v63 }
 0x6ef   : > { %v2999_v8 = vadd.f32 %v2997_v31, %v2699_v25  ;;  %v3333_v60 = vadd.f32 %v6327_v54, %v603_v20 }
 0x6f0   : > { %v3598_v28 = vadd.f32 %v3596_v49, %v3298_v38  ;;  %v3579_v23 = vadd.f32 %v3577_v52, %v3575_v40  ;;  %v3423_v52 = vpop.f32.mrf.mxu0 }
 0x6f1   : > { %v3299_v16 = vadd.f32 %v3297_v2, %v2999_v8  ;;  %v4061_v47 = vmul.f32 -1.442695, %v3333_v60  ;;  %v6739_v60 = vld [vmem:[#allocation90_spill] sm:$0xff] }
 0x6f2   : > { %3604 = vrot.lane.b32.xlu1 %v3598_v28, %s4636_s10  ;;  %v3587_v57 = vmul.f32 %v3579_v23, %v6734_v19  ;;  %v3424_v23 = vadd.f32 %v6209_v18, %v3423_v52 }
 0x6f3   : > { %4504 = vpow2.f32 %v4061_v47 }
 0x6f4   : > { %v3591_v42 = vadd.f32 %v3589_v11, %v3587_v57  ;;  %v6738_v57 = vld [vmem:[#allocation48_spill] sm:$0xff] }
 0x6f5   : > { %v745_v3 = vadd.f32 %v6215_v44, %v6738_v57  ;;  %v1729_v44 = vmul.f32 %v6739_v60, %v6712_v29  ;;  %v2693_v29 = vmul.f32 %v5968_v46, %v6733_v5  ;;  %v6745_v46 = vld [vmem:[#allocation69_spill] sm:$0xff]  ;;  %v2992_v57 = vmul.f32 %v6130_v4, %v5739_v34 }
 0x6f6   : > { %v3597_v55 = vmul.f32 %v3591_v42, %v6734_v19  ;;  %v2993_v19 = vmul.f32 %v6132_v15, %v5749_v14  ;;  %v1396_v5 = vmul.f32 %v6745_v46, %v6728_v62  ;;  %v6746_v14 = vld [vmem:[#allocation11_spill] sm:$0xff]  ;;  %v6748_v62 = vld [vmem:[#allocation80_spill] sm:$0xff] }
 0x6f7   : > { %v2060_v15 = vmul.f32 %v6746_v14, %v5626_v24  ;;  %v2692_v24 = vmul.f32 %v5966_v41, %v6726_v35 }
 0x6f8   : > { %v3599_v30 = vadd.f32 %v3597_v55, %v3299_v16 }
 0x6f9   : > { %v4505_v6 = vpop.eup %4504 }
 0x6fa   : > { %3614 = vperm.xlu1 %4183, %v3600_v45   ;;  %3606 = vrot.lane.b32.xlu2 %v3599_v30, %s4636_s10  ;;  %v3341_v33 = vadd.f32 1.0, %v4505_v6  ;;  %v6741_v6 = vld [vmem:[#allocation94_spill] sm:$0xff]  ;;  %s4578_s10 = sshra.s32 %s3643_s25, 4  ;;  %s4579_s10 = int_to_ptr.hbm [resolvable:$true] %s4578_s10 }
 0x6fb   : > { %v2061_v63 = vmul.f32 %v6741_v6, %v5618_v43  ;;  %s4580_s12 = scalar_lea.hbm %s4579_s10, 16  ;;  %p4585_p3 = scmp.lt.s32.totalorder %s4579_s10, %s6490_s8 }
 0x6fc   : > { %4506 = vrcp.f32 %v3341_v33  ;;  %v3368_v40 = vand.u32 2147483648, %v3341_v33  ;;  %vm3362_vm10 = vweird.f32 %v3341_v33  ;;  %v3366_v50 = vand.u32 2147483647, %v3341_v33  ;;  %p4581_p0 = scmp.ne.s32.totalorder %s4579_s10, %s4580_s12  ;;  %p4586_p4 = scmp.lt.s32.totalorder %s4584_s26, %s4580_s12 }
 0x6fd   : > { %4508 = vpow2.f32 %v4063_v48  ;;  %v6742_v48 = vld [vmem:[#allocation36_spill] sm:$0xff] }
 0x6fe   : > { %v3369_v28 = vor.u32 1.1754944e-38, %v3368_v40  ;;  %vm3367_vm12 = vcmp.eq.f32.partialorder %v3366_v50, 8.507059e+37  ;;  %v3293_v40 = vmul.f32 %v6232_v7, %v5509_v17  ;;  %p4582_p1 = pnand %p4581_p0, %p4723_p6  ;;  %p4587_p5 = por %p4586_p4, %p4585_p3 }
 0x700   : > { %p4583_p2 = pneg %p4582_p1 }
 0x702   : > { %3619 = vperm.xlu2 %4184, %v3601_v0   ;;  %v4507_v12 = vpop.eup %4506  ;;  %p4588_p7 = pnand %p4587_p5, %p4583_p2 }
 0x703   : > { %v4509_v1 = vpop.eup %4508  ;;  %v3358_v10 = vmul.f32 %v4507_v12, %v3341_v33  ;;  %vm3363_vm9 = vweird.f32 %v4507_v12  ;;  %v1731_v33 = vadd.f32 %v1729_v44, %v1397_v56 }
 0x704   : > { %v3381_v32 = vadd.f32 1.0, %v4509_v1  ;;  %vm3364_vm11 = vmor %vm3362_vm10, %vm3363_vm9 }
 0x705   : > { %v3359_v38 = vsub.f32 1.0, %v3358_v10  ;;  %v6743_v10 = vld [vmem:[#allocation81_spill] sm:$0xff] }
 0x706   : > { %4510 = vrcp.f32 %v3381_v32  ;;  %v3408_v42 = vand.u32 2147483648, %v3381_v32  ;;  %vm3402_vm14 = vweird.f32 %v3381_v32  ;;  %v3406_v45 = vand.u32 2147483647, %v3381_v32 }
 0x707   : > { %v3360_v54 = vmul.f32 %v4507_v12, %v3359_v38  ;;  %v2063_v38 = vadd.f32 %v2061_v63, %v1731_v33 }
 0x708   : > { %v3409_v55 = vor.u32 1.1754944e-38, %v3408_v42  ;;  %vm3407_vm1 = vcmp.eq.f32.partialorder %v3406_v45, 8.507059e+37 }
 0x709   : > { %v3361_v61 = vadd.f32 %v4507_v12, %v3360_v54 }
 0x70b   : > { %v3365_v27 = vsel %vm3364_vm11, %v4507_v12, %v3361_v61  ;;  %v2393_v12 = vmul.f32 %v6742_v48, %v5807_v59 }
 0x70c   : > { %v4511_v49 = vpop.eup %4510  ;;  %v3370_v9 = vsel %vm3367_vm12, %v3369_v28, %v3365_v27  ;;  %v6744_v27 = vld [vmem:[#allocation89_spill] sm:$0xff] }
 0x70d   : > { %v3398_v22 = vmul.f32 %v4511_v49, %v3381_v32  ;;  %v3427_v25 = vmul.f32 %v3424_v23, %v3370_v9  ;;  %vm3403_vm13 = vweird.f32 %v4511_v49  ;;  %v3583_v32 = vmul.f32 %v6232_v7, %v6743_v10 }
 0x70e   : > { %vm3404_vm15 = vmor %vm3402_vm14, %vm3403_vm13  ;;  %v2395_v54 = vadd.f32 %v2393_v12, %v2063_v38  ;;  %v1728_v52 = vmul.f32 %v6744_v27, %v6709_v51  ;;  %v3580_v51 = vmul.f32 %v6325_v39, %v6721_v58 }
 0x70f   : > { %v3399_v31 = vsub.f32 1.0, %v3398_v22  ;;  %v3429_v11 = vadd.f32 %v3427_v25, %v745_v3 }
 0x710   : > { %v2695_v61 = vadd.f32 %v2693_v29, %v2395_v54  ;;  %v1730_v17 = vadd.f32 %v1728_v52, %v1396_v5 }
 0x711   : > { %v3400_v2 = vmul.f32 %v4511_v49, %v3399_v31  ;;  %4512 = vtanh.f32 %v3429_v11 }
 0x712   : > { %v2995_v59 = vadd.f32 %v2993_v19, %v2695_v61  ;;  %v2062_v25 = vadd.f32 %v2060_v15, %v1730_v17 }
 0x713   : > { %v3401_v8 = vadd.f32 %v4511_v49, %v3400_v2  ;;  %v3582_v2 = vmul.f32 %v6230_v21, %v6748_v62 }
 0x714   : > { %v3295_v22 = vadd.f32 %v3293_v40, %v2995_v59 }
 0x715   : > { %v3405_v16 = vsel %vm3404_vm15, %v4511_v49, %v3401_v8  ;;  %v3584_v3 = vadd.f32 %v3582_v2, %v3580_v51 }
 0x716   : > { %v3410_v30 = vsel %vm3407_vm1, %v3409_v55, %v3405_v16 }
 0x717   : > { %v4513_v36 = vpop.eup %4512  ;;  %v3433_v20 = vsub.f32 1.0, %v3410_v30  ;;  %v3437_v0 = vmul.f32 %v3410_v30, %v6232_v7  ;;  %v3592_v42 = vmul.f32 %v3584_v3, %v6721_v58 }
 0x719   : > { %v3435_v18 = vmul.f32 %v4513_v36, %v3433_v20 }
 0x71b   : > { %v3439_v47 = vadd.f32 %v3437_v0, %v3435_v18 }
 0x71d   : > { %v3581_v1 = vmul.f32 %v3439_v47, %v6730_v37 }
 0x71f   : > { %v3585_v49 = vadd.f32 %v3583_v32, %v3581_v1 }
 0x721   : > { %v3593_v50 = vmul.f32 %v3585_v49, %v6730_v37  ;;  %v6747_v37 = vld [vmem:[#allocation77_spill] sm:$0xff] }
 0x722   : > { %v2392_v23 = vmul.f32 %v6747_v37, %v5798_v53  ;;  %v3292_v53 = vmul.f32 %v6230_v21, %v5507_v13 }
 0x723   : > { %v3595_v28 = vadd.f32 %v3593_v50, %v3295_v22 }
 0x724   : > { %v2394_v11 = vadd.f32 %v2392_v23, %v2062_v25 }
 0x726   : > { %v2694_v39 = vadd.f32 %v2692_v24, %v2394_v11 }
 0x728   : > { %v2994_v45 = vadd.f32 %v2992_v57, %v2694_v39 }
 0x72a   : > { %v3294_v41 = vadd.f32 %v3292_v53, %v2994_v45 }
 0x72c   : > { %v3594_v34 = vadd.f32 %v3592_v42, %v3294_v41 }
 0x754   : > { %v3607_v43 = vpop.permute.xlu2 %3606 }
 0x755   : > { %v3611_v31 = vsel %vm531_vm0, %v3595_v28, %v3607_v43 }
 0x75c   : > { %v3620_v9 = vpop.permute.xlu2 %3619 }
 0x75d   : > { %v3623_v7 = vmul.f32 %v3620_v9, %v3611_v31 }
 0x75f   : > { %3626 = vst.msk [vmem:[%s439_s18 + $0x8] sm:$0xff] %vm3624_vm2, %v3623_v7 }
 0x764   : > { %v3605_v8 = vpop.permute.xlu1 %3604 }
 0x765   : > { %v3610_v35 = vsel %vm531_vm0, %v3594_v34, %v3605_v8 }
 0x76c   : > { %v3615_v4 = vpop.permute.xlu1 %3614 }
 0x76d   : > { %v3622_v13 = vmul.f32 %v3615_v4, %v3610_v35 }
 0x76f   : > { %3625 = vst.msk [vmem:[%s439_s18] sm:$0xff] %vm3624_vm2, %v3622_v13 }
 0x770   : > { %4591 = shalt.err (!%p4588_p7)
}
 0x771   : > { %s4637_s17 = smov 128   ;;  %s4638_s18 = smov 8  }
 0x772   : > { %4111 = dma.vmem_to_hbm [thread:$0]  (%p4723_p6), %s3641_s13, 256, %s3643_s25, %s3628_s9, %s4637_s17, %s4637_s17, %s4638_s18  }
 0x773 PF: > { %s3657_s23 = sand.u32 1, %s4614_s27   ;;  %p4114_p10 = pnand %p3737_p9, %p4727_p8 }
 0x774   : > { %s3658_s24 = scalar_lea.sflag [#allocation4], %s3657_s23 }
 0x775   : > { %p4115_p11 = pneg %p4114_p10 }
 0x777   : > { %4609 = dma.done.wait (%p4115_p11), %s3658_s24, 256  }
 0x778   : > { %4611 = vsyncadd (%p4115_p11), %s3658_s24, 4294967040  ;;  %p18_p12 = scmp.ge.s32.totalorder %s4709_s11, 4   ;;  %s6749_s27 = smov %s4618_s28 }
 0x779   : > { %s6750_s28 = smov %s4622_s29  ;;  %s6751_s29 = smov %s4721_s14 }
 0x77a   : > { %s6752_s30 = smov %s4709_s11  ;;  %20 = sbr.rel (!%p18_p12) target bundleno = 3 (0x3), region = 154 }
 0x77f   :  { %3664 = vsyncpa [#allocation4], 1 }
 0x780   :  { %3666 = vsyncpa [#allocation4 + $0x1], 1 }

</bundles_post_ra>
